<compile_context>
chip_gen: v7x
topology: tpu7x:2x2x1
jax: 0.10.0
libtpu: 0.0.40
codegen_flags: <defaults>
</compile_context>

<pallas_src>
import functools
import math

import jax
import jax.numpy as jnp
from jax.experimental import pallas as pl
from jax.experimental.pallas import tpu as pltpu

PAD_IDX = 0.0                    # padding value used by pad_sequence
NEG_INF = -1e30                  # "-inf" for max-pool padding (bf16 safe)

# ---- generation-gated VMEM budget -----------------------------------------
try:
    _PHYS_VMEM = int(pltpu.get_tpu_info().vmem_capacity_bytes)
    if not _PHYS_VMEM or _PHYS_VMEM <= 0:
        raise ValueError
except Exception:
    _PHYS_VMEM = 64 * 1024 * 1024          # v7x-conservative fallback

VMEM_LIMIT = min(100 * 1024 * 1024, _PHYS_VMEM * 3 // 4)   # scoped-VMEM limit
VMEM_BUDGET = VMEM_LIMIT * 4 // 5                          # what we plan to use

M_TILE_CAP = 1024   # max pseudo-rows of a single image per grid step
TARGET_M = 1024     # target pseudo-rows of MXU work per grid step (G * tm)
MAX_GROUP = 32      # cap on images packed into one grid step (kernel-body size)


def _round_up(x, m):
    return ((x + m - 1) // m) * m


def _cdiv(a, b):
    return (a + b - 1) // b


# --------------------------------------------------------------------------
# Pallas kernels
# --------------------------------------------------------------------------

def _conv_gemm_kernel(a_ref, w_ref, shift_ref, o_ref, *scratch,
                      taps, cin, tm, gpb, relu):
    """Implicit-GEMM conv + folded-BN shift + optional ReLU.

    a_ref:     (gpb, nph, L, cin)    bf16 flattened (phase-split) input slabs
    w_ref:     (n_taps*cin, tco)     bf16, BN scale pre-folded into weights
    shift_ref: (1, tco)              f32  (BN shift + conv bias)
    o_ref:     (gpb, tm, tco)        bf16
    scratch[0] (multi-tap only): (nbuf, tm, n_taps*cin) bf16 LHS gather buffer.
    One single big-K dot per image (MXU accumulates internally).
    """
    m0 = pl.multiple_of(pl.program_id(2) * tm, 8)
    if len(taps) == 1:
        ph, off = taps[0]
        for g in range(gpb):
            a = a_ref[g, ph, pl.ds(off + m0, tm), :]              # (tm, cin)
            out = jnp.dot(a, w_ref[...], preferred_element_type=jnp.float32)
            out = out + shift_ref[...]
            if relu:
                out = jnp.maximum(out, 0.0)
            o_ref[g] = out.astype(o_ref.dtype)
    else:
        lhs_ref = scratch[0]
        nbuf = lhs_ref.shape[0]
        for g in range(gpb):
            buf = g % nbuf
            for t, (ph, off) in enumerate(taps):
                lhs_ref[buf, :, t * cin:(t + 1) * cin] = \
                    a_ref[g, ph, pl.ds(off + m0, tm), :]
            out = jnp.dot(lhs_ref[buf], w_ref[...],
                          preferred_element_type=jnp.float32)
            out = out + shift_ref[...]
            if relu:
                out = jnp.maximum(out, 0.0)
            o_ref[g] = out.astype(o_ref.dtype)


def _maxpool_window_kernel(a_ref, o_ref, *, taps, tm, gpb):
    """Fused 3x3/stride-2 max-pool over the flattened phase slab, G images/step."""
    m0 = pl.multiple_of(pl.program_id(1) * tm, 8)
    for g in range(gpb):
        res = None
        for ph, off in taps:
            v = a_ref[g, ph, pl.ds(off + m0, tm), :]
            res = v if res is None else jnp.maximum(res, v)
        o_ref[g] = res


def _add_relu_kernel(a_ref, b_ref, o_ref):
    o_ref[...] = jnp.maximum(a_ref[...] + b_ref[...], 0.0).astype(o_ref.dtype)


def _gap_kernel(x_ref, o_ref, *, inv):
    s = jnp.sum(x_ref[...].astype(jnp.float32), axis=1, keepdims=True)
    o_ref[...] = (s * inv).astype(o_ref.dtype)


def _maxpool1d_kernel(x_ref, o_ref):
    o_ref[0] = jnp.maximum(x_ref[0, :, 0, :], x_ref[0, :, 1, :])


# --------------------------------------------------------------------------
# Implicit-GEMM geometry helpers
# --------------------------------------------------------------------------

def _phase_flatten(x, kh, kw, s, pad, pad_value):
    """Pad + phase-split (space-to-depth by stride) + flatten spatially.

    x: (N, H, W, C).  Returns (xflat, geom) with xflat: (N, s*s, Hq*Wq, C).
    For kernel tap (i, j), slab row m+off of phase (i%s)*s + (j%s) holds the
    input pixel needed by flattened pseudo-output row m, where pseudo-output
    is (Ho, Wq) row-major and columns wo >= Wo are garbage.
    """
    N, H, W, C = x.shape
    Ho = (H + 2 * pad - kh) // s + 1
    Wo = (W + 2 * pad - kw) // s + 1
    Hq = (kh - 1) // s + Ho
    Wq = (kw - 1) // s + Wo
    eh = s * Hq - H - pad
    ew = s * Wq - W - pad
    assert eh >= 0 and ew >= 0, (eh, ew)
    xp = jnp.pad(x, ((0, 0), (pad, eh), (pad, ew), (0, 0)),
                 constant_values=pad_value)
    if s == 1:
        xflat = xp.reshape(N, 1, Hq * Wq, C)
    else:
        xp = xp.reshape(N, Hq, s, Wq, s, C).transpose(0, 2, 4, 1, 3, 5)
        xflat = xp.reshape(N, s * s, Hq * Wq, C)
    halo = ((kh - 1) // s) * Wq + (kw - 1) // s
    taps = [((i % s) * s + (j % s), (i // s) * Wq + (j // s))
            for i in range(kh) for j in range(kw)]
    return xflat, dict(Ho=Ho, Wo=Wo, Wq=Wq, Mps=Ho * Wq, halo=halo, taps=taps)


def _im2col(x, kh, kw, s, pad):
    """XLA im2col (stem conv only: Cin is tiny so a slab would waste 16x lanes)."""
    N, H, W, C = x.shape
    Ho = (H + 2 * pad - kh) // s + 1
    Wo = (W + 2 * pad - kw) // s + 1
    xp = jnp.pad(x, ((0, 0), (pad, pad), (pad, pad), (0, 0)))
    cols = []
    for i in range(kh):
        for j in range(kw):
            cols.append(xp[:, i:i + (Ho - 1) * s + 1:s,
                           j:j + (Wo - 1) * s + 1:s, :])
    return jnp.concatenate(cols, axis=-1)              # (N, Ho, Wo, kh*kw*C)


def _choose_tiles(Mps, N, *, nph, cp, K, tco, halo, single_tap):
    """Pick (tm, nmb, G) under the per-generation VMEM budget."""
    def need(tm, nmb, G):
        L = halo + tm * nmb
        nbuf = 2 if G > 1 else 1
        slab = 2 * G * nph * L * cp * 2         # double-buffered activation slab
        wbuf = 2 * K * tco * 2                  # double-buffered weight tile
        outb = 2 * G * tm * tco * 2             # double-buffered output tile
        lhs = 0 if single_tap else nbuf * tm * K * 2
        accf = 2 * tm * tco * 4                 # f32 matmul-result temporaries
        return slab + wbuf + outb + lhs + accf + (1 << 16)

    nmb = _cdiv(Mps, M_TILE_CAP)
    tm = _round_up(_cdiv(Mps, nmb), 8)
    G = 1
    if nmb == 1:
        G = max(1, min(N, MAX_GROUP, TARGET_M // tm))
        while G > 1 and need(tm, nmb, G) > VMEM_BUDGET:
            G -= 1
    while need(tm, nmb, G) > VMEM_BUDGET and tm > 8:
        nmb += 1
        tm = _round_up(_cdiv(Mps, nmb), 8)
    return tm, nmb, G


# --------------------------------------------------------------------------
# Conv / pool / elementwise wrappers
# --------------------------------------------------------------------------

def _conv_core(x, wmat, shift, kh, kw, s, pad, relu):
    """Run the implicit-GEMM conv kernel over NHWC bf16 `x` with a flat
    (kh*kw*Cp, Cout) weight matrix (BN scale already folded)."""
    x = x.astype(jnp.bfloat16)
    N = x.shape[0]
    Cp = x.shape[-1]
    K, Cout = wmat.shape
    ntaps = kh * kw
    assert K == ntaps * Cp
    if ntaps > 1:
        assert Cp % 128 == 0, Cp

    wmat = wmat.astype(jnp.bfloat16)
    shift = shift.reshape(1, Cout).astype(jnp.float32)

    xflat, g = _phase_flatten(x, kh, kw, s, pad, 0.0)
    nph = s * s
    Mps, halo, taps = g['Mps'], g['halo'], g['taps']
    Ho, Wo, Wq = g['Ho'], g['Wo'], g['Wq']

    tco = min(Cout, 512)
    assert Cout % tco == 0, (Cout, tco)
    ncb = Cout // tco

    tm, nmb, G = _choose_tiles(Mps, N, nph=nph, cp=Cp, K=K, tco=tco, halo=halo,
                               single_tap=(ntaps == 1))
    Mp = tm * nmb
    L = halo + Mp
    cur = xflat.shape[2]
    assert L >= cur, (L, cur)
    ngrp = _cdiv(N, G)
    Npad = ngrp * G
    xflat = jnp.pad(xflat, ((0, Npad - N), (0, 0), (0, L - cur), (0, 0)))

    scratch = []
    if ntaps > 1:
        nbuf = 2 if G > 1 else 1
        scratch = [pltpu.VMEM((nbuf, tm, K), jnp.bfloat16)]

    flops = 2 * N * Mps * K * Cout
    bytes_accessed = (xflat.size + wmat.size * ncb + Npad * Mp * Cout) * 2 \
        + shift.size * 4

    out = pl.pallas_call(
        functools.partial(_conv_gemm_kernel, taps=taps, cin=Cp, tm=tm,
                          gpb=G, relu=relu),
        out_shape=jax.ShapeDtypeStruct((Npad, Mp, Cout), jnp.bfloat16),
        grid=(ngrp, ncb, nmb),
        in_specs=[
            # whole per-group slab; revisited (no re-DMA) across the cb/mb axes
            pl.BlockSpec((G, nph, L, Cp), lambda n, cb, mb: (n, 0, 0, 0)),
            pl.BlockSpec((K, tco), lambda n, cb, mb: (0, cb)),
            pl.BlockSpec((1, tco), lambda n, cb, mb: (0, cb)),
        ],
        out_specs=pl.BlockSpec((G, tm, tco), lambda n, cb, mb: (n, mb, cb)),
        scratch_shapes=scratch,
        compiler_params=pltpu.CompilerParams(
            dimension_semantics=("parallel", "parallel", "parallel"),
            vmem_limit_bytes=VMEM_LIMIT),
        cost_estimate=pl.CostEstimate(flops=flops, transcendentals=0,
                                      bytes_accessed=bytes_accessed),
    )(xflat, wmat, shift)

    out = out[:N, :Mps, :].reshape(N, Ho, Wq, Cout)[:, :, :Wo, :]
    return out


def conv2d_bn_act(x, p, stride, pad, relu):
    """Conv2d (optional bias) + BatchNorm(eval) + optional ReLU on NHWC bf16.

    x: (N, H, W, Cin).  p['w']: (Cout, Cin, kh, kw) f32.
    Returns (N, Ho, Wo, Cout) bf16.
    """
    w = p['w']
    Cout, Cin, kh, kw = w.shape
    N, H, W, C = x.shape
    assert C == Cin, (C, Cin)

    # Fold eval-mode BN (and conv bias) into per-channel scale / shift; the
    # scale goes into the weights so the epilogue is a single add (+ ReLU).
    scale = p['gamma'] * jax.lax.rsqrt(p['var'] + 1e-5)
    shift = p['beta'] - p['mean'] * scale
    if 'b' in p:
        shift = shift + p['b'] * scale
    wtap = jnp.transpose(w, (2, 3, 1, 0)).reshape(kh * kw, Cin, Cout)
    wtap = wtap * scale[None, None, :]

    if kh * kw > 1 and Cin < 16:
        # Stem conv: XLA im2col -> plain GEMM (avoids the 8-lane slab layout).
        ximg = _im2col(x, kh, kw, stride, pad)       # (N, Ho, Wo, kh*kw*Cin)
        K0 = kh * kw * Cin
        Kp = _round_up(K0, 8)
        if Kp != K0:
            ximg = jnp.pad(ximg, ((0, 0), (0, 0), (0, 0), (0, Kp - K0)))
        wmat = jnp.pad(wtap.reshape(K0, Cout), ((0, Kp - K0), (0, 0)))
        return _conv_core(ximg, wmat, shift, 1, 1, 1, 0, relu)

    if kh == 1 and kw == 1 and stride > 1:
        # 1x1 strided (downsample) conv: just subsample, no phase split needed.
        x = x[:, ::stride, ::stride, :]
        stride = 1

    # Pad Cin to a multiple of 128 so tap copies and the GEMM are lane-aligned.
    Cp = _round_up(Cin, 128)
    if Cp != Cin:
        x = jnp.pad(x, ((0, 0), (0, 0), (0, 0), (0, Cp - Cin)))
        wtap = jnp.pad(wtap, ((0, 0), (0, Cp - Cin), (0, 0)))
    wmat = wtap.reshape(kh * kw * Cp, Cout)
    return _conv_core(x, wmat, shift, kh, kw, stride, pad, relu)


def maxpool2d_3x3_s2_p1(x):
    """Fused nn.MaxPool2d(3, stride=2, padding=1) on NHWC bf16 input."""
    # TODO(synk): fuse this into the stem conv's GEMM epilogue to remove one
    # full activation round-trip (needs the whole image per tile).
    N, H, W, C = x.shape
    xflat, g = _phase_flatten(x, 3, 3, 2, 1, pad_value=NEG_INF)
    Mps, halo, taps = g['Mps'], g['halo'], g['taps']
    nmb = _cdiv(Mps, M_TILE_CAP)
    tm = _round_up(_cdiv(Mps, nmb), 8)
    Mp = tm * nmb
    L = halo + Mp
    G = 1
    if nmb == 1:
        G = max(1, min(N, MAX_GROUP, TARGET_M // tm))
        while G > 1 and 2 * G * (4 * L + tm) * C * 2 > VMEM_BUDGET:
            G -= 1
    ngrp = _cdiv(N, G)
    Npad = ngrp * G
    cur = xflat.shape[2]
    xflat = jnp.pad(xflat, ((0, Npad - N), (0, 0), (0, L - cur), (0, 0)),
                    constant_values=NEG_INF)
    out = pl.pallas_call(
        functools.partial(_maxpool_window_kernel, taps=taps, tm=tm, gpb=G),
        out_shape=jax.ShapeDtypeStruct((Npad, Mp, C), x.dtype),
        grid=(ngrp, nmb),
        in_specs=[pl.BlockSpec((G, 4, L, C), lambda n, mb: (n, 0, 0, 0))],
        out_specs=pl.BlockSpec((G, tm, C), lambda n, mb: (n, mb, 0)),
        compiler_params=pltpu.CompilerParams(
            dimension_semantics=("parallel", "parallel"),
            vmem_limit_bytes=VMEM_LIMIT),
    )(xflat)
    return out[:N, :Mps, :].reshape(N, g['Ho'], g['Wq'], C)[:, :, :g['Wo'], :]


def add_relu(a, b):
    """Residual add + ReLU (BasicBlock tail), several images per grid step."""
    # TODO(synk): chain the pseudo-row layout between convs so the residual
    # add lives in the second conv's GEMM epilogue without an extra XLA pad.
    N, H, W, C = a.shape
    per = H * W * C * a.dtype.itemsize
    G = 1
    for d in range(1, N + 1):
        if N % d == 0 and 6 * d * per <= VMEM_BUDGET // 4:
            G = d
    spec = pl.BlockSpec((G, H, W, C), lambda n: (n, 0, 0, 0))
    return pl.pallas_call(
        _add_relu_kernel,
        out_shape=jax.ShapeDtypeStruct(a.shape, a.dtype),
        grid=(N // G,),
        in_specs=[spec, spec],
        out_specs=spec,
        compiler_params=pltpu.CompilerParams(
            dimension_semantics=("parallel",), vmem_limit_bytes=VMEM_LIMIT),
    )(a, b)


def global_avg_pool(x):
    """Adaptive avg pool to (1,1) + flatten: (N, H, W, C) -> (N, C)."""
    N, H, W, C = x.shape
    x2 = x.reshape(N, H * W, C)
    per = H * W * C * x.dtype.itemsize
    G = 1
    for d in range(1, N + 1):
        if N % d == 0 and 4 * d * per <= VMEM_BUDGET // 4:
            G = d
    out = pl.pallas_call(
        functools.partial(_gap_kernel, inv=1.0 / (H * W)),
        out_shape=jax.ShapeDtypeStruct((N, 1, C), x.dtype),
        grid=(N // G,),
        in_specs=[pl.BlockSpec((G, H * W, C), lambda n: (n, 0, 0))],
        out_specs=pl.BlockSpec((G, 1, C), lambda n: (n, 0, 0)),
        compiler_params=pltpu.CompilerParams(
            dimension_semantics=("parallel",), vmem_limit_bytes=VMEM_LIMIT),
    )(x2)
    return out.reshape(N, C)


def maxpool1d_2(x):
    """nn.MaxPool1d(kernel_size=2, ceil_mode=False) on channels-last (B, T, C)."""
    B, T, C = x.shape
    To = T // 2
    x4 = x[:, :2 * To, :].reshape(B, To, 2, C)
    return pl.pallas_call(
        _maxpool1d_kernel,
        out_shape=jax.ShapeDtypeStruct((B, To, C), x.dtype),
        grid=(B,),
        in_specs=[pl.BlockSpec((1, To, 2, C), lambda b: (b, 0, 0, 0))],
        out_specs=pl.BlockSpec((1, To, C), lambda b: (b, 0, 0)),
        compiler_params=pltpu.CompilerParams(
            dimension_semantics=("parallel",), vmem_limit_bytes=VMEM_LIMIT),
    )(x4)


# --------------------------------------------------------------------------
# Parameter init (deterministic; stands in for the pretrained checkpoint)
# --------------------------------------------------------------------------

def init_conv_bn(key, cin, cout, k, bias=False, dims=2):
    k1, k2, k3, k4 = jax.random.split(key, 4)
    if dims == 2:
        wshape = (cout, cin, k, k)
        fan_in = cin * k * k
    else:
        wshape = (cout, cin, k)
        fan_in = cin * k
    p = {
        'w': jax.random.normal(k1, wshape, jnp.float32) / math.sqrt(fan_in),
        'gamma': 1.0 + 0.1 * jax.random.normal(k2, (cout,), jnp.float32),
        'beta': 0.1 * jax.random.normal(k3, (cout,), jnp.float32),
        'mean': jnp.zeros((cout,), jnp.float32),
        'var': jnp.ones((cout,), jnp.float32),
    }
    if bias:
        p['b'] = 0.1 * jax.random.normal(k4, (cout,), jnp.float32)
    return p


def init_resnet18(key):
    keys = iter(jax.random.split(key, 64))
    params = {'conv1': init_conv_bn(next(keys), 3, 64, 7)}
    layers = []
    in_ch = 64
    for ch, stride in zip([64, 128, 256, 512], [1, 2, 2, 2]):
        blocks = []
        for bi in range(2):
            s = stride if bi == 0 else 1
            blk = {
                'conv1': init_conv_bn(next(keys), in_ch, ch, 3),
                'conv2': init_conv_bn(next(keys), ch, ch, 3),
            }
            if s != 1 or in_ch != ch:
                blk['down'] = init_conv_bn(next(keys), in_ch, ch, 1)
            blocks.append(blk)
            in_ch = ch
        layers.append(blocks)
    params['layers'] = layers
    return params


def init_feature_extracter(key):
    k_res, k_t1, k_t2 = jax.random.split(key, 3)
    return {
        'resnet': init_resnet18(k_res),
        'tconv': {
            'k1': init_conv_bn(k_t1, 512, 1024, 5, bias=True, dims=1),
            'k2': init_conv_bn(k_t2, 1024, 1024, 5, bias=True, dims=1),
        },
    }


# --------------------------------------------------------------------------
# Forward passes
# --------------------------------------------------------------------------

def resnet18_forward(params, x):
    # x: (total_frames, 3, H, W) f32 NCHW -> (total_frames, 512) bf16
    x = jnp.transpose(x, (0, 2, 3, 1)).astype(jnp.bfloat16)     # NCHW -> NHWC once
    x = conv2d_bn_act(x, params['conv1'], stride=2, pad=3, relu=True)
    x = maxpool2d_3x3_s2_p1(x)
    for layer, stride in zip(params['layers'], [1, 2, 2, 2]):
        for bi, blk in enumerate(layer):
            s = stride if bi == 0 else 1
            identity = x
            out = conv2d_bn_act(x, blk['conv1'], stride=s, pad=1, relu=True)
            out = conv2d_bn_act(out, blk['conv2'], stride=1, pad=1, relu=False)
            if 'down' in blk:
                identity = conv2d_bn_act(x, blk['down'], stride=s, pad=0, relu=False)
            x = add_relu(out, identity)
    return global_avg_pool(x)          # (total_frames, 512); fc = Identity


def pad_sequence_jax(x, lengths, pad_value=PAD_IDX):
    # x: (sum(lengths), D) -> (B, T_max, D), batch_first=True
    # (host-side loop over lengths; retraces per distinct length tuple)
    T = max(lengths)
    outs, start = [], 0
    for L in lengths:
        seq = x[start:start + L]
        outs.append(jnp.pad(seq, ((0, T - L), (0, 0)), constant_values=pad_value))
        start += L
    return jnp.stack(outs, axis=0)


def temporal_conv_forward(params, x):
    # x: (B, T, 512) bf16 -> (B, T_out, 1024)   (conv_type=2: K5, P2, K5, P2)
    def conv1d(x3, p):
        p2 = dict(p)
        p2['w'] = p['w'][:, :, None, :]                   # (O, C, 1, K)
        y = conv2d_bn_act(x3[:, None, :, :], p2, stride=1, pad=0, relu=True)
        return y[:, 0]                                    # (B, To, O)

    x = conv1d(x, params['k1'])
    x = maxpool1d_2(x)
    x = conv1d(x, params['k2'])
    x = maxpool1d_2(x)
    return x


def feature_extracter_forward(params, src, src_length_batch):
    feats = resnet18_forward(params['resnet'], src)        # (sum(L), 512) bf16
    x = pad_sequence_jax(feats, src_length_batch)          # (B, T_max, 512)
    out = temporal_conv_forward(params['tconv'], x)        # (B, T_out, 1024)
    return out.astype(jnp.float32)


# --------------------------------------------------------------------------

if __name__ == "__main__":
    key = jax.random.PRNGKey(0)
    k_params, k_x = jax.random.split(key)

    params = init_feature_extracter(k_params)

    # small but TemporalConv-compatible sequence lengths (needs T_max >= 16)
    src_length_batch = [16, 12]
    total_frames = sum(src_length_batch)
    src = jax.random.normal(k_x, (total_frames, 3, 16, 16), jnp.float32)

    out = feature_extracter_forward(params, src, src_length_batch)
    out = jax.block_until_ready(out)

    assert out.shape == (2, 1, 1024), out.shape
    assert bool(jnp.all(jnp.isfinite(out)))
    print("KERNEL_OK")
</pallas_src>

<mosaic_0001>
module attributes {stable_mosaic.version = 11 : i64} {
  func.func @_conv_gemm_kernel(%arg0: i32, %arg1: i32, %arg2: i32, %arg3: memref<16x1x64x152xbf16, #tpu.memory_space<vmem>>, %arg4: memref<152x64xbf16, #tpu.memory_space<vmem>>, %arg5: memref<1x64xf32, #tpu.memory_space<vmem>>, %arg6: memref<16x64x64xbf16, #tpu.memory_space<vmem>>) attributes {dimension_semantics = [#tpu.dimension_semantics<parallel>, #tpu.dimension_semantics<parallel>, #tpu.dimension_semantics<parallel>], iteration_bounds = array<i64: 2, 1, 1>, scalar_prefetch = 0 : i64, scratch_operands = 0 : i64, tpu.core_type = #tpu.core_type<tc>, window_params = [{transform_indices = @transform_0, window_bounds = array<i64: 16, 1, 64, 152>}, {transform_indices = @transform_1, window_bounds = array<i64: 152, 64>}, {transform_indices = @transform_2, window_bounds = array<i64: 1, 64>}, {transform_indices = @transform_3, window_bounds = array<i64: 16, 64, 64>}]} {
    %c64_i32 = arith.constant 64 : i32
    %0 = arith.muli %arg2, %c64_i32 : i32
    %1 = tpu.assume_multiple %0, 8 : i32
    %c0_i32 = arith.constant 0 : i32
    %2 = arith.addi %c0_i32, %1 : i32
    %c0 = arith.constant 0 : index
    %c0_0 = arith.constant 0 : index
    %3 = arith.index_cast %2 : i32 to index
    %c0_1 = arith.constant 0 : index
    %4 = vector.load %arg3[%c0, %c0_0, %3, %c0_1] : memref<16x1x64x152xbf16, #tpu.memory_space<vmem>>, vector<1x1x64x152xbf16>
    %5 = vector.shape_cast %4 : vector<1x1x64x152xbf16> to vector<64x152xbf16>
    %c0_2 = arith.constant 0 : index
    %c0_3 = arith.constant 0 : index
    %6 = vector.load %arg4[%c0_2, %c0_3] : memref<152x64xbf16, #tpu.memory_space<vmem>>, vector<152x64xbf16>
    %cst = arith.constant dense<0.000000e+00> : vector<64x64xf32>
    %7 = tpu.matmul %5, %6, %cst {dimension_numbers = #tpu.dot_dimension_numbers<[1], [0], [0], [1], [0, 0, 1, 1], [], []>} : vector<64x152xbf16>, vector<152x64xbf16>, vector<64x64xf32> -> vector<64x64xf32>
    %c0_4 = arith.constant 0 : index
    %c0_5 = arith.constant 0 : index
    %8 = vector.load %arg5[%c0_4, %c0_5] : memref<1x64xf32, #tpu.memory_space<vmem>>, vector<1x64xf32>
    %9 = vector.broadcast %8 : vector<1x64xf32> to vector<64x64xf32>
    %10 = arith.addf %7, %9 : vector<64x64xf32>
    %cst_6 = arith.constant 0.000000e+00 : f32
    %11 = vector.broadcast %cst_6 : f32 to vector<64x64xf32>
    %12 = arith.maximumf %10, %11 : vector<64x64xf32>
    %13 = arith.truncf %12 : vector<64x64xf32> to vector<64x64xbf16>
    %c0_7 = arith.constant 0 : index
    %c0_8 = arith.constant 0 : index
    %c0_9 = arith.constant 0 : index
    %14 = vector.load %arg6[%c0_7, %c0_8, %c0_9] : memref<16x64x64xbf16, #tpu.memory_space<vmem>>, vector<1x64x64xbf16>
    %15 = vector.shape_cast %14 : vector<1x64x64xbf16> to vector<64x64xbf16>
    %16 = vector.shape_cast %13 : vector<64x64xbf16> to vector<1x64x64xbf16>
    tpu.vector_store %arg6[%c0_7, %c0_8, %c0_9], %16 {strides = array<i32>} : memref<16x64x64xbf16, #tpu.memory_space<vmem>>, vector<1x64x64xbf16>,
    %c0_i32_10 = arith.constant 0 : i32
    %17 = arith.addi %c0_i32_10, %1 : i32
    %c1 = arith.constant 1 : index
    %c0_11 = arith.constant 0 : index
    %18 = arith.index_cast %17 : i32 to index
    %c0_12 = arith.constant 0 : index
    %19 = vector.load %arg3[%c1, %c0_11, %18, %c0_12] : memref<16x1x64x152xbf16, #tpu.memory_space<vmem>>, vector<1x1x64x152xbf16>
    %20 = vector.shape_cast %19 : vector<1x1x64x152xbf16> to vector<64x152xbf16>
    %c0_13 = arith.constant 0 : index
    %c0_14 = arith.constant 0 : index
    %21 = vector.load %arg4[%c0_13, %c0_14] : memref<152x64xbf16, #tpu.memory_space<vmem>>, vector<152x64xbf16>
    %cst_15 = arith.constant dense<0.000000e+00> : vector<64x64xf32>
    %22 = tpu.matmul %20, %21, %cst_15 {dimension_numbers = #tpu.dot_dimension_numbers<[1], [0], [0], [1], [0, 0, 1, 1], [], []>} : vector<64x152xbf16>, vector<152x64xbf16>, vector<64x64xf32> -> vector<64x64xf32>
    %c0_16 = arith.constant 0 : index
    %c0_17 = arith.constant 0 : index
    %23 = vector.load %arg5[%c0_16, %c0_17] : memref<1x64xf32, #tpu.memory_space<vmem>>, vector<1x64xf32>
    %24 = vector.broadcast %23 : vector<1x64xf32> to vector<64x64xf32>
    %25 = arith.addf %22, %24 : vector<64x64xf32>
    %cst_18 = arith.constant 0.000000e+00 : f32
    %26 = vector.broadcast %cst_18 : f32 to vector<64x64xf32>
    %27 = arith.maximumf %25, %26 : vector<64x64xf32>
    %28 = arith.truncf %27 : vector<64x64xf32> to vector<64x64xbf16>
    %c1_19 = arith.constant 1 : index
    %c0_20 = arith.constant 0 : index
    %c0_21 = arith.constant 0 : index
    %29 = vector.load %arg6[%c1_19, %c0_20, %c0_21] : memref<16x64x64xbf16, #tpu.memory_space<vmem>>, vector<1x64x64xbf16>
    %30 = vector.shape_cast %29 : vector<1x64x64xbf16> to vector<64x64xbf16>
    %31 = vector.shape_cast %28 : vector<64x64xbf16> to vector<1x64x64xbf16>
    tpu.vector_store %arg6[%c1_19, %c0_20, %c0_21], %31 {strides = array<i32>} : memref<16x64x64xbf16, #tpu.memory_space<vmem>>, vector<1x64x64xbf16>,
    %c0_i32_22 = arith.constant 0 : i32
    %32 = arith.addi %c0_i32_22, %1 : i32
    %c2 = arith.constant 2 : index
    %c0_23 = arith.constant 0 : index
    %33 = arith.index_cast %32 : i32 to index
    %c0_24 = arith.constant 0 : index
    %34 = vector.load %arg3[%c2, %c0_23, %33, %c0_24] : memref<16x1x64x152xbf16, #tpu.memory_space<vmem>>, vector<1x1x64x152xbf16>
    %35 = vector.shape_cast %34 : vector<1x1x64x152xbf16> to vector<64x152xbf16>
    %c0_25 = arith.constant 0 : index
    %c0_26 = arith.constant 0 : index
    %36 = vector.load %arg4[%c0_25, %c0_26] : memref<152x64xbf16, #tpu.memory_space<vmem>>, vector<152x64xbf16>
    %cst_27 = arith.constant dense<0.000000e+00> : vector<64x64xf32>
    %37 = tpu.matmul %35, %36, %cst_27 {dimension_numbers = #tpu.dot_dimension_numbers<[1], [0], [0], [1], [0, 0, 1, 1], [], []>} : vector<64x152xbf16>, vector<152x64xbf16>, vector<64x64xf32> -> vector<64x64xf32>
    %c0_28 = arith.constant 0 : index
    %c0_29 = arith.constant 0 : index
    %38 = vector.load %arg5[%c0_28, %c0_29] : memref<1x64xf32, #tpu.memory_space<vmem>>, vector<1x64xf32>
    %39 = vector.broadcast %38 : vector<1x64xf32> to vector<64x64xf32>
    %40 = arith.addf %37, %39 : vector<64x64xf32>
    %cst_30 = arith.constant 0.000000e+00 : f32
    %41 = vector.broadcast %cst_30 : f32 to vector<64x64xf32>
    %42 = arith.maximumf %40, %41 : vector<64x64xf32>
    %43 = arith.truncf %42 : vector<64x64xf32> to vector<64x64xbf16>
    %c2_31 = arith.constant 2 : index
    %c0_32 = arith.constant 0 : index
    %c0_33 = arith.constant 0 : index
    %44 = vector.load %arg6[%c2_31, %c0_32, %c0_33] : memref<16x64x64xbf16, #tpu.memory_space<vmem>>, vector<1x64x64xbf16>
    %45 = vector.shape_cast %44 : vector<1x64x64xbf16> to vector<64x64xbf16>
    %46 = vector.shape_cast %43 : vector<64x64xbf16> to vector<1x64x64xbf16>
    tpu.vector_store %arg6[%c2_31, %c0_32, %c0_33], %46 {strides = array<i32>} : memref<16x64x64xbf16, #tpu.memory_space<vmem>>, vector<1x64x64xbf16>,
    %c0_i32_34 = arith.constant 0 : i32
    %47 = arith.addi %c0_i32_34, %1 : i32
    %c3 = arith.constant 3 : index
    %c0_35 = arith.constant 0 : index
    %48 = arith.index_cast %47 : i32 to index
    %c0_36 = arith.constant 0 : index
    %49 = vector.load %arg3[%c3, %c0_35, %48, %c0_36] : memref<16x1x64x152xbf16, #tpu.memory_space<vmem>>, vector<1x1x64x152xbf16>
    %50 = vector.shape_cast %49 : vector<1x1x64x152xbf16> to vector<64x152xbf16>
    %c0_37 = arith.constant 0 : index
    %c0_38 = arith.constant 0 : index
    %51 = vector.load %arg4[%c0_37, %c0_38] : memref<152x64xbf16, #tpu.memory_space<vmem>>, vector<152x64xbf16>
    %cst_39 = arith.constant dense<0.000000e+00> : vector<64x64xf32>
    %52 = tpu.matmul %50, %51, %cst_39 {dimension_numbers = #tpu.dot_dimension_numbers<[1], [0], [0], [1], [0, 0, 1, 1], [], []>} : vector<64x152xbf16>, vector<152x64xbf16>, vector<64x64xf32> -> vector<64x64xf32>
    %c0_40 = arith.constant 0 : index
    %c0_41 = arith.constant 0 : index
    %53 = vector.load %arg5[%c0_40, %c0_41] : memref<1x64xf32, #tpu.memory_space<vmem>>, vector<1x64xf32>
    %54 = vector.broadcast %53 : vector<1x64xf32> to vector<64x64xf32>
    %55 = arith.addf %52, %54 : vector<64x64xf32>
    %cst_42 = arith.constant 0.000000e+00 : f32
    %56 = vector.broadcast %cst_42 : f32 to vector<64x64xf32>
    %57 = arith.maximumf %55, %56 : vector<64x64xf32>
    %58 = arith.truncf %57 : vector<64x64xf32> to vector<64x64xbf16>
    %c3_43 = arith.constant 3 : index
    %c0_44 = arith.constant 0 : index
    %c0_45 = arith.constant 0 : index
    %59 = vector.load %arg6[%c3_43, %c0_44, %c0_45] : memref<16x64x64xbf16, #tpu.memory_space<vmem>>, vector<1x64x64xbf16>
    %60 = vector.shape_cast %59 : vector<1x64x64xbf16> to vector<64x64xbf16>
    %61 = vector.shape_cast %58 : vector<64x64xbf16> to vector<1x64x64xbf16>
    tpu.vector_store %arg6[%c3_43, %c0_44, %c0_45], %61 {strides = array<i32>} : memref<16x64x64xbf16, #tpu.memory_space<vmem>>, vector<1x64x64xbf16>,
    %c0_i32_46 = arith.constant 0 : i32
    %62 = arith.addi %c0_i32_46, %1 : i32
    %c4 = arith.constant 4 : index
    %c0_47 = arith.constant 0 : index
    %63 = arith.index_cast %62 : i32 to index
    %c0_48 = arith.constant 0 : index
    %64 = vector.load %arg3[%c4, %c0_47, %63, %c0_48] : memref<16x1x64x152xbf16, #tpu.memory_space<vmem>>, vector<1x1x64x152xbf16>
    %65 = vector.shape_cast %64 : vector<1x1x64x152xbf16> to vector<64x152xbf16>
    %c0_49 = arith.constant 0 : index
    %c0_50 = arith.constant 0 : index
    %66 = vector.load %arg4[%c0_49, %c0_50] : memref<152x64xbf16, #tpu.memory_space<vmem>>, vector<152x64xbf16>
    %cst_51 = arith.constant dense<0.000000e+00> : vector<64x64xf32>
    %67 = tpu.matmul %65, %66, %cst_51 {dimension_numbers = #tpu.dot_dimension_numbers<[1], [0], [0], [1], [0, 0, 1, 1], [], []>} : vector<64x152xbf16>, vector<152x64xbf16>, vector<64x64xf32> -> vector<64x64xf32>
    %c0_52 = arith.constant 0 : index
    %c0_53 = arith.constant 0 : index
    %68 = vector.load %arg5[%c0_52, %c0_53] : memref<1x64xf32, #tpu.memory_space<vmem>>, vector<1x64xf32>
    %69 = vector.broadcast %68 : vector<1x64xf32> to vector<64x64xf32>
    %70 = arith.addf %67, %69 : vector<64x64xf32>
    %cst_54 = arith.constant 0.000000e+00 : f32
    %71 = vector.broadcast %cst_54 : f32 to vector<64x64xf32>
    %72 = arith.maximumf %70, %71 : vector<64x64xf32>
    %73 = arith.truncf %72 : vector<64x64xf32> to vector<64x64xbf16>
    %c4_55 = arith.constant 4 : index
    %c0_56 = arith.constant 0 : index
    %c0_57 = arith.constant 0 : index
    %74 = vector.load %arg6[%c4_55, %c0_56, %c0_57] : memref<16x64x64xbf16, #tpu.memory_space<vmem>>, vector<1x64x64xbf16>
    %75 = vector.shape_cast %74 : vector<1x64x64xbf16> to vector<64x64xbf16>
    %76 = vector.shape_cast %73 : vector<64x64xbf16> to vector<1x64x64xbf16>
    tpu.vector_store %arg6[%c4_55, %c0_56, %c0_57], %76 {strides = array<i32>} : memref<16x64x64xbf16, #tpu.memory_space<vmem>>, vector<1x64x64xbf16>,
    %c0_i32_58 = arith.constant 0 : i32
    %77 = arith.addi %c0_i32_58, %1 : i32
    %c5 = arith.constant 5 : index
    %c0_59 = arith.constant 0 : index
    %78 = arith.index_cast %77 : i32 to index
    %c0_60 = arith.constant 0 : index
    %79 = vector.load %arg3[%c5, %c0_59, %78, %c0_60] : memref<16x1x64x152xbf16, #tpu.memory_space<vmem>>, vector<1x1x64x152xbf16>
    %80 = vector.shape_cast %79 : vector<1x1x64x152xbf16> to vector<64x152xbf16>
    %c0_61 = arith.constant 0 : index
    %c0_62 = arith.constant 0 : index
    %81 = vector.load %arg4[%c0_61, %c0_62] : memref<152x64xbf16, #tpu.memory_space<vmem>>, vector<152x64xbf16>
    %cst_63 = arith.constant dense<0.000000e+00> : vector<64x64xf32>
    %82 = tpu.matmul %80, %81, %cst_63 {dimension_numbers = #tpu.dot_dimension_numbers<[1], [0], [0], [1], [0, 0, 1, 1], [], []>} : vector<64x152xbf16>, vector<152x64xbf16>, vector<64x64xf32> -> vector<64x64xf32>
    %c0_64 = arith.constant 0 : index
    %c0_65 = arith.constant 0 : index
    %83 = vector.load %arg5[%c0_64, %c0_65] : memref<1x64xf32, #tpu.memory_space<vmem>>, vector<1x64xf32>
    %84 = vector.broadcast %83 : vector<1x64xf32> to vector<64x64xf32>
    %85 = arith.addf %82, %84 : vector<64x64xf32>
    %cst_66 = arith.constant 0.000000e+00 : f32
    %86 = vector.broadcast %cst_66 : f32 to vector<64x64xf32>
    %87 = arith.maximumf %85, %86 : vector<64x64xf32>
    %88 = arith.truncf %87 : vector<64x64xf32> to vector<64x64xbf16>
    %c5_67 = arith.constant 5 : index
    %c0_68 = arith.constant 0 : index
    %c0_69 = arith.constant 0 : index
    %89 = vector.load %arg6[%c5_67, %c0_68, %c0_69] : memref<16x64x64xbf16, #tpu.memory_space<vmem>>, vector<1x64x64xbf16>
    %90 = vector.shape_cast %89 : vector<1x64x64xbf16> to vector<64x64xbf16>
    %91 = vector.shape_cast %88 : vector<64x64xbf16> to vector<1x64x64xbf16>
    tpu.vector_store %arg6[%c5_67, %c0_68, %c0_69], %91 {strides = array<i32>} : memref<16x64x64xbf16, #tpu.memory_space<vmem>>, vector<1x64x64xbf16>,
    %c0_i32_70 = arith.constant 0 : i32
    %92 = arith.addi %c0_i32_70, %1 : i32
    %c6 = arith.constant 6 : index
    %c0_71 = arith.constant 0 : index
    %93 = arith.index_cast %92 : i32 to index
    %c0_72 = arith.constant 0 : index
    %94 = vector.load %arg3[%c6, %c0_71, %93, %c0_72] : memref<16x1x64x152xbf16, #tpu.memory_space<vmem>>, vector<1x1x64x152xbf16>
    %95 = vector.shape_cast %94 : vector<1x1x64x152xbf16> to vector<64x152xbf16>
    %c0_73 = arith.constant 0 : index
    %c0_74 = arith.constant 0 : index
    %96 = vector.load %arg4[%c0_73, %c0_74] : memref<152x64xbf16, #tpu.memory_space<vmem>>, vector<152x64xbf16>
    %cst_75 = arith.constant dense<0.000000e+00> : vector<64x64xf32>
    %97 = tpu.matmul %95, %96, %cst_75 {dimension_numbers = #tpu.dot_dimension_numbers<[1], [0], [0], [1], [0, 0, 1, 1], [], []>} : vector<64x152xbf16>, vector<152x64xbf16>, vector<64x64xf32> -> vector<64x64xf32>
    %c0_76 = arith.constant 0 : index
    %c0_77 = arith.constant 0 : index
    %98 = vector.load %arg5[%c0_76, %c0_77] : memref<1x64xf32, #tpu.memory_space<vmem>>, vector<1x64xf32>
    %99 = vector.broadcast %98 : vector<1x64xf32> to vector<64x64xf32>
    %100 = arith.addf %97, %99 : vector<64x64xf32>
    %cst_78 = arith.constant 0.000000e+00 : f32
    %101 = vector.broadcast %cst_78 : f32 to vector<64x64xf32>
    %102 = arith.maximumf %100, %101 : vector<64x64xf32>
    %103 = arith.truncf %102 : vector<64x64xf32> to vector<64x64xbf16>
    %c6_79 = arith.constant 6 : index
    %c0_80 = arith.constant 0 : index
    %c0_81 = arith.constant 0 : index
    %104 = vector.load %arg6[%c6_79, %c0_80, %c0_81] : memref<16x64x64xbf16, #tpu.memory_space<vmem>>, vector<1x64x64xbf16>
    %105 = vector.shape_cast %104 : vector<1x64x64xbf16> to vector<64x64xbf16>
    %106 = vector.shape_cast %103 : vector<64x64xbf16> to vector<1x64x64xbf16>
    tpu.vector_store %arg6[%c6_79, %c0_80, %c0_81], %106 {strides = array<i32>} : memref<16x64x64xbf16, #tpu.memory_space<vmem>>, vector<1x64x64xbf16>,
    %c0_i32_82 = arith.constant 0 : i32
    %107 = arith.addi %c0_i32_82, %1 : i32
    %c7 = arith.constant 7 : index
    %c0_83 = arith.constant 0 : index
    %108 = arith.index_cast %107 : i32 to index
    %c0_84 = arith.constant 0 : index
    %109 = vector.load %arg3[%c7, %c0_83, %108, %c0_84] : memref<16x1x64x152xbf16, #tpu.memory_space<vmem>>, vector<1x1x64x152xbf16>
    %110 = vector.shape_cast %109 : vector<1x1x64x152xbf16> to vector<64x152xbf16>
    %c0_85 = arith.constant 0 : index
    %c0_86 = arith.constant 0 : index
    %111 = vector.load %arg4[%c0_85, %c0_86] : memref<152x64xbf16, #tpu.memory_space<vmem>>, vector<152x64xbf16>
    %cst_87 = arith.constant dense<0.000000e+00> : vector<64x64xf32>
    %112 = tpu.matmul %110, %111, %cst_87 {dimension_numbers = #tpu.dot_dimension_numbers<[1], [0], [0], [1], [0, 0, 1, 1], [], []>} : vector<64x152xbf16>, vector<152x64xbf16>, vector<64x64xf32> -> vector<64x64xf32>
    %c0_88 = arith.constant 0 : index
    %c0_89 = arith.constant 0 : index
    %113 = vector.load %arg5[%c0_88, %c0_89] : memref<1x64xf32, #tpu.memory_space<vmem>>, vector<1x64xf32>
    %114 = vector.broadcast %113 : vector<1x64xf32> to vector<64x64xf32>
    %115 = arith.addf %112, %114 : vector<64x64xf32>
    %cst_90 = arith.constant 0.000000e+00 : f32
    %116 = vector.broadcast %cst_90 : f32 to vector<64x64xf32>
    %117 = arith.maximumf %115, %116 : vector<64x64xf32>
    %118 = arith.truncf %117 : vector<64x64xf32> to vector<64x64xbf16>
    %c7_91 = arith.constant 7 : index
    %c0_92 = arith.constant 0 : index
    %c0_93 = arith.constant 0 : index
    %119 = vector.load %arg6[%c7_91, %c0_92, %c0_93] : memref<16x64x64xbf16, #tpu.memory_space<vmem>>, vector<1x64x64xbf16>
    %120 = vector.shape_cast %119 : vector<1x64x64xbf16> to vector<64x64xbf16>
    %121 = vector.shape_cast %118 : vector<64x64xbf16> to vector<1x64x64xbf16>
    tpu.vector_store %arg6[%c7_91, %c0_92, %c0_93], %121 {strides = array<i32>} : memref<16x64x64xbf16, #tpu.memory_space<vmem>>, vector<1x64x64xbf16>,
    %c0_i32_94 = arith.constant 0 : i32
    %122 = arith.addi %c0_i32_94, %1 : i32
    %c8 = arith.constant 8 : index
    %c0_95 = arith.constant 0 : index
    %123 = arith.index_cast %122 : i32 to index
    %c0_96 = arith.constant 0 : index
    %124 = vector.load %arg3[%c8, %c0_95, %123, %c0_96] : memref<16x1x64x152xbf16, #tpu.memory_space<vmem>>, vector<1x1x64x152xbf16>
    %125 = vector.shape_cast %124 : vector<1x1x64x152xbf16> to vector<64x152xbf16>
    %c0_97 = arith.constant 0 : index
    %c0_98 = arith.constant 0 : index
    %126 = vector.load %arg4[%c0_97, %c0_98] : memref<152x64xbf16, #tpu.memory_space<vmem>>, vector<152x64xbf16>
    %cst_99 = arith.constant dense<0.000000e+00> : vector<64x64xf32>
    %127 = tpu.matmul %125, %126, %cst_99 {dimension_numbers = #tpu.dot_dimension_numbers<[1], [0], [0], [1], [0, 0, 1, 1], [], []>} : vector<64x152xbf16>, vector<152x64xbf16>, vector<64x64xf32> -> vector<64x64xf32>
    %c0_100 = arith.constant 0 : index
    %c0_101 = arith.constant 0 : index
    %128 = vector.load %arg5[%c0_100, %c0_101] : memref<1x64xf32, #tpu.memory_space<vmem>>, vector<1x64xf32>
    %129 = vector.broadcast %128 : vector<1x64xf32> to vector<64x64xf32>
    %130 = arith.addf %127, %129 : vector<64x64xf32>
    %cst_102 = arith.constant 0.000000e+00 : f32
    %131 = vector.broadcast %cst_102 : f32 to vector<64x64xf32>
    %132 = arith.maximumf %130, %131 : vector<64x64xf32>
    %133 = arith.truncf %132 : vector<64x64xf32> to vector<64x64xbf16>
    %c8_103 = arith.constant 8 : index
    %c0_104 = arith.constant 0 : index
    %c0_105 = arith.constant 0 : index
    %134 = vector.load %arg6[%c8_103, %c0_104, %c0_105] : memref<16x64x64xbf16, #tpu.memory_space<vmem>>, vector<1x64x64xbf16>
    %135 = vector.shape_cast %134 : vector<1x64x64xbf16> to vector<64x64xbf16>
    %136 = vector.shape_cast %133 : vector<64x64xbf16> to vector<1x64x64xbf16>
    tpu.vector_store %arg6[%c8_103, %c0_104, %c0_105], %136 {strides = array<i32>} : memref<16x64x64xbf16, #tpu.memory_space<vmem>>, vector<1x64x64xbf16>,
    %c0_i32_106 = arith.constant 0 : i32
    %137 = arith.addi %c0_i32_106, %1 : i32
    %c9 = arith.constant 9 : index
    %c0_107 = arith.constant 0 : index
    %138 = arith.index_cast %137 : i32 to index
    %c0_108 = arith.constant 0 : index
    %139 = vector.load %arg3[%c9, %c0_107, %138, %c0_108] : memref<16x1x64x152xbf16, #tpu.memory_space<vmem>>, vector<1x1x64x152xbf16>
    %140 = vector.shape_cast %139 : vector<1x1x64x152xbf16> to vector<64x152xbf16>
    %c0_109 = arith.constant 0 : index
    %c0_110 = arith.constant 0 : index
    %141 = vector.load %arg4[%c0_109, %c0_110] : memref<152x64xbf16, #tpu.memory_space<vmem>>, vector<152x64xbf16>
    %cst_111 = arith.constant dense<0.000000e+00> : vector<64x64xf32>
    %142 = tpu.matmul %140, %141, %cst_111 {dimension_numbers = #tpu.dot_dimension_numbers<[1], [0], [0], [1], [0, 0, 1, 1], [], []>} : vector<64x152xbf16>, vector<152x64xbf16>, vector<64x64xf32> -> vector<64x64xf32>
    %c0_112 = arith.constant 0 : index
    %c0_113 = arith.constant 0 : index
    %143 = vector.load %arg5[%c0_112, %c0_113] : memref<1x64xf32, #tpu.memory_space<vmem>>, vector<1x64xf32>
    %144 = vector.broadcast %143 : vector<1x64xf32> to vector<64x64xf32>
    %145 = arith.addf %142, %144 : vector<64x64xf32>
    %cst_114 = arith.constant 0.000000e+00 : f32
    %146 = vector.broadcast %cst_114 : f32 to vector<64x64xf32>
    %147 = arith.maximumf %145, %146 : vector<64x64xf32>
    %148 = arith.truncf %147 : vector<64x64xf32> to vector<64x64xbf16>
    %c9_115 = arith.constant 9 : index
    %c0_116 = arith.constant 0 : index
    %c0_117 = arith.constant 0 : index
    %149 = vector.load %arg6[%c9_115, %c0_116, %c0_117] : memref<16x64x64xbf16, #tpu.memory_space<vmem>>, vector<1x64x64xbf16>
    %150 = vector.shape_cast %149 : vector<1x64x64xbf16> to vector<64x64xbf16>
    %151 = vector.shape_cast %148 : vector<64x64xbf16> to vector<1x64x64xbf16>
    tpu.vector_store %arg6[%c9_115, %c0_116, %c0_117], %151 {strides = array<i32>} : memref<16x64x64xbf16, #tpu.memory_space<vmem>>, vector<1x64x64xbf16>,
    %c0_i32_118 = arith.constant 0 : i32
    %152 = arith.addi %c0_i32_118, %1 : i32
    %c10 = arith.constant 10 : index
    %c0_119 = arith.constant 0 : index
    %153 = arith.index_cast %152 : i32 to index
    %c0_120 = arith.constant 0 : index
    %154 = vector.load %arg3[%c10, %c0_119, %153, %c0_120] : memref<16x1x64x152xbf16, #tpu.memory_space<vmem>>, vector<1x1x64x152xbf16>
    %155 = vector.shape_cast %154 : vector<1x1x64x152xbf16> to vector<64x152xbf16>
    %c0_121 = arith.constant 0 : index
    %c0_122 = arith.constant 0 : index
    %156 = vector.load %arg4[%c0_121, %c0_122] : memref<152x64xbf16, #tpu.memory_space<vmem>>, vector<152x64xbf16>
    %cst_123 = arith.constant dense<0.000000e+00> : vector<64x64xf32>
    %157 = tpu.matmul %155, %156, %cst_123 {dimension_numbers = #tpu.dot_dimension_numbers<[1], [0], [0], [1], [0, 0, 1, 1], [], []>} : vector<64x152xbf16>, vector<152x64xbf16>, vector<64x64xf32> -> vector<64x64xf32>
    %c0_124 = arith.constant 0 : index
    %c0_125 = arith.constant 0 : index
    %158 = vector.load %arg5[%c0_124, %c0_125] : memref<1x64xf32, #tpu.memory_space<vmem>>, vector<1x64xf32>
    %159 = vector.broadcast %158 : vector<1x64xf32> to vector<64x64xf32>
    %160 = arith.addf %157, %159 : vector<64x64xf32>
    %cst_126 = arith.constant 0.000000e+00 : f32
    %161 = vector.broadcast %cst_126 : f32 to vector<64x64xf32>
    %162 = arith.maximumf %160, %161 : vector<64x64xf32>
    %163 = arith.truncf %162 : vector<64x64xf32> to vector<64x64xbf16>
    %c10_127 = arith.constant 10 : index
    %c0_128 = arith.constant 0 : index
    %c0_129 = arith.constant 0 : index
    %164 = vector.load %arg6[%c10_127, %c0_128, %c0_129] : memref<16x64x64xbf16, #tpu.memory_space<vmem>>, vector<1x64x64xbf16>
    %165 = vector.shape_cast %164 : vector<1x64x64xbf16> to vector<64x64xbf16>
    %166 = vector.shape_cast %163 : vector<64x64xbf16> to vector<1x64x64xbf16>
    tpu.vector_store %arg6[%c10_127, %c0_128, %c0_129], %166 {strides = array<i32>} : memref<16x64x64xbf16, #tpu.memory_space<vmem>>, vector<1x64x64xbf16>,
    %c0_i32_130 = arith.constant 0 : i32
    %167 = arith.addi %c0_i32_130, %1 : i32
    %c11 = arith.constant 11 : index
    %c0_131 = arith.constant 0 : index
    %168 = arith.index_cast %167 : i32 to index
    %c0_132 = arith.constant 0 : index
    %169 = vector.load %arg3[%c11, %c0_131, %168, %c0_132] : memref<16x1x64x152xbf16, #tpu.memory_space<vmem>>, vector<1x1x64x152xbf16>
    %170 = vector.shape_cast %169 : vector<1x1x64x152xbf16> to vector<64x152xbf16>
    %c0_133 = arith.constant 0 : index
    %c0_134 = arith.constant 0 : index
    %171 = vector.load %arg4[%c0_133, %c0_134] : memref<152x64xbf16, #tpu.memory_space<vmem>>, vector<152x64xbf16>
    %cst_135 = arith.constant dense<0.000000e+00> : vector<64x64xf32>
    %172 = tpu.matmul %170, %171, %cst_135 {dimension_numbers = #tpu.dot_dimension_numbers<[1], [0], [0], [1], [0, 0, 1, 1], [], []>} : vector<64x152xbf16>, vector<152x64xbf16>, vector<64x64xf32> -> vector<64x64xf32>
    %c0_136 = arith.constant 0 : index
    %c0_137 = arith.constant 0 : index
    %173 = vector.load %arg5[%c0_136, %c0_137] : memref<1x64xf32, #tpu.memory_space<vmem>>, vector<1x64xf32>
    %174 = vector.broadcast %173 : vector<1x64xf32> to vector<64x64xf32>
    %175 = arith.addf %172, %174 : vector<64x64xf32>
    %cst_138 = arith.constant 0.000000e+00 : f32
    %176 = vector.broadcast %cst_138 : f32 to vector<64x64xf32>
    %177 = arith.maximumf %175, %176 : vector<64x64xf32>
    %178 = arith.truncf %177 : vector<64x64xf32> to vector<64x64xbf16>
    %c11_139 = arith.constant 11 : index
    %c0_140 = arith.constant 0 : index
    %c0_141 = arith.constant 0 : index
    %179 = vector.load %arg6[%c11_139, %c0_140, %c0_141] : memref<16x64x64xbf16, #tpu.memory_space<vmem>>, vector<1x64x64xbf16>
    %180 = vector.shape_cast %179 : vector<1x64x64xbf16> to vector<64x64xbf16>
    %181 = vector.shape_cast %178 : vector<64x64xbf16> to vector<1x64x64xbf16>
    tpu.vector_store %arg6[%c11_139, %c0_140, %c0_141], %181 {strides = array<i32>} : memref<16x64x64xbf16, #tpu.memory_space<vmem>>, vector<1x64x64xbf16>,
    %c0_i32_142 = arith.constant 0 : i32
    %182 = arith.addi %c0_i32_142, %1 : i32
    %c12 = arith.constant 12 : index
    %c0_143 = arith.constant 0 : index
    %183 = arith.index_cast %182 : i32 to index
    %c0_144 = arith.constant 0 : index
    %184 = vector.load %arg3[%c12, %c0_143, %183, %c0_144] : memref<16x1x64x152xbf16, #tpu.memory_space<vmem>>, vector<1x1x64x152xbf16>
    %185 = vector.shape_cast %184 : vector<1x1x64x152xbf16> to vector<64x152xbf16>
    %c0_145 = arith.constant 0 : index
    %c0_146 = arith.constant 0 : index
    %186 = vector.load %arg4[%c0_145, %c0_146] : memref<152x64xbf16, #tpu.memory_space<vmem>>, vector<152x64xbf16>
    %cst_147 = arith.constant dense<0.000000e+00> : vector<64x64xf32>
    %187 = tpu.matmul %185, %186, %cst_147 {dimension_numbers = #tpu.dot_dimension_numbers<[1], [0], [0], [1], [0, 0, 1, 1], [], []>} : vector<64x152xbf16>, vector<152x64xbf16>, vector<64x64xf32> -> vector<64x64xf32>
    %c0_148 = arith.constant 0 : index
    %c0_149 = arith.constant 0 : index
    %188 = vector.load %arg5[%c0_148, %c0_149] : memref<1x64xf32, #tpu.memory_space<vmem>>, vector<1x64xf32>
    %189 = vector.broadcast %188 : vector<1x64xf32> to vector<64x64xf32>
    %190 = arith.addf %187, %189 : vector<64x64xf32>
    %cst_150 = arith.constant 0.000000e+00 : f32
    %191 = vector.broadcast %cst_150 : f32 to vector<64x64xf32>
    %192 = arith.maximumf %190, %191 : vector<64x64xf32>
    %193 = arith.truncf %192 : vector<64x64xf32> to vector<64x64xbf16>
    %c12_151 = arith.constant 12 : index
    %c0_152 = arith.constant 0 : index
    %c0_153 = arith.constant 0 : index
    %194 = vector.load %arg6[%c12_151, %c0_152, %c0_153] : memref<16x64x64xbf16, #tpu.memory_space<vmem>>, vector<1x64x64xbf16>
    %195 = vector.shape_cast %194 : vector<1x64x64xbf16> to vector<64x64xbf16>
    %196 = vector.shape_cast %193 : vector<64x64xbf16> to vector<1x64x64xbf16>
    tpu.vector_store %arg6[%c12_151, %c0_152, %c0_153], %196 {strides = array<i32>} : memref<16x64x64xbf16, #tpu.memory_space<vmem>>, vector<1x64x64xbf16>,
    %c0_i32_154 = arith.constant 0 : i32
    %197 = arith.addi %c0_i32_154, %1 : i32
    %c13 = arith.constant 13 : index
    %c0_155 = arith.constant 0 : index
    %198 = arith.index_cast %197 : i32 to index
    %c0_156 = arith.constant 0 : index
    %199 = vector.load %arg3[%c13, %c0_155, %198, %c0_156] : memref<16x1x64x152xbf16, #tpu.memory_space<vmem>>, vector<1x1x64x152xbf16>
    %200 = vector.shape_cast %199 : vector<1x1x64x152xbf16> to vector<64x152xbf16>
    %c0_157 = arith.constant 0 : index
    %c0_158 = arith.constant 0 : index
    %201 = vector.load %arg4[%c0_157, %c0_158] : memref<152x64xbf16, #tpu.memory_space<vmem>>, vector<152x64xbf16>
    %cst_159 = arith.constant dense<0.000000e+00> : vector<64x64xf32>
    %202 = tpu.matmul %200, %201, %cst_159 {dimension_numbers = #tpu.dot_dimension_numbers<[1], [0], [0], [1], [0, 0, 1, 1], [], []>} : vector<64x152xbf16>, vector<152x64xbf16>, vector<64x64xf32> -> vector<64x64xf32>
    %c0_160 = arith.constant 0 : index
    %c0_161 = arith.constant 0 : index
    %203 = vector.load %arg5[%c0_160, %c0_161] : memref<1x64xf32, #tpu.memory_space<vmem>>, vector<1x64xf32>
    %204 = vector.broadcast %203 : vector<1x64xf32> to vector<64x64xf32>
    %205 = arith.addf %202, %204 : vector<64x64xf32>
    %cst_162 = arith.constant 0.000000e+00 : f32
    %206 = vector.broadcast %cst_162 : f32 to vector<64x64xf32>
    %207 = arith.maximumf %205, %206 : vector<64x64xf32>
    %208 = arith.truncf %207 : vector<64x64xf32> to vector<64x64xbf16>
    %c13_163 = arith.constant 13 : index
    %c0_164 = arith.constant 0 : index
    %c0_165 = arith.constant 0 : index
    %209 = vector.load %arg6[%c13_163, %c0_164, %c0_165] : memref<16x64x64xbf16, #tpu.memory_space<vmem>>, vector<1x64x64xbf16>
    %210 = vector.shape_cast %209 : vector<1x64x64xbf16> to vector<64x64xbf16>
    %211 = vector.shape_cast %208 : vector<64x64xbf16> to vector<1x64x64xbf16>
    tpu.vector_store %arg6[%c13_163, %c0_164, %c0_165], %211 {strides = array<i32>} : memref<16x64x64xbf16, #tpu.memory_space<vmem>>, vector<1x64x64xbf16>,
    %c0_i32_166 = arith.constant 0 : i32
    %212 = arith.addi %c0_i32_166, %1 : i32
    %c14 = arith.constant 14 : index
    %c0_167 = arith.constant 0 : index
    %213 = arith.index_cast %212 : i32 to index
    %c0_168 = arith.constant 0 : index
    %214 = vector.load %arg3[%c14, %c0_167, %213, %c0_168] : memref<16x1x64x152xbf16, #tpu.memory_space<vmem>>, vector<1x1x64x152xbf16>
    %215 = vector.shape_cast %214 : vector<1x1x64x152xbf16> to vector<64x152xbf16>
    %c0_169 = arith.constant 0 : index
    %c0_170 = arith.constant 0 : index
    %216 = vector.load %arg4[%c0_169, %c0_170] : memref<152x64xbf16, #tpu.memory_space<vmem>>, vector<152x64xbf16>
    %cst_171 = arith.constant dense<0.000000e+00> : vector<64x64xf32>
    %217 = tpu.matmul %215, %216, %cst_171 {dimension_numbers = #tpu.dot_dimension_numbers<[1], [0], [0], [1], [0, 0, 1, 1], [], []>} : vector<64x152xbf16>, vector<152x64xbf16>, vector<64x64xf32> -> vector<64x64xf32>
    %c0_172 = arith.constant 0 : index
    %c0_173 = arith.constant 0 : index
    %218 = vector.load %arg5[%c0_172, %c0_173] : memref<1x64xf32, #tpu.memory_space<vmem>>, vector<1x64xf32>
    %219 = vector.broadcast %218 : vector<1x64xf32> to vector<64x64xf32>
    %220 = arith.addf %217, %219 : vector<64x64xf32>
    %cst_174 = arith.constant 0.000000e+00 : f32
    %221 = vector.broadcast %cst_174 : f32 to vector<64x64xf32>
    %222 = arith.maximumf %220, %221 : vector<64x64xf32>
    %223 = arith.truncf %222 : vector<64x64xf32> to vector<64x64xbf16>
    %c14_175 = arith.constant 14 : index
    %c0_176 = arith.constant 0 : index
    %c0_177 = arith.constant 0 : index
    %224 = vector.load %arg6[%c14_175, %c0_176, %c0_177] : memref<16x64x64xbf16, #tpu.memory_space<vmem>>, vector<1x64x64xbf16>
    %225 = vector.shape_cast %224 : vector<1x64x64xbf16> to vector<64x64xbf16>
    %226 = vector.shape_cast %223 : vector<64x64xbf16> to vector<1x64x64xbf16>
    tpu.vector_store %arg6[%c14_175, %c0_176, %c0_177], %226 {strides = array<i32>} : memref<16x64x64xbf16, #tpu.memory_space<vmem>>, vector<1x64x64xbf16>,
    %c0_i32_178 = arith.constant 0 : i32
    %227 = arith.addi %c0_i32_178, %1 : i32
    %c15 = arith.constant 15 : index
    %c0_179 = arith.constant 0 : index
    %228 = arith.index_cast %227 : i32 to index
    %c0_180 = arith.constant 0 : index
    %229 = vector.load %arg3[%c15, %c0_179, %228, %c0_180] : memref<16x1x64x152xbf16, #tpu.memory_space<vmem>>, vector<1x1x64x152xbf16>
    %230 = vector.shape_cast %229 : vector<1x1x64x152xbf16> to vector<64x152xbf16>
    %c0_181 = arith.constant 0 : index
    %c0_182 = arith.constant 0 : index
    %231 = vector.load %arg4[%c0_181, %c0_182] : memref<152x64xbf16, #tpu.memory_space<vmem>>, vector<152x64xbf16>
    %cst_183 = arith.constant dense<0.000000e+00> : vector<64x64xf32>
    %232 = tpu.matmul %230, %231, %cst_183 {dimension_numbers = #tpu.dot_dimension_numbers<[1], [0], [0], [1], [0, 0, 1, 1], [], []>} : vector<64x152xbf16>, vector<152x64xbf16>, vector<64x64xf32> -> vector<64x64xf32>
    %c0_184 = arith.constant 0 : index
    %c0_185 = arith.constant 0 : index
    %233 = vector.load %arg5[%c0_184, %c0_185] : memref<1x64xf32, #tpu.memory_space<vmem>>, vector<1x64xf32>
    %234 = vector.broadcast %233 : vector<1x64xf32> to vector<64x64xf32>
    %235 = arith.addf %232, %234 : vector<64x64xf32>
    %cst_186 = arith.constant 0.000000e+00 : f32
    %236 = vector.broadcast %cst_186 : f32 to vector<64x64xf32>
    %237 = arith.maximumf %235, %236 : vector<64x64xf32>
    %238 = arith.truncf %237 : vector<64x64xf32> to vector<64x64xbf16>
    %c15_187 = arith.constant 15 : index
    %c0_188 = arith.constant 0 : index
    %c0_189 = arith.constant 0 : index
    %239 = vector.load %arg6[%c15_187, %c0_188, %c0_189] : memref<16x64x64xbf16, #tpu.memory_space<vmem>>, vector<1x64x64xbf16>
    %240 = vector.shape_cast %239 : vector<1x64x64xbf16> to vector<64x64xbf16>
    %241 = vector.shape_cast %238 : vector<64x64xbf16> to vector<1x64x64xbf16>
    tpu.vector_store %arg6[%c15_187, %c0_188, %c0_189], %241 {strides = array<i32>} : memref<16x64x64xbf16, #tpu.memory_space<vmem>>, vector<1x64x64xbf16>,
    return
  }
  func.func @transform_0(%arg0: i32, %arg1: i32, %arg2: i32) -> (i32, i32, i32, i32) {
    %c0_i32 = arith.constant 0 : i32
    %c0_i32_0 = arith.constant 0 : i32
    %c0_i32_1 = arith.constant 0 : i32
    %c0_i32_2 = arith.constant 0 : i32
    return %arg0, %c0_i32, %c0_i32_0, %c0_i32_1 : i32, i32, i32, i32
  }
  func.func @transform_1(%arg0: i32, %arg1: i32, %arg2: i32) -> (i32, i32) {
    %c0_i32 = arith.constant 0 : i32
    %c0_i32_0 = arith.constant 0 : i32
    return %c0_i32, %arg1 : i32, i32
  }
  func.func @transform_2(%arg0: i32, %arg1: i32, %arg2: i32) -> (i32, i32) {
    %c0_i32 = arith.constant 0 : i32
    %c0_i32_0 = arith.constant 0 : i32
    return %c0_i32, %arg1 : i32, i32
  }
  func.func @transform_3(%arg0: i32, %arg1: i32, %arg2: i32) -> (i32, i32, i32) {
    %c0_i32 = arith.constant 0 : i32
    return %arg0, %arg2, %arg1 : i32, i32, i32
  }
}

</mosaic_0001>

<bundles_post_ra>
// kernel: tpu_custom_call.1
= control target key start
LH: loop header
LB: loop body
LE: loop exit
PB: predicated region body
PF: predicated region fallthrough
CT: control target
= control target key end

     0   :  { %8 = vsyncpa [#allocation3], 0  ;;  %s7464_s0 = inlined_call_operand.hbm [shape: bf16[32,1,64,152], index: 0, kind: input, shape index: {}]   ;;  %s7465_s1 = inlined_call_operand.vmem [shape: bf16[152,64], index: 1, kind: input, shape index: {}]   ;;  %s7466_s2 = inlined_call_operand.vmem [shape: f32[1,64], index: 2, kind: input, shape index: {}]   ;;  %s7467_s3 = inlined_call_operand.hbm [shape: bf16[32,64,64], index: 3, kind: output, shape index: {}]  }
   0x1   :  { %10 = vsyncpa [#allocation3 + $0x1], 0 }
   0x2   :  { %11 = vsyncpa [#allocation4], 0 }
   0x3   :  { %13 = vsyncpa [#allocation4 + $0x1], 0  ;;  %s6037_s12 = smov 0   ;;  %s6039_s13 = smov 0  }
   0x4   :  { %s6041_s14 = smov 0   ;;  %s6043_s15 = smov 0  }
   0x5   :  { %s6045_s16 = smov 0   ;;  %s6047_s17 = smov 0  }
   0x6 LB: > { %s4592_s18 = sadd.s32 4294967295, %s6008_s17   ;;  %s4593_s19 = sadd.s32 4294967294, %s6008_s17   ;;  %s6008_s17 = sphi %s6047_s17, %s19_s17   ;;  %s6004_s16 = sphi %s6045_s16, %s7482_s16   ;;  %s6000_s15 = sphi %s6043_s15, %s7481_s15   ;;  %s5996_s14 = sphi %s6041_s14, %s7480_s14   ;;  %s5992_s13 = sphi %s6039_s13, %s7479_s13   ;;  %s5988_s12 = sphi %s6037_s12, %s7478_s12  }
   0x7   : > { %s38_s20 = sadd.s32 1, %s6004_s16  ;;  %s45_s21 = sadd.s32 1, %s5996_s14 }
   0x8   : > { %p40_p0 = scmp.ge.s32.totalorder %s38_s20, 2  ;;  %p52_p1 = scmp.ne.s32.totalorder %s5996_s14, %s5992_s13 }
   0x9   : > { %p53_p2 = scmp.eq.s32.totalorder %s6008_s17, 0  ;;  %p58_p3 = scmp.ne.s32.totalorder %s5992_s13, %s5988_s12 }
   0xa   : > { %s7484_s20 = smov (%p40_p0, %s38_s20), 0  ;;  %p59_p5 = scmp.eq.s32.totalorder %s4592_s18, 0 }
   0xb   : > { %p6078_p4 = por %p53_p2, %p52_p1  ;;  %s42_s23 = ssub.s32 %s6004_s16, %s7484_s20 }
   0xc   : > { %p138_p6 = scmp.eq.s32.totalorder %s4592_s18, 1  ;;  %p43_p7 = scmp.eq.s32.totalorder %s42_s23, 0 }
   0xd   : > { %p6084_p8 = por %p59_p5, %p58_p3  ;;  %p144_p10 = scmp.eq.s32.totalorder %s4593_s19, 1 }
   0xe   : > { %p6088_p9 = por %p138_p6, %p52_p1  ;;  %p5491_p13 = scmp.lt.s32.totalorder %s6008_s17, 2 }
   0xf   : > { %s6093_s26 = scalar_select %p43_p7, %s5996_s14, %s45_s21  }
  0x10   : > { %s7471_s25 = scalar_select %p6088_p9, 1, 0 }
  0x11   : > { %p6095_p11 = por %p144_p10, %p58_p3  ;;  %s177_s28 = sand.u32 1, %s5996_s14  }
  0x12   : > { %s4598_s29 = sshll.u32 %s177_s28, 10  ;;  %s5348_s30 = sshll.u32 %s6004_s16, 14 }
  0x13   : > { %s7472_s27 = scalar_select %p6095_p11, 1, 0 }
  0x14   : > { %s6106_s6 = scalar_lea.hbm %s7464_s0, %s5348_s30  ;;  %s181_s7 = scalar_lea.vmem [#allocation2], %s4598_s29 }
  0x15   : > { %s189_s8 = sshll.u32 %s181_s7, 4  ;;  %p6112_p0 = pnand %p5491_p13, %p6078_p4  ;;  %s6108_s8 = int_to_ptr.vmem [resolvable:$true] %s189_s8 }
  0x16   : > { %s6117_s10 = scalar_lea.sflag [#allocation3], %s177_s28  ;;  %s5896_s11 = scalar_lea.hbm %s6106_s6, 16384 }
  0x17   : > { %p5897_p2 = scmp.ne.s32.totalorder %s6106_s6, %s5896_s11  ;;  %p5898_p3 = pneg %p6112_p0 }
  0x18   : > { %s5901_s21 = scalar_lea.hbm %s7464_s0, 32768  ;;  %p5902_p4 = scmp.lt.u32.totalorder %s6106_s6, %s7464_s0 }
  0x19   : > { %p5899_p5 = pnand %p5898_p3, %p5897_p2  ;;  %p5903_p7 = scmp.lt.u32.totalorder %s5901_s21, %s5896_s11 }
  0x1a   : > { %p5905_p13 = scmp.lt.u32.totalorder %s5896_s11, %s6106_s6 }
  0x1b   : > { %p5900_p6 = pneg %p5899_p5  ;;  %p5904_p10 = por %p5903_p7, %p5902_p4 }
  0x1d   : > { %p5906_p12 = por %p5905_p13, %p5904_p10 }
  0x1f   : > { %p5907_p1 = pnand %p5906_p12, %p5900_p6 }
  0x21   : > { %5910 = shalt.err (!%p5907_p1)
}
  0x22   : > { %s5911_s28 = scalar_lea.vmem %s6108_s8, 16384  ;;  %s6010_s29 = smov [#allocation2]  }
  0x23   : > { %p5912_p2 = scmp.ne.s32.totalorder %s6108_s8, %s5911_s28  ;;  %s5916_s30 = sshll.u32 %s6010_s29, 4  ;;  %s5917_s30 = int_to_ptr.vmem [resolvable:$false] %s5916_s30 }
  0x24   : > { %s5918_s4 = scalar_lea.vmem %s5917_s30, 32768  ;;  %p5919_p9 = scmp.lt.s32.totalorder %s6108_s8, %s5917_s30 }
  0x25   : > { %p5914_p5 = pnand %p5912_p2, %p5898_p3  ;;  %p5920_p4 = scmp.lt.s32.totalorder %s5918_s4, %s5911_s28 }
  0x27   : > { %p5915_p11 = pneg %p5914_p5  ;;  %p5921_p7 = por %p5920_p4, %p5919_p9 }
  0x29   : > { %p5922_p10 = pnand %p5921_p7, %p5915_p11 }
  0x2b   : > { %5925 = shalt.err (!%p5922_p10)
}
  0x2c   : > { %s6011_s5 = smov 128   ;;  %s6012_s7 = smov 8  }
  0x2d   : > { %5486 = dma.hbm_to_vmem [thread:$0]  (!%p6112_p0), %s6106_s6, 16384, %s6108_s8, %s6117_s10, %s6011_s5, %s6011_s5, %s6012_s7  }
  0x2e   : > { %p197_p12 = scmp.lt.s32.totalorder %s6008_s17, 3  ;;  %p7474_p1 = scmp.ge.s32.totalorder %s6008_s17, 1 }
  0x30   : > { %p198_p3 = pnand %p7474_p1, %p197_p12 }
  0x31   : > { %s6149_s11 = sand.u32 (!%p198_p3), 1, %s5992_s13  }
  0x32   : > { %201 = sbr.rel (%p198_p3) target bundleno = 638 (0x27e), region = 32  ;;  %s4603_s18 = sshll.u32 (!%p198_p3), %s6149_s11, 10 }
  0x33   : > { %s204_s19 = scalar_lea.sflag (!%p198_p3), [#allocation3], %s6149_s11  ;;  %s6153_s21 = scalar_lea.vmem (!%p198_p3), [#allocation2], %s4603_s18 }
  0x39   : > { %5979 = dma.done.wait (%p6084_p8), %s204_s19, 16384  }
  0x3a   : > { %5981 = vsyncadd (%p6084_p8), %s204_s19, 4294950912  ;;  %v6013_v0 = vmov 0   ;;  %v5546_v1 = vld [vmem:[%s7465_s1] sm:$0xff]   ;;  %v5548_v3 = vld [vmem:[%s7465_s1 + $0x8] sm:$0xff]   ;;  %vm381_vm0 = vcmask 195584   ;;  %vm394_vm1 = vcmask 1043456  }
  0x3b   : > { %398 = vmatprep.subr.bf16.mxu0 %v6013_v0  ;;  %657 = vmatprep.subr.bf16.mxu1 %v6013_v0  ;;  %v5547_v2 = vld [vmem:[%s7465_s1] sm:$0xff]   ;;  %v5549_v4 = vld [vmem:[%s7465_s1 + $0x8] sm:$0xff]   ;;  %v5550_v5 = vld [vmem:[%s7465_s1 + $0x10] sm:$0xff]   ;;  %s4604_s10 = sshll.u32 %s6149_s11, 9  ;;  %vm503_vm2 = vcmask 519168   ;;  %s5478_s19 = sshll.u32 %s6000_s15, 13 }
  0x3c   : > { %399 = vmatpush1.bf16.msra.mxu0 %v5546_v1  ;;  %658 = vmatpush1.bf16.msra.mxu1 %v5547_v2  ;;  %v5551_v6 = vld [vmem:[%s7465_s1 + $0x10] sm:$0xff]   ;;  %v5552_v7 = vld [vmem:[%s7465_s1 + $0x18] sm:$0xff]   ;;  %v5554_v9 = vld [vmem:[%s7465_s1 + $0x20] sm:$0xff]   ;;  %s6846_s4 = scalar_lea.vmem [#allocation5], %s4604_s10  ;;  %s7407_s10 = scalar_lea.hbm %s7467_s3, %s5478_s19 }
  0x3d   : > { %400 = vmatprep.subr.bf16.mxu0 %v6013_v0  ;;  %659 = vmatprep.subr.bf16.mxu1 %v6013_v0  ;;  %v5553_v8 = vld [vmem:[%s7465_s1 + $0x18] sm:$0xff]   ;;  %v5555_v10 = vld [vmem:[%s7465_s1 + $0x20] sm:$0xff]   ;;  %v5556_v11 = vld [vmem:[%s7465_s1 + $0x28] sm:$0xff]   ;;  %s4415_s6 = sshll.u32 %s6846_s4, 4  ;;  %s4398_s15 = scalar_lea.sflag [#allocation4], %s6149_s11  ;;  %s7409_s6 = int_to_ptr.vmem [resolvable:$true] %s4415_s6 }
  0x3e   : > { %v5557_v12 = vld [vmem:[%s7465_s1 + $0x28] sm:$0xff]   ;;  %v5558_v15 = vld [vmem:[%s7465_s1 + $0x30] sm:$0xff]   ;;  %v5560_v17 = vld [vmem:[%s7465_s1 + $0x38] sm:$0xff]   ;;  %s5926_s22 = scalar_lea.vmem %s7409_s6, 8192  ;;  %p7475_p9 = scmp.ne.s32.totalorder %s7471_s25, 0 }
  0x3f   : > { %v5568_v13 = vld [vmem:[%s6153_s21 + $0x4] ss:$8 sps:$4 sm:$0xff]   ;;  %v5559_v16 = vld [vmem:[%s7465_s1 + $0x30] sm:$0xff]   ;;  %v5561_v18 = vld [vmem:[%s7465_s1 + $0x38] sm:$0xff]   ;;  %p5927_p8 = scmp.ne.s32.totalorder %s7409_s6, %s5926_s22  ;;  %s6014_s23 = smov [#allocation5]  }
  0x40   : > { %401 = vmatpush1.bf16.msra.mxu0 %v5548_v3  ;;  %660 = vmatpush1.bf16.msra.mxu1 %v5549_v4  ;;  %v5571_v14 = vld [vmem:[%s6153_s21 + $0x44] ss:$8 sps:$4 sm:$0xff]   ;;  %v5564_v21 = vld [vmem:[%s7465_s1 + $0x48] ss:$0 sps:$4 sm:$0xff]   ;;  %v5578_v29 = vld [vmem:[%s6153_s21 + $0x14] ss:$8 sps:$4 sm:$0xff]  }
  0x41   : > { %402 = vmatprep.subr.bf16.mxu0 %v6013_v0  ;;  %661 = vmatprep.subr.bf16.mxu1 %v6013_v0  ;;  %v5562_v19 = vld [vmem:[%s7465_s1 + $0x40] sm:$0xff]   ;;  %v5565_v22 = vld [vmem:[%s7465_s1 + $0x48] ss:$0 sps:$4 sm:$0xff]   ;;  %v396_v23 = vsel %vm394_vm1, %v5564_v21, 0  ;;  %v5580_v30 = vld [vmem:[%s6153_s21 + $0x54] ss:$8 sps:$4 sm:$0xff]   ;;  %p5928_p11 = pnand %p5927_p8, %p7475_p9 }
  0x42   : > { %4624 = vmatprep.mubr.msk.bf16.mxu0 %vm381_vm0, %v5568_v13  ;;  %4663 = vmatprep.mubr.msk.bf16.mxu1 %vm381_vm0, %v5571_v14  ;;  %v5563_v20 = vld [vmem:[%s7465_s1 + $0x40] sm:$0xff]   ;;  %v655_v24 = vsel %vm394_vm1, %v5565_v22, 0  ;;  %v5574_v31 = vld [vmem:[%s7465_s1 + $0x8] sm:$0xff]   ;;  %v5576_v33 = vld [vmem:[%s7465_s1 + $0x10] sm:$0xff]   ;;  %s5930_s24 = sshll.u32 %s6014_s23, 4  ;;  %s5931_s24 = int_to_ptr.vmem [resolvable:$false] %s5930_s24 }
  0x43   : > { %v5566_v25 = vld [vmem:[%s6153_s21] ss:$8 sps:$4 sm:$0xff]   ;;  %v5584_v34 = vld [vmem:[%s6153_s21 + $0x10] ss:$8 sps:$4 sm:$0xff]   ;;  %v5588_v37 = vld [vmem:[%s6153_s21 + $0x24] ss:$8 sps:$4 sm:$0xff]   ;;  %p5929_p0 = pneg %p5928_p11  ;;  %p5933_p6 = scmp.lt.s32.totalorder %s7409_s6, %s5931_s24 }
  0x44   : > { %403 = vmatpush1.bf16.msra.mxu0 %v5550_v5  ;;  %662 = vmatpush1.bf16.msra.mxu1 %v5551_v6  ;;  %v5569_v26 = vld [vmem:[%s6153_s21 + $0x40] ss:$8 sps:$4 sm:$0xff]   ;;  %v5585_v35 = vld [vmem:[%s6153_s21 + $0x50] ss:$8 sps:$4 sm:$0xff]   ;;  %v5590_v38 = vld [vmem:[%s6153_s21 + $0x64] ss:$8 sps:$4 sm:$0xff]  }
  0x45   : > { %404 = vmatprep.subr.bf16.mxu0 %v6013_v0  ;;  %663 = vmatprep.subr.bf16.mxu1 %v6013_v0  ;;  %v5572_v27 = vld [vmem:[%s7465_s1] sm:$0xff]   ;;  %v5575_v32 = vld [vmem:[%s7465_s1 + $0x8] sm:$0xff]   ;;  %v5577_v36 = vld [vmem:[%s7465_s1 + $0x10] sm:$0xff]   ;;  %s5932_s28 = scalar_lea.vmem %s5931_s24, 16384 }
  0x46   : > { %v5573_v28 = vld [vmem:[%s7465_s1] sm:$0xff]   ;;  %v5582_v39 = vld [vmem:[%s7465_s1 + $0x18] sm:$0xff]   ;;  %v5592_v47 = vld [vmem:[%s7465_s1 + $0x28] sm:$0xff]   ;;  %p5934_p13 = scmp.lt.s32.totalorder %s5932_s28, %s5926_s22 }
  0x47   : > { %v5583_v40 = vld [vmem:[%s7465_s1 + $0x18] sm:$0xff]   ;;  %v5586_v41 = vld [vmem:[%s7465_s1 + $0x20] sm:$0xff]   ;;  %v5593_v48 = vld [vmem:[%s7465_s1 + $0x28] sm:$0xff]  }
  0x48   : > { %405 = vmatpush1.bf16.msra.mxu0 %v5552_v7  ;;  %664 = vmatpush1.bf16.msra.mxu1 %v5553_v8  ;;  %v5594_v42 = vld [vmem:[%s6153_s21 + $0x20] ss:$8 sps:$4 sm:$0xff]   ;;  %v5598_v45 = vld [vmem:[%s6153_s21 + $0x34] ss:$8 sps:$4 sm:$0xff]   ;;  %v5604_v49 = vld [vmem:[%s6153_s21 + $0x30] ss:$8 sps:$4 sm:$0xff]   ;;  %p5935_p2 = por %p5934_p13, %p5933_p6 }
  0x49   : > { %406 = vmatprep.subr.bf16.mxu0 %v6013_v0  ;;  %665 = vmatprep.subr.bf16.mxu1 %v6013_v0  ;;  %v5595_v43 = vld [vmem:[%s6153_s21 + $0x60] ss:$8 sps:$4 sm:$0xff]   ;;  %v5600_v46 = vld [vmem:[%s6153_s21 + $0x74] ss:$8 sps:$4 sm:$0xff]   ;;  %v5605_v51 = vld [vmem:[%s6153_s21 + $0x70] ss:$8 sps:$4 sm:$0xff]  }
  0x4a   : > { %v5587_v44 = vld [vmem:[%s7465_s1 + $0x20] sm:$0xff]   ;;  %v5596_v50 = vld [vmem:[%s7465_s1 + $0x30] sm:$0xff]   ;;  %v5602_v55 = vld [vmem:[%s7465_s1 + $0x38] sm:$0xff]   ;;  %p5936_p5 = pnand %p5935_p2, %p5929_p0 }
  0x4b   : > { %v5597_v52 = vld [vmem:[%s7465_s1 + $0x30] sm:$0xff]   ;;  %v5612_v53 = vld [vmem:[%s6153_s21 + $0x84] ss:$8 sps:$4 sm:$0xff]   ;;  %v5603_v56 = vld [vmem:[%s7465_s1 + $0x38] sm:$0xff]  }
  0x4c   : > { %407 = vmatpush1.bf16.msra.mxu0 %v5554_v9  ;;  %666 = vmatpush1.bf16.msra.mxu1 %v5555_v10  ;;  %v5615_v54 = vld [vmem:[%s6153_s21 + $0xc4] ss:$8 sps:$4 sm:$0xff]   ;;  %v5608_v59 = vld [vmem:[%s7465_s1 + $0x48] ss:$0 sps:$4 sm:$0xff]   ;;  %v5622_v4 = vld [vmem:[%s6153_s21 + $0x94] ss:$8 sps:$4 sm:$0xff]  }
  0x4d   : > { %408 = vmatprep.subr.bf16.mxu0 %v6013_v0  ;;  %667 = vmatprep.subr.bf16.mxu1 %v6013_v0  ;;  %v5606_v57 = vld [vmem:[%s7465_s1 + $0x40] sm:$0xff]   ;;  %v5609_v60 = vld [vmem:[%s7465_s1 + $0x48] ss:$0 sps:$4 sm:$0xff]   ;;  %v914_v61 = vsel %vm394_vm1, %v5608_v59, 0  ;;  %v5624_v5 = vld [vmem:[%s6153_s21 + $0xd4] ss:$8 sps:$4 sm:$0xff]  }
  0x4e   : > { %v5607_v58 = vld [vmem:[%s7465_s1 + $0x40] sm:$0xff]   ;;  %v1173_v63 = vsel %vm394_vm1, %v5609_v60, 0  ;;  %v5618_v6 = vld [vmem:[%s7465_s1 + $0x8] sm:$0xff]   ;;  %v5620_v8 = vld [vmem:[%s7465_s1 + $0x10] sm:$0xff]  }
  0x4f   : > { %v5610_v62 = vld [vmem:[%s6153_s21 + $0x80] ss:$8 sps:$4 sm:$0xff]   ;;  %v5628_v9 = vld [vmem:[%s6153_s21 + $0x90] ss:$8 sps:$4 sm:$0xff]   ;;  %v5634_v13 = vld [vmem:[%s6153_s21 + $0xe4] ss:$8 sps:$4 sm:$0xff]  }
  0x50   : > { %409 = vmatpush1.bf16.msra.mxu0 %v5556_v11  ;;  %668 = vmatpush1.bf16.msra.mxu1 %v5557_v12  ;;  %v5613_v1 = vld [vmem:[%s6153_s21 + $0xc0] ss:$8 sps:$4 sm:$0xff]   ;;  %v5629_v10 = vld [vmem:[%s6153_s21 + $0xd0] ss:$8 sps:$4 sm:$0xff]   ;;  %v5632_v12 = vld [vmem:[%s6153_s21 + $0xa4] ss:$8 sps:$4 sm:$0xff]  }
  0x51   : > { %410 = vmatprep.subr.bf16.mxu0 %v6013_v0  ;;  %669 = vmatprep.subr.bf16.mxu1 %v6013_v0  ;;  %v5616_v2 = vld [vmem:[%s7465_s1] sm:$0xff]   ;;  %v5619_v7 = vld [vmem:[%s7465_s1 + $0x8] sm:$0xff]   ;;  %v5621_v11 = vld [vmem:[%s7465_s1 + $0x10] sm:$0xff]  }
  0x52   : > { %v5617_v3 = vld [vmem:[%s7465_s1] sm:$0xff]   ;;  %v5626_v14 = vld [vmem:[%s7465_s1 + $0x18] sm:$0xff]   ;;  %v5636_v22 = vld [vmem:[%s7465_s1 + $0x28] sm:$0xff]  }
  0x53   : > { %v5644_v21 = vld [vmem:[%s6153_s21 + $0xf4] ss:$8 sps:$4 sm:$0xff]   ;;  %v5680_v60 = vld [vmem:[%s7465_s1 + $0x28] sm:$0xff]  }
  0x54   : > { %411 = vmatpush1.bf16.msra.mxu0 %v5558_v15  ;;  %670 = vmatpush1.bf16.msra.mxu1 %v5559_v16  ;;  %v5627_v15 = vld [vmem:[%s7465_s1 + $0x18] sm:$0xff]   ;;  %v5630_v16 = vld [vmem:[%s7465_s1 + $0x20] sm:$0xff]  }
  0x55   : > { %412 = vmatprep.subr.bf16.mxu0 %v6013_v0  ;;  %671 = vmatprep.subr.bf16.mxu1 %v6013_v0  ;;  %v5688_v59 = vld [vmem:[%s6153_s21 + $0x174] ss:$8 sps:$4 sm:$0xff]  }
  0x58   : > { %413 = vmatpush1.bf16.msra.mxu0 %v5560_v17  ;;  %672 = vmatpush1.bf16.msra.mxu1 %v5561_v18  ;;  %v5638_v17 = vld [vmem:[%s6153_s21 + $0xa0] ss:$8 sps:$4 sm:$0xff]  }
  0x59   : > { %414 = vmatprep.subr.bf16.mxu0 %v6013_v0  ;;  %673 = vmatprep.subr.bf16.mxu1 %v6013_v0  ;;  %v5639_v18 = vld [vmem:[%s6153_s21 + $0xe0] ss:$8 sps:$4 sm:$0xff]  }
  0x5c   : > { %415 = vmatpush1.bf16.msra.mxu0 %v5562_v19  ;;  %674 = vmatpush1.bf16.msra.mxu1 %v5563_v20  ;;  %v5631_v19 = vld [vmem:[%s7465_s1 + $0x20] sm:$0xff]   ;;  %v5642_v20 = vld [vmem:[%s6153_s21 + $0xb4] ss:$8 sps:$4 sm:$0xff]  }
  0x5d   : > { %416 = vmatprep.subr.bf16.mxu0 %v6013_v0  ;;  %675 = vmatprep.subr.bf16.mxu1 %v6013_v0 }
  0x60   : > { %417 = vmatpush1.bf16.msra.mxu0 %v396_v23  ;;  %676 = vmatpush1.bf16.msra.mxu1 %v655_v24  ;;  %v5637_v23 = vld [vmem:[%s7465_s1 + $0x28] sm:$0xff]   ;;  %v5640_v24 = vld [vmem:[%s7465_s1 + $0x30] sm:$0xff]  }
  0x61   : > { %916 = vmatprep.subr.bf16.mxu0 %v6013_v0  ;;  %1175 = vmatprep.subr.bf16.mxu1 %v6013_v0 }
  0x63   : > { %431 = vmatmul.mubr.bf16.vlgmr.msra.gmra.mrb[0].mxu0 %v5566_v25  ;;  %690 = vmatmul.mubr.bf16.vlgmr.msra.gmra.mrb[0].mxu1 %v5569_v26  ;;  %v5648_v25 = vld [vmem:[%s6153_s21 + $0xb0] ss:$8 sps:$4 sm:$0xff]  }
  0x64   : > { %917 = vmatpush1.bf16.msra.mxu0 %v5572_v27  ;;  %1176 = vmatpush1.bf16.msra.mxu1 %v5573_v28  ;;  %v5649_v26 = vld [vmem:[%s6153_s21 + $0xf0] ss:$8 sps:$4 sm:$0xff]   ;;  %v5656_v28 = vld [vmem:[%s6153_s21 + $0x104] ss:$8 sps:$4 sm:$0xff]  }
  0x65   : > { %918 = vmatprep.subr.bf16.mxu0 %v6013_v0  ;;  %1177 = vmatprep.subr.bf16.mxu1 %v6013_v0  ;;  %v5641_v27 = vld [vmem:[%s7465_s1 + $0x30] sm:$0xff]  }
  0x66   : > { %4625 = vmatprep.mubr.msk.bf16.mxu0 %vm381_vm0, %v5578_v29  ;;  %4664 = vmatprep.mubr.msk.bf16.mxu1 %vm381_vm0, %v5580_v30  ;;  %v5659_v29 = vld [vmem:[%s6153_s21 + $0x144] ss:$8 sps:$4 sm:$0xff]   ;;  %v5646_v30 = vld [vmem:[%s7465_s1 + $0x38] sm:$0xff]  }
  0x68   : > { %919 = vmatpush1.bf16.msra.mxu0 %v5574_v31  ;;  %1178 = vmatpush1.bf16.msra.mxu1 %v5575_v32  ;;  %v5647_v31 = vld [vmem:[%s7465_s1 + $0x38] sm:$0xff]   ;;  %v5650_v32 = vld [vmem:[%s7465_s1 + $0x40] sm:$0xff]  }
  0x69   : > { %920 = vmatprep.subr.bf16.mxu0 %v6013_v0  ;;  %1179 = vmatprep.subr.bf16.mxu1 %v6013_v0 }
  0x6b   : > { %439 = vmatmul.mubr.bf16.gmra.mrb[4].mxu0 %v5584_v34  ;;  %698 = vmatmul.mubr.bf16.gmra.mrb[4].mxu1 %v5585_v35  ;;  %v5651_v34 = vld [vmem:[%s7465_s1 + $0x40] sm:$0xff]   ;;  %v5653_v35 = vld [vmem:[%s7465_s1 + $0x48] ss:$0 sps:$4 sm:$0xff]  }
  0x6c   : > { %921 = vmatpush1.bf16.msra.mxu0 %v5576_v33  ;;  %1180 = vmatpush1.bf16.msra.mxu1 %v5577_v36  ;;  %v5652_v33 = vld [vmem:[%s7465_s1 + $0x48] ss:$0 sps:$4 sm:$0xff]  }
  0x6d   : > { %922 = vmatprep.subr.bf16.mxu0 %v6013_v0  ;;  %1181 = vmatprep.subr.bf16.mxu1 %v6013_v0  ;;  %v1432_v36 = vsel %vm394_vm1, %v5652_v33, 0  ;;  %v5730_v33 = vld [vmem:[%s6153_s21 + $0x1b4] ss:$8 sps:$4 sm:$0xff]  }
  0x6e   : > { %4626 = vmatprep.mubr.msk.bf16.mxu0 %vm381_vm0, %v5588_v37  ;;  %4665 = vmatprep.mubr.msk.bf16.mxu1 %vm381_vm0, %v5590_v38  ;;  %v5654_v37 = vld [vmem:[%s6153_s21 + $0x100] ss:$8 sps:$4 sm:$0xff]   ;;  %v1691_v38 = vsel %vm394_vm1, %v5653_v35, 0 }
  0x6f   : > { %v5724_v35 = vld [vmem:[%s7465_s1 + $0x28] sm:$0xff]  }
  0x70   : > { %923 = vmatpush1.bf16.msra.mxu0 %v5582_v39  ;;  %1182 = vmatpush1.bf16.msra.mxu1 %v5583_v40  ;;  %v5657_v39 = vld [vmem:[%s6153_s21 + $0x140] ss:$8 sps:$4 sm:$0xff]  }
  0x71   : > { %924 = vmatprep.subr.bf16.mxu0 %v6013_v0  ;;  %1183 = vmatprep.subr.bf16.mxu1 %v6013_v0  ;;  %v5660_v40 = vld [vmem:[%s7465_s1] sm:$0xff]  }
  0x73   : > { %447 = vmatmul.mubr.bf16.gmra.mrb[8].mxu0 %v5594_v42  ;;  %706 = vmatmul.mubr.bf16.gmra.mrb[8].mxu1 %v5595_v43  ;;  %v5666_v42 = vld [vmem:[%s6153_s21 + $0x114] ss:$8 sps:$4 sm:$0xff]  }
  0x74   : > { %925 = vmatpush1.bf16.msra.mxu0 %v5586_v41  ;;  %1184 = vmatpush1.bf16.msra.mxu1 %v5587_v44  ;;  %v5661_v41 = vld [vmem:[%s7465_s1] sm:$0xff]   ;;  %v5668_v43 = vld [vmem:[%s6153_s21 + $0x154] ss:$8 sps:$4 sm:$0xff]   ;;  %v5662_v44 = vld [vmem:[%s7465_s1 + $0x8] sm:$0xff]  }
  0x75   : > { %926 = vmatprep.subr.bf16.mxu0 %v6013_v0  ;;  %1185 = vmatprep.subr.bf16.mxu1 %v6013_v0 }
  0x76   : > { %4627 = vmatprep.mubr.msk.bf16.mxu0 %vm381_vm0, %v5598_v45  ;;  %4666 = vmatprep.mubr.msk.bf16.mxu1 %vm381_vm0, %v5600_v46  ;;  %v5663_v45 = vld [vmem:[%s7465_s1 + $0x8] sm:$0xff]   ;;  %v5664_v46 = vld [vmem:[%s7465_s1 + $0x10] sm:$0xff]  }
  0x78   : > { %927 = vmatpush1.bf16.msra.mxu0 %v5592_v47  ;;  %1186 = vmatpush1.bf16.msra.mxu1 %v5593_v48  ;;  %v5672_v47 = vld [vmem:[%s6153_s21 + $0x110] ss:$8 sps:$4 sm:$0xff]  }
  0x79   : > { %928 = vmatprep.subr.bf16.mxu0 %v6013_v0  ;;  %1187 = vmatprep.subr.bf16.mxu1 %v6013_v0  ;;  %v5673_v48 = vld [vmem:[%s6153_s21 + $0x150] ss:$8 sps:$4 sm:$0xff]  }
  0x7b   : > { %455 = vmatmul.mubr.bf16.gmra.mrb[12].mxu0 %v5604_v49  ;;  %714 = vmatmul.mubr.bf16.gmra.mrb[12].mxu1 %v5605_v51  ;;  %v5665_v49 = vld [vmem:[%s7465_s1 + $0x10] sm:$0xff]   ;;  %v5678_v51 = vld [vmem:[%s6153_s21 + $0x164] ss:$8 sps:$4 sm:$0xff]  }
  0x7c   : > { %929 = vmatpush1.bf16.msra.mxu0 %v5596_v50  ;;  %1188 = vmatpush1.bf16.msra.mxu1 %v5597_v52  ;;  %v5676_v50 = vld [vmem:[%s6153_s21 + $0x124] ss:$8 sps:$4 sm:$0xff]   ;;  %v5670_v52 = vld [vmem:[%s7465_s1 + $0x18] sm:$0xff]  }
  0x7d   : > { %930 = vmatprep.subr.bf16.mxu0 %v6013_v0  ;;  %1189 = vmatprep.subr.bf16.mxu1 %v6013_v0 }
  0x7e   : > { %4710 = vmatprep.mubr.msk.bf16.mxu0 %vm381_vm0, %v5612_v53  ;;  %4757 = vmatprep.mubr.msk.bf16.mxu1 %vm381_vm0, %v5615_v54  ;;  %v5671_v53 = vld [vmem:[%s7465_s1 + $0x18] sm:$0xff]   ;;  %v5674_v54 = vld [vmem:[%s7465_s1 + $0x20] sm:$0xff]  }
  0x80   : > { %931 = vmatpush1.bf16.msra.mxu0 %v5602_v55  ;;  %1190 = vmatpush1.bf16.msra.mxu1 %v5603_v56  ;;  %v5682_v55 = vld [vmem:[%s6153_s21 + $0x120] ss:$8 sps:$4 sm:$0xff]  }
  0x81   : > { %932 = vmatprep.subr.bf16.mxu0 %v6013_v0  ;;  %1191 = vmatprep.subr.bf16.mxu1 %v6013_v0  ;;  %v5683_v56 = vld [vmem:[%s6153_s21 + $0x160] ss:$8 sps:$4 sm:$0xff]  }
  0x84   : > { %933 = vmatpush1.bf16.msra.mxu0 %v5606_v57  ;;  %1192 = vmatpush1.bf16.msra.mxu1 %v5607_v58  ;;  %v5675_v57 = vld [vmem:[%s7465_s1 + $0x20] sm:$0xff]   ;;  %v5686_v58 = vld [vmem:[%s6153_s21 + $0x134] ss:$8 sps:$4 sm:$0xff]  }
  0x85   : > { %934 = vmatprep.subr.bf16.mxu0 %v6013_v0  ;;  %1193 = vmatprep.subr.bf16.mxu1 %v6013_v0 }
  0x88   : > { %935 = vmatpush1.bf16.msra.mxu0 %v914_v61  ;;  %1194 = vmatpush1.bf16.msra.mxu1 %v1173_v63  ;;  %v5681_v61 = vld [vmem:[%s7465_s1 + $0x28] sm:$0xff]   ;;  %v5692_v63 = vld [vmem:[%s6153_s21 + $0x130] ss:$8 sps:$4 sm:$0xff]  }
  0x89   : > { %1434 = vmatprep.subr.bf16.mxu0 %v6013_v0  ;;  %1693 = vmatprep.subr.bf16.mxu1 %v6013_v0 }
  0x8b   : > { %949 = vmatmul.mubr.bf16.vlgmr.msra.gmra.mrb[16].mxu0 %v5610_v62  ;;  %1208 = vmatmul.mubr.bf16.vlgmr.msra.gmra.mrb[16].mxu1 %v5613_v1  ;;  %v5684_v62 = vld [vmem:[%s7465_s1 + $0x30] sm:$0xff]  }
  0x8c   : > { %1435 = vmatpush1.bf16.msra.mxu0 %v5616_v2  ;;  %1694 = vmatpush1.bf16.msra.mxu1 %v5617_v3  ;;  %v5693_v1 = vld [vmem:[%s6153_s21 + $0x170] ss:$8 sps:$4 sm:$0xff]   ;;  %v5700_v3 = vld [vmem:[%s6153_s21 + $0x184] ss:$8 sps:$4 sm:$0xff]  }
  0x8d   : > { %1436 = vmatprep.subr.bf16.mxu0 %v6013_v0  ;;  %1695 = vmatprep.subr.bf16.mxu1 %v6013_v0  ;;  %v5685_v2 = vld [vmem:[%s7465_s1 + $0x30] sm:$0xff]  }
  0x8e   : > { %4711 = vmatprep.mubr.msk.bf16.mxu0 %vm381_vm0, %v5622_v4  ;;  %4758 = vmatprep.mubr.msk.bf16.mxu1 %vm381_vm0, %v5624_v5  ;;  %v5703_v4 = vld [vmem:[%s6153_s21 + $0x1c4] ss:$8 sps:$4 sm:$0xff]   ;;  %v5690_v5 = vld [vmem:[%s7465_s1 + $0x38] sm:$0xff]  }
  0x90   : > { %1437 = vmatpush1.bf16.msra.mxu0 %v5618_v6  ;;  %1696 = vmatpush1.bf16.msra.mxu1 %v5619_v7  ;;  %v5691_v6 = vld [vmem:[%s7465_s1 + $0x38] sm:$0xff]   ;;  %v5694_v7 = vld [vmem:[%s7465_s1 + $0x40] sm:$0xff]  }
  0x91   : > { %1438 = vmatprep.subr.bf16.mxu0 %v6013_v0  ;;  %1697 = vmatprep.subr.bf16.mxu1 %v6013_v0 }
  0x93   : > { %957 = vmatmul.mubr.bf16.gmra.mrb[20].mxu0 %v5628_v9  ;;  %1216 = vmatmul.mubr.bf16.gmra.mrb[20].mxu1 %v5629_v10  ;;  %v5696_v9 = vld [vmem:[%s7465_s1 + $0x48] ss:$0 sps:$4 sm:$0xff]  }
  0x94   : > { %1439 = vmatpush1.bf16.msra.mxu0 %v5620_v8  ;;  %1698 = vmatpush1.bf16.msra.mxu1 %v5621_v11  ;;  %v5695_v8 = vld [vmem:[%s7465_s1 + $0x40] sm:$0xff]   ;;  %v5697_v10 = vld [vmem:[%s7465_s1 + $0x48] ss:$0 sps:$4 sm:$0xff]   ;;  %v1950_v11 = vsel %vm394_vm1, %v5696_v9, 0  ;;  %v5776_v9 = vld [vmem:[%s6153_s21 + $0x274] ss:$8 sps:$4 sm:$0xff]  }
  0x95   : > { %1440 = vmatprep.subr.bf16.mxu0 %v6013_v0  ;;  %1699 = vmatprep.subr.bf16.mxu1 %v6013_v0 }
  0x96   : > { %4712 = vmatprep.mubr.msk.bf16.mxu0 %vm381_vm0, %v5632_v12  ;;  %4759 = vmatprep.mubr.msk.bf16.mxu1 %vm381_vm0, %v5634_v13  ;;  %v2209_v12 = vsel %vm394_vm1, %v5697_v10, 0  ;;  %v5698_v13 = vld [vmem:[%s6153_s21 + $0x180] ss:$8 sps:$4 sm:$0xff]  }
  0x97   : > { %v5768_v10 = vld [vmem:[%s7465_s1 + $0x28] sm:$0xff]  }
  0x98   : > { %1441 = vmatpush1.bf16.msra.mxu0 %v5626_v14  ;;  %1700 = vmatpush1.bf16.msra.mxu1 %v5627_v15  ;;  %v5701_v14 = vld [vmem:[%s6153_s21 + $0x1c0] ss:$8 sps:$4 sm:$0xff]  }
  0x99   : > { %1442 = vmatprep.subr.bf16.mxu0 %v6013_v0  ;;  %1701 = vmatprep.subr.bf16.mxu1 %v6013_v0  ;;  %v5704_v15 = vld [vmem:[%s7465_s1] sm:$0xff]  }
  0x9b   : > { %965 = vmatmul.mubr.bf16.gmra.mrb[24].mxu0 %v5638_v17  ;;  %1224 = vmatmul.mubr.bf16.gmra.mrb[24].mxu1 %v5639_v18  ;;  %v5710_v17 = vld [vmem:[%s6153_s21 + $0x194] ss:$8 sps:$4 sm:$0xff]  }
  0x9c   : > { %1443 = vmatpush1.bf16.msra.mxu0 %v5630_v16  ;;  %1702 = vmatpush1.bf16.msra.mxu1 %v5631_v19  ;;  %v5705_v16 = vld [vmem:[%s7465_s1] sm:$0xff]   ;;  %v5712_v18 = vld [vmem:[%s6153_s21 + $0x1d4] ss:$8 sps:$4 sm:$0xff]   ;;  %v5706_v19 = vld [vmem:[%s7465_s1 + $0x8] sm:$0xff]  }
  0x9d   : > { %1444 = vmatprep.subr.bf16.mxu0 %v6013_v0  ;;  %1703 = vmatprep.subr.bf16.mxu1 %v6013_v0 }
  0x9e   : > { %4713 = vmatprep.mubr.msk.bf16.mxu0 %vm381_vm0, %v5642_v20  ;;  %4760 = vmatprep.mubr.msk.bf16.mxu1 %vm381_vm0, %v5644_v21  ;;  %v5707_v20 = vld [vmem:[%s7465_s1 + $0x8] sm:$0xff]   ;;  %v5708_v21 = vld [vmem:[%s7465_s1 + $0x10] sm:$0xff]  }
  0xa0   : > { %1445 = vmatpush1.bf16.msra.mxu0 %v5636_v22  ;;  %1704 = vmatpush1.bf16.msra.mxu1 %v5637_v23  ;;  %v5716_v22 = vld [vmem:[%s6153_s21 + $0x190] ss:$8 sps:$4 sm:$0xff]  }
  0xa1   : > { %1446 = vmatprep.subr.bf16.mxu0 %v6013_v0  ;;  %1705 = vmatprep.subr.bf16.mxu1 %v6013_v0  ;;  %v5717_v23 = vld [vmem:[%s6153_s21 + $0x1d0] ss:$8 sps:$4 sm:$0xff]  }
  0xa3   : > { %973 = vmatmul.mubr.bf16.gmra.mrb[28].mxu0 %v5648_v25  ;;  %1232 = vmatmul.mubr.bf16.gmra.mrb[28].mxu1 %v5649_v26  ;;  %v5720_v25 = vld [vmem:[%s6153_s21 + $0x1a4] ss:$8 sps:$4 sm:$0xff]  }
  0xa4   : > { %1447 = vmatpush1.bf16.msra.mxu0 %v5640_v24  ;;  %1706 = vmatpush1.bf16.msra.mxu1 %v5641_v27  ;;  %v5709_v24 = vld [vmem:[%s7465_s1 + $0x10] sm:$0xff]   ;;  %v5722_v26 = vld [vmem:[%s6153_s21 + $0x1e4] ss:$8 sps:$4 sm:$0xff]   ;;  %v5714_v27 = vld [vmem:[%s7465_s1 + $0x18] sm:$0xff]  }
  0xa5   : > { %1448 = vmatprep.subr.bf16.mxu0 %v6013_v0  ;;  %1707 = vmatprep.subr.bf16.mxu1 %v6013_v0 }
  0xa6   : > { %4804 = vmatprep.mubr.msk.bf16.mxu0 %vm381_vm0, %v5656_v28  ;;  %4851 = vmatprep.mubr.msk.bf16.mxu1 %vm381_vm0, %v5659_v29  ;;  %v5715_v28 = vld [vmem:[%s7465_s1 + $0x18] sm:$0xff]   ;;  %v5718_v29 = vld [vmem:[%s7465_s1 + $0x20] sm:$0xff]  }
  0xa8   : > { %1449 = vmatpush1.bf16.msra.mxu0 %v5646_v30  ;;  %1708 = vmatpush1.bf16.msra.mxu1 %v5647_v31  ;;  %v5726_v30 = vld [vmem:[%s6153_s21 + $0x1a0] ss:$8 sps:$4 sm:$0xff]  }
  0xa9   : > { %1450 = vmatprep.subr.bf16.mxu0 %v6013_v0  ;;  %1709 = vmatprep.subr.bf16.mxu1 %v6013_v0  ;;  %v5727_v31 = vld [vmem:[%s6153_s21 + $0x1e0] ss:$8 sps:$4 sm:$0xff]  }
  0xac   : > { %1451 = vmatpush1.bf16.msra.mxu0 %v5650_v32  ;;  %1710 = vmatpush1.bf16.msra.mxu1 %v5651_v34  ;;  %v5719_v32 = vld [vmem:[%s7465_s1 + $0x20] sm:$0xff]   ;;  %v5732_v34 = vld [vmem:[%s6153_s21 + $0x1f4] ss:$8 sps:$4 sm:$0xff]  }
  0xad   : > { %1452 = vmatprep.subr.bf16.mxu0 %v6013_v0  ;;  %1711 = vmatprep.subr.bf16.mxu1 %v6013_v0 }
  0xb0   : > { %1453 = vmatpush1.bf16.msra.mxu0 %v1432_v36  ;;  %1712 = vmatpush1.bf16.msra.mxu1 %v1691_v38  ;;  %v5725_v36 = vld [vmem:[%s7465_s1 + $0x28] sm:$0xff]   ;;  %v5728_v38 = vld [vmem:[%s7465_s1 + $0x30] sm:$0xff]  }
  0xb1   : > { %1952 = vmatprep.subr.bf16.mxu0 %v6013_v0  ;;  %2211 = vmatprep.subr.bf16.mxu1 %v6013_v0 }
  0xb3   : > { %1467 = vmatmul.mubr.bf16.vlgmr.msra.gmra.mrb[32].mxu0 %v5654_v37  ;;  %1726 = vmatmul.mubr.bf16.vlgmr.msra.gmra.mrb[32].mxu1 %v5657_v39  ;;  %v5736_v37 = vld [vmem:[%s6153_s21 + $0x1b0] ss:$8 sps:$4 sm:$0xff]  }
  0xb4   : > { %1953 = vmatpush1.bf16.msra.mxu0 %v5660_v40  ;;  %2212 = vmatpush1.bf16.msra.mxu1 %v5661_v41  ;;  %v5737_v39 = vld [vmem:[%s6153_s21 + $0x1f0] ss:$8 sps:$4 sm:$0xff]   ;;  %v5744_v41 = vld [vmem:[%s6153_s21 + $0x204] ss:$8 sps:$4 sm:$0xff]  }
  0xb5   : > { %1954 = vmatprep.subr.bf16.mxu0 %v6013_v0  ;;  %2213 = vmatprep.subr.bf16.mxu1 %v6013_v0  ;;  %v5729_v40 = vld [vmem:[%s7465_s1 + $0x30] sm:$0xff]  }
  0xb6   : > { %4805 = vmatprep.mubr.msk.bf16.mxu0 %vm381_vm0, %v5666_v42  ;;  %4852 = vmatprep.mubr.msk.bf16.mxu1 %vm381_vm0, %v5668_v43  ;;  %v5747_v42 = vld [vmem:[%s6153_s21 + $0x244] ss:$8 sps:$4 sm:$0xff]   ;;  %v5734_v43 = vld [vmem:[%s7465_s1 + $0x38] sm:$0xff]  }
  0xb8   : > { %1955 = vmatpush1.bf16.msra.mxu0 %v5662_v44  ;;  %2214 = vmatpush1.bf16.msra.mxu1 %v5663_v45  ;;  %v5735_v44 = vld [vmem:[%s7465_s1 + $0x38] sm:$0xff]   ;;  %v5738_v45 = vld [vmem:[%s7465_s1 + $0x40] sm:$0xff]  }
  0xb9   : > { %1956 = vmatprep.subr.bf16.mxu0 %v6013_v0  ;;  %2215 = vmatprep.subr.bf16.mxu1 %v6013_v0 }
  0xbb   : > { %1475 = vmatmul.mubr.bf16.gmra.mrb[36].mxu0 %v5672_v47  ;;  %1734 = vmatmul.mubr.bf16.gmra.mrb[36].mxu1 %v5673_v48  ;;  %v5740_v47 = vld [vmem:[%s7465_s1 + $0x48] ss:$0 sps:$4 sm:$0xff]  }
  0xbc   : > { %1957 = vmatpush1.bf16.msra.mxu0 %v5664_v46  ;;  %2216 = vmatpush1.bf16.msra.mxu1 %v5665_v49  ;;  %v5739_v46 = vld [vmem:[%s7465_s1 + $0x40] sm:$0xff]   ;;  %v5741_v48 = vld [vmem:[%s7465_s1 + $0x48] ss:$0 sps:$4 sm:$0xff]   ;;  %v2468_v49 = vsel %vm394_vm1, %v5740_v47, 0 }
  0xbd   : > { %1958 = vmatprep.subr.bf16.mxu0 %v6013_v0  ;;  %2217 = vmatprep.subr.bf16.mxu1 %v6013_v0  ;;  %v5814_v47 = vld [vmem:[%s6153_s21 + $0x2a0] ss:$8 sps:$4 sm:$0xff]  }
  0xbe   : > { %4806 = vmatprep.mubr.msk.bf16.mxu0 %vm381_vm0, %v5676_v50  ;;  %4853 = vmatprep.mubr.msk.bf16.mxu1 %vm381_vm0, %v5678_v51  ;;  %v2727_v50 = vsel %vm394_vm1, %v5741_v48, 0  ;;  %v5742_v51 = vld [vmem:[%s6153_s21 + $0x200] ss:$8 sps:$4 sm:$0xff]  }
  0xc0   : > { %1959 = vmatpush1.bf16.msra.mxu0 %v5670_v52  ;;  %2218 = vmatpush1.bf16.msra.mxu1 %v5671_v53  ;;  %v5745_v52 = vld [vmem:[%s6153_s21 + $0x240] ss:$8 sps:$4 sm:$0xff]  }
  0xc1   : > { %1960 = vmatprep.subr.bf16.mxu0 %v6013_v0  ;;  %2219 = vmatprep.subr.bf16.mxu1 %v6013_v0  ;;  %v5748_v53 = vld [vmem:[%s7465_s1] sm:$0xff]  }
  0xc3   : > { %1483 = vmatmul.mubr.bf16.gmra.mrb[40].mxu0 %v5682_v55  ;;  %1742 = vmatmul.mubr.bf16.gmra.mrb[40].mxu1 %v5683_v56  ;;  %v5754_v55 = vld [vmem:[%s6153_s21 + $0x214] ss:$8 sps:$4 sm:$0xff]  }
  0xc4   : > { %1961 = vmatpush1.bf16.msra.mxu0 %v5674_v54  ;;  %2220 = vmatpush1.bf16.msra.mxu1 %v5675_v57  ;;  %v5749_v54 = vld [vmem:[%s7465_s1] sm:$0xff]   ;;  %v5756_v56 = vld [vmem:[%s6153_s21 + $0x254] ss:$8 sps:$4 sm:$0xff]   ;;  %v5750_v57 = vld [vmem:[%s7465_s1 + $0x8] sm:$0xff]  }
  0xc5   : > { %1962 = vmatprep.subr.bf16.mxu0 %v6013_v0  ;;  %2221 = vmatprep.subr.bf16.mxu1 %v6013_v0 }
  0xc6   : > { %4807 = vmatprep.mubr.msk.bf16.mxu0 %vm381_vm0, %v5686_v58  ;;  %4854 = vmatprep.mubr.msk.bf16.mxu1 %vm381_vm0, %v5688_v59  ;;  %v5751_v58 = vld [vmem:[%s7465_s1 + $0x8] sm:$0xff]   ;;  %v5752_v59 = vld [vmem:[%s7465_s1 + $0x10] sm:$0xff]  }
  0xc8   : > { %1963 = vmatpush1.bf16.msra.mxu0 %v5680_v60  ;;  %2222 = vmatpush1.bf16.msra.mxu1 %v5681_v61  ;;  %v5760_v60 = vld [vmem:[%s6153_s21 + $0x210] ss:$8 sps:$4 sm:$0xff]  }
  0xc9   : > { %1964 = vmatprep.subr.bf16.mxu0 %v6013_v0  ;;  %2223 = vmatprep.subr.bf16.mxu1 %v6013_v0  ;;  %v5761_v61 = vld [vmem:[%s6153_s21 + $0x250] ss:$8 sps:$4 sm:$0xff]  }
  0xcb   : > { %1491 = vmatmul.mubr.bf16.gmra.mrb[44].mxu0 %v5692_v63  ;;  %1750 = vmatmul.mubr.bf16.gmra.mrb[44].mxu1 %v5693_v1  ;;  %v5764_v63 = vld [vmem:[%s6153_s21 + $0x224] ss:$8 sps:$4 sm:$0xff]  }
  0xcc   : > { %1965 = vmatpush1.bf16.msra.mxu0 %v5684_v62  ;;  %2224 = vmatpush1.bf16.msra.mxu1 %v5685_v2  ;;  %v5753_v62 = vld [vmem:[%s7465_s1 + $0x10] sm:$0xff]   ;;  %v5766_v1 = vld [vmem:[%s6153_s21 + $0x264] ss:$8 sps:$4 sm:$0xff]   ;;  %v5758_v2 = vld [vmem:[%s7465_s1 + $0x18] sm:$0xff]  }
  0xcd   : > { %1966 = vmatprep.subr.bf16.mxu0 %v6013_v0  ;;  %2225 = vmatprep.subr.bf16.mxu1 %v6013_v0 }
  0xce   : > { %4898 = vmatprep.mubr.msk.bf16.mxu0 %vm381_vm0, %v5700_v3  ;;  %4945 = vmatprep.mubr.msk.bf16.mxu1 %vm381_vm0, %v5703_v4  ;;  %v5759_v3 = vld [vmem:[%s7465_s1 + $0x18] sm:$0xff]   ;;  %v5762_v4 = vld [vmem:[%s7465_s1 + $0x20] sm:$0xff]  }
  0xd0   : > { %1967 = vmatpush1.bf16.msra.mxu0 %v5690_v5  ;;  %2226 = vmatpush1.bf16.msra.mxu1 %v5691_v6  ;;  %v5770_v5 = vld [vmem:[%s6153_s21 + $0x220] ss:$8 sps:$4 sm:$0xff]  }
  0xd1   : > { %1968 = vmatprep.subr.bf16.mxu0 %v6013_v0  ;;  %2227 = vmatprep.subr.bf16.mxu1 %v6013_v0  ;;  %v5771_v6 = vld [vmem:[%s6153_s21 + $0x260] ss:$8 sps:$4 sm:$0xff]  }
  0xd4   : > { %1969 = vmatpush1.bf16.msra.mxu0 %v5694_v7  ;;  %2228 = vmatpush1.bf16.msra.mxu1 %v5695_v8  ;;  %v5763_v7 = vld [vmem:[%s7465_s1 + $0x20] sm:$0xff]   ;;  %v5774_v8 = vld [vmem:[%s6153_s21 + $0x234] ss:$8 sps:$4 sm:$0xff]  }
  0xd5   : > { %1970 = vmatprep.subr.bf16.mxu0 %v6013_v0  ;;  %2229 = vmatprep.subr.bf16.mxu1 %v6013_v0 }
  0xd8   : > { %1971 = vmatpush1.bf16.msra.mxu0 %v1950_v11  ;;  %2230 = vmatpush1.bf16.msra.mxu1 %v2209_v12  ;;  %v5769_v11 = vld [vmem:[%s7465_s1 + $0x28] sm:$0xff]   ;;  %v5772_v12 = vld [vmem:[%s7465_s1 + $0x30] sm:$0xff]  }
  0xd9   : > { %2470 = vmatprep.subr.bf16.mxu0 %v6013_v0  ;;  %2729 = vmatprep.subr.bf16.mxu1 %v6013_v0 }
  0xdb   : > { %1985 = vmatmul.mubr.bf16.vlgmr.msra.gmra.mrb[48].mxu0 %v5698_v13  ;;  %2244 = vmatmul.mubr.bf16.vlgmr.msra.gmra.mrb[48].mxu1 %v5701_v14  ;;  %v5780_v13 = vld [vmem:[%s6153_s21 + $0x230] ss:$8 sps:$4 sm:$0xff]  }
  0xdc   : > { %2471 = vmatpush1.bf16.msra.mxu0 %v5704_v15  ;;  %2730 = vmatpush1.bf16.msra.mxu1 %v5705_v16  ;;  %v5781_v14 = vld [vmem:[%s6153_s21 + $0x270] ss:$8 sps:$4 sm:$0xff]   ;;  %v5788_v16 = vld [vmem:[%s6153_s21 + $0x284] ss:$8 sps:$4 sm:$0xff]  }
  0xdd   : > { %2472 = vmatprep.subr.bf16.mxu0 %v6013_v0  ;;  %2731 = vmatprep.subr.bf16.mxu1 %v6013_v0  ;;  %v5773_v15 = vld [vmem:[%s7465_s1 + $0x30] sm:$0xff]  }
  0xde   : > { %4899 = vmatprep.mubr.msk.bf16.mxu0 %vm381_vm0, %v5710_v17  ;;  %4946 = vmatprep.mubr.msk.bf16.mxu1 %vm381_vm0, %v5712_v18  ;;  %v5791_v17 = vld [vmem:[%s6153_s21 + $0x2c4] ss:$8 sps:$4 sm:$0xff]   ;;  %v5778_v18 = vld [vmem:[%s7465_s1 + $0x38] sm:$0xff]  }
  0xe0   : > { %2473 = vmatpush1.bf16.msra.mxu0 %v5706_v19  ;;  %2732 = vmatpush1.bf16.msra.mxu1 %v5707_v20  ;;  %v5779_v19 = vld [vmem:[%s7465_s1 + $0x38] sm:$0xff]   ;;  %v5782_v20 = vld [vmem:[%s7465_s1 + $0x40] sm:$0xff]  }
  0xe1   : > { %2474 = vmatprep.subr.bf16.mxu0 %v6013_v0  ;;  %2733 = vmatprep.subr.bf16.mxu1 %v6013_v0 }
  0xe3   : > { %1993 = vmatmul.mubr.bf16.gmra.mrb[52].mxu0 %v5716_v22  ;;  %2252 = vmatmul.mubr.bf16.gmra.mrb[52].mxu1 %v5717_v23  ;;  %v5784_v22 = vld [vmem:[%s7465_s1 + $0x48] ss:$0 sps:$4 sm:$0xff]  }
  0xe4   : > { %2475 = vmatpush1.bf16.msra.mxu0 %v5708_v21  ;;  %2734 = vmatpush1.bf16.msra.mxu1 %v5709_v24  ;;  %v5783_v21 = vld [vmem:[%s7465_s1 + $0x40] sm:$0xff]   ;;  %v5785_v23 = vld [vmem:[%s7465_s1 + $0x48] ss:$0 sps:$4 sm:$0xff]   ;;  %v2986_v24 = vsel %vm394_vm1, %v5784_v22, 0 }
  0xe5   : > { %2476 = vmatprep.subr.bf16.mxu0 %v6013_v0  ;;  %2735 = vmatprep.subr.bf16.mxu1 %v6013_v0 }
  0xe6   : > { %4900 = vmatprep.mubr.msk.bf16.mxu0 %vm381_vm0, %v5720_v25  ;;  %4947 = vmatprep.mubr.msk.bf16.mxu1 %vm381_vm0, %v5722_v26  ;;  %v3245_v25 = vsel %vm394_vm1, %v5785_v23, 0  ;;  %v5786_v26 = vld [vmem:[%s6153_s21 + $0x280] ss:$8 sps:$4 sm:$0xff]  }
  0xe8   : > { %2477 = vmatpush1.bf16.msra.mxu0 %v5714_v27  ;;  %2736 = vmatpush1.bf16.msra.mxu1 %v5715_v28  ;;  %v5789_v27 = vld [vmem:[%s6153_s21 + $0x2c0] ss:$8 sps:$4 sm:$0xff]  }
  0xe9   : > { %2478 = vmatprep.subr.bf16.mxu0 %v6013_v0  ;;  %2737 = vmatprep.subr.bf16.mxu1 %v6013_v0  ;;  %v5792_v28 = vld [vmem:[%s7465_s1] sm:$0xff]  }
  0xeb   : > { %2001 = vmatmul.mubr.bf16.gmra.mrb[56].mxu0 %v5726_v30  ;;  %2260 = vmatmul.mubr.bf16.gmra.mrb[56].mxu1 %v5727_v31  ;;  %v5798_v30 = vld [vmem:[%s6153_s21 + $0x294] ss:$8 sps:$4 sm:$0xff]  }
  0xec   : > { %2479 = vmatpush1.bf16.msra.mxu0 %v5718_v29  ;;  %2738 = vmatpush1.bf16.msra.mxu1 %v5719_v32  ;;  %v5793_v29 = vld [vmem:[%s7465_s1] sm:$0xff]   ;;  %v5800_v31 = vld [vmem:[%s6153_s21 + $0x2d4] ss:$8 sps:$4 sm:$0xff]   ;;  %v5794_v32 = vld [vmem:[%s7465_s1 + $0x8] sm:$0xff]  }
  0xed   : > { %2480 = vmatprep.subr.bf16.mxu0 %v6013_v0  ;;  %2739 = vmatprep.subr.bf16.mxu1 %v6013_v0 }
  0xee   : > { %4901 = vmatprep.mubr.msk.bf16.mxu0 %vm381_vm0, %v5730_v33  ;;  %4948 = vmatprep.mubr.msk.bf16.mxu1 %vm381_vm0, %v5732_v34  ;;  %v5795_v33 = vld [vmem:[%s7465_s1 + $0x8] sm:$0xff]   ;;  %v5804_v34 = vld [vmem:[%s6153_s21 + $0x290] ss:$8 sps:$4 sm:$0xff]  }
  0xf0   : > { %2481 = vmatpush1.bf16.msra.mxu0 %v5724_v35  ;;  %2740 = vmatpush1.bf16.msra.mxu1 %v5725_v36  ;;  %v5796_v35 = vld [vmem:[%s7465_s1 + $0x10] sm:$0xff]  }
  0xf1   : > { %2482 = vmatprep.subr.bf16.mxu0 %v6013_v0  ;;  %2741 = vmatprep.subr.bf16.mxu1 %v6013_v0  ;;  %v5805_v36 = vld [vmem:[%s6153_s21 + $0x2d0] ss:$8 sps:$4 sm:$0xff]  }
  0xf3   : > { %2009 = vmatmul.mubr.bf16.gmra.mrb[60].mxu0 %v5736_v37  ;;  %2268 = vmatmul.mubr.bf16.gmra.mrb[60].mxu1 %v5737_v39  ;;  %v5797_v37 = vld [vmem:[%s7465_s1 + $0x10] sm:$0xff]   ;;  %v5810_v39 = vld [vmem:[%s6153_s21 + $0x2e4] ss:$8 sps:$4 sm:$0xff]  }
  0xf4   : > { %2483 = vmatpush1.bf16.msra.mxu0 %v5728_v38  ;;  %2742 = vmatpush1.bf16.msra.mxu1 %v5729_v40  ;;  %v5808_v38 = vld [vmem:[%s6153_s21 + $0x2a4] ss:$8 sps:$4 sm:$0xff]   ;;  %v6812_v40 = vld [vmem:[%s7466_s2] ss:$0 sm:$0xff] }
  0xf5   : > { %2484 = vmatprep.subr.bf16.mxu0 %v6013_v0  ;;  %2743 = vmatprep.subr.bf16.mxu1 %v6013_v0 }
  0xf6   : > { %4992 = vmatprep.mubr.msk.bf16.mxu0 %vm381_vm0, %v5744_v41  ;;  %5039 = vmatprep.mubr.msk.bf16.mxu1 %vm381_vm0, %v5747_v42  ;;  %v5802_v41 = vld [vmem:[%s7465_s1 + $0x18] sm:$0xff]  }
  0xf7   : > { %v5803_v42 = vld [vmem:[%s7465_s1 + $0x18] sm:$0xff]  }
  0xf8   : > { %2485 = vmatpush1.bf16.msra.mxu0 %v5734_v43  ;;  %2744 = vmatpush1.bf16.msra.mxu1 %v5735_v44 }
  0xf9   : > { %2486 = vmatprep.subr.bf16.mxu0 %v6013_v0  ;;  %2745 = vmatprep.subr.bf16.mxu1 %v6013_v0 }
  0xfc   : > { %2487 = vmatpush1.bf16.msra.mxu0 %v5738_v45  ;;  %2746 = vmatpush1.bf16.msra.mxu1 %v5739_v46 }
  0xfd   : > { %2488 = vmatprep.subr.bf16.mxu0 %v6013_v0  ;;  %2747 = vmatprep.subr.bf16.mxu1 %v6013_v0 }
 0x100   : > { %2489 = vmatpush1.bf16.msra.mxu0 %v2468_v49  ;;  %2748 = vmatpush1.bf16.msra.mxu1 %v2727_v50 }
 0x101   : > { %2988 = vmatprep.subr.bf16.mxu0 %v6013_v0  ;;  %3247 = vmatprep.subr.bf16.mxu1 %v6013_v0 }
 0x103   : > { %2503 = vmatmul.mubr.bf16.vlgmr.msra.gmra.mrb[64].mxu0 %v5742_v51  ;;  %2762 = vmatmul.mubr.bf16.vlgmr.msra.gmra.mrb[64].mxu1 %v5745_v52  ;;  %v5806_v51 = vld [vmem:[%s7465_s1 + $0x20] sm:$0xff]  }
 0x104   : > { %2989 = vmatpush1.bf16.msra.mxu0 %v5748_v53  ;;  %3248 = vmatpush1.bf16.msra.mxu1 %v5749_v54  ;;  %v5815_v52 = vld [vmem:[%s6153_s21 + $0x2e0] ss:$8 sps:$4 sm:$0xff]  }
 0x105   : > { %2990 = vmatprep.subr.bf16.mxu0 %v6013_v0  ;;  %3249 = vmatprep.subr.bf16.mxu1 %v6013_v0 }
 0x106   : > { %4993 = vmatprep.mubr.msk.bf16.mxu0 %vm381_vm0, %v5754_v55  ;;  %5040 = vmatprep.mubr.msk.bf16.mxu1 %vm381_vm0, %v5756_v56 }
 0x108   : > { %2991 = vmatpush1.bf16.msra.mxu0 %v5750_v57  ;;  %3250 = vmatpush1.bf16.msra.mxu1 %v5751_v58  ;;  %v5807_v57 = vld [vmem:[%s7465_s1 + $0x20] sm:$0xff]  }
 0x109   : > { %2992 = vmatprep.subr.bf16.mxu0 %v6013_v0  ;;  %3251 = vmatprep.subr.bf16.mxu1 %v6013_v0 }
 0x10b   : > { %2511 = vmatmul.mubr.bf16.gmra.mrb[68].mxu0 %v5760_v60  ;;  %2770 = vmatmul.mubr.bf16.gmra.mrb[68].mxu1 %v5761_v61  ;;  %v5818_v61 = vld [vmem:[%s6153_s21 + $0x2b4] ss:$8 sps:$4 sm:$0xff]  }
 0x10c   : > { %2993 = vmatpush1.bf16.msra.mxu0 %v5752_v59  ;;  %3252 = vmatpush1.bf16.msra.mxu1 %v5753_v62 }
 0x10d   : > { %2994 = vmatprep.subr.bf16.mxu0 %v6013_v0  ;;  %3253 = vmatprep.subr.bf16.mxu1 %v6013_v0 }
 0x10e   : > { %4994 = vmatprep.mubr.msk.bf16.mxu0 %vm381_vm0, %v5764_v63  ;;  %5041 = vmatprep.mubr.msk.bf16.mxu1 %vm381_vm0, %v5766_v1  ;;  %v5820_v1 = vld [vmem:[%s6153_s21 + $0x2f4] ss:$8 sps:$4 sm:$0xff]  }
 0x110   : > { %2995 = vmatpush1.bf16.msra.mxu0 %v5758_v2  ;;  %3254 = vmatpush1.bf16.msra.mxu1 %v5759_v3 }
 0x111   : > { %2996 = vmatprep.subr.bf16.mxu0 %v6013_v0  ;;  %3255 = vmatprep.subr.bf16.mxu1 %v6013_v0 }
 0x113   : > { %2519 = vmatmul.mubr.bf16.gmra.mrb[72].mxu0 %v5770_v5  ;;  %2778 = vmatmul.mubr.bf16.gmra.mrb[72].mxu1 %v5771_v6  ;;  %v5813_v6 = vld [vmem:[%s7465_s1 + $0x28] sm:$0xff]  }
 0x114   : > { %2997 = vmatpush1.bf16.msra.mxu0 %v5762_v4  ;;  %3256 = vmatpush1.bf16.msra.mxu1 %v5763_v7  ;;  %v5812_v4 = vld [vmem:[%s7465_s1 + $0x28] sm:$0xff]  }
 0x115   : > { %2998 = vmatprep.subr.bf16.mxu0 %v6013_v0  ;;  %3257 = vmatprep.subr.bf16.mxu1 %v6013_v0 }
 0x116   : > { %4995 = vmatprep.mubr.msk.bf16.mxu0 %vm381_vm0, %v5774_v8  ;;  %5042 = vmatprep.mubr.msk.bf16.mxu1 %vm381_vm0, %v5776_v9 }
 0x118   : > { %2999 = vmatpush1.bf16.msra.mxu0 %v5768_v10  ;;  %3258 = vmatpush1.bf16.msra.mxu1 %v5769_v11 }
 0x119   : > { %3000 = vmatprep.subr.bf16.mxu0 %v6013_v0  ;;  %3259 = vmatprep.subr.bf16.mxu1 %v6013_v0 }
 0x11b   : > { %2527 = vmatmul.mubr.bf16.gmra.mrb[76].mxu0 %v5780_v13  ;;  %2786 = vmatmul.mubr.bf16.gmra.mrb[76].mxu1 %v5781_v14  ;;  %v5816_v14 = vld [vmem:[%s7465_s1 + $0x30] sm:$0xff]  }
 0x11c   : > { %3001 = vmatpush1.bf16.msra.mxu0 %v5772_v12  ;;  %3260 = vmatpush1.bf16.msra.mxu1 %v5773_v15  ;;  %v5824_v12 = vld [vmem:[%s6153_s21 + $0x2b0] ss:$8 sps:$4 sm:$0xff]  }
 0x11d   : > { %3002 = vmatprep.subr.bf16.mxu0 %v6013_v0  ;;  %3261 = vmatprep.subr.bf16.mxu1 %v6013_v0 }
 0x11e   : > { %5086 = vmatprep.mubr.msk.bf16.mxu0 %vm381_vm0, %v5788_v16  ;;  %5133 = vmatprep.mubr.msk.bf16.mxu1 %vm381_vm0, %v5791_v17  ;;  %v5825_v17 = vld [vmem:[%s6153_s21 + $0x2f0] ss:$8 sps:$4 sm:$0xff]  }
 0x120   : > { %3003 = vmatpush1.bf16.msra.mxu0 %v5778_v18  ;;  %3262 = vmatpush1.bf16.msra.mxu1 %v5779_v19  ;;  %v5817_v19 = vld [vmem:[%s7465_s1 + $0x30] sm:$0xff]  }
 0x121   : > { %3004 = vmatprep.subr.bf16.mxu0 %v6013_v0  ;;  %3263 = vmatprep.subr.bf16.mxu1 %v6013_v0 }
 0x124   : > { %3005 = vmatpush1.bf16.msra.mxu0 %v5782_v20  ;;  %3264 = vmatpush1.bf16.msra.mxu1 %v5783_v21 }
 0x125   : > { %3006 = vmatprep.subr.bf16.mxu0 %v6013_v0  ;;  %3265 = vmatprep.subr.bf16.mxu1 %v6013_v0 }
 0x128   : > { %3007 = vmatpush1.bf16.msra.mxu0 %v2986_v24  ;;  %3266 = vmatpush1.bf16.msra.mxu1 %v3245_v25 }
 0x129   : > { %3506 = vmatprep.subr.bf16.mxu0 %v6013_v0  ;;  %3765 = vmatprep.subr.bf16.mxu1 %v6013_v0 }
 0x12b   : > { %3021 = vmatmul.mubr.bf16.vlgmr.msra.gmra.mrb[80].mxu0 %v5786_v26  ;;  %3280 = vmatmul.mubr.bf16.vlgmr.msra.gmra.mrb[80].mxu1 %v5789_v27  ;;  %v5832_v26 = vld [vmem:[%s6153_s21 + $0x304] ss:$8 sps:$4 sm:$0xff]  }
 0x12c   : > { %3507 = vmatpush1.bf16.msra.mxu0 %v5792_v28  ;;  %3766 = vmatpush1.bf16.msra.mxu1 %v5793_v29  ;;  %v5835_v29 = vld [vmem:[%s6153_s21 + $0x344] ss:$8 sps:$4 sm:$0xff]  }
 0x12d   : > { %3508 = vmatprep.subr.bf16.mxu0 %v6013_v0  ;;  %3767 = vmatprep.subr.bf16.mxu1 %v6013_v0 }
 0x12e   : > { %5087 = vmatprep.mubr.msk.bf16.mxu0 %vm381_vm0, %v5798_v30  ;;  %5134 = vmatprep.mubr.msk.bf16.mxu1 %vm381_vm0, %v5800_v31 }
 0x130   : > { %3509 = vmatpush1.bf16.msra.mxu0 %v5794_v32  ;;  %3768 = vmatpush1.bf16.msra.mxu1 %v5795_v33  ;;  %v5822_v32 = vld [vmem:[%s7465_s1 + $0x38] sm:$0xff]  }
 0x131   : > { %3510 = vmatprep.subr.bf16.mxu0 %v6013_v0  ;;  %3769 = vmatprep.subr.bf16.mxu1 %v6013_v0 }
 0x133   : > { %3029 = vmatmul.mubr.bf16.gmra.mrb[84].mxu0 %v5804_v34  ;;  %3288 = vmatmul.mubr.bf16.gmra.mrb[84].mxu1 %v5805_v36  ;;  %v5823_v34 = vld [vmem:[%s7465_s1 + $0x38] sm:$0xff]  }
 0x134   : > { %3511 = vmatpush1.bf16.msra.mxu0 %v5796_v35  ;;  %3770 = vmatpush1.bf16.msra.mxu1 %v5797_v37 }
 0x135   : > { %3512 = vmatprep.subr.bf16.mxu0 %v6013_v0  ;;  %3771 = vmatprep.subr.bf16.mxu1 %v6013_v0 }
 0x136   : > { %v432_v43 = vpop.f32.mrb[0].mxu0  ;;  %5088 = vmatprep.mubr.msk.bf16.mxu0 %vm381_vm0, %v5808_v38  ;;  %v691_v45 = vpop.f32.mrb[0].mxu1  ;;  %5135 = vmatprep.mubr.msk.bf16.mxu1 %vm381_vm0, %v5810_v39 }
 0x137   : > { %v433_v44 = vadd.f32 %v6812_v40, %v432_v43  ;;  %v434_v46 = vpop.f32.mrb[1].mxu0  ;;  %v692_v48 = vadd.f32 %v6812_v40, %v691_v45  ;;  %v693_v49 = vpop.f32.mrb[1].mxu1 }
 0x138   : > { %v435_v50 = vpop.f32.mrb[2].mxu0  ;;  %3513 = vmatpush1.bf16.msra.mxu0 %v5802_v41  ;;  %v694_v55 = vpop.f32.mrb[2].mxu1  ;;  %3772 = vmatpush1.bf16.msra.mxu1 %v5803_v42  ;;  %v5826_v42 = vld [vmem:[%s7465_s1 + $0x40] sm:$0xff]  }
 0x139   : > { %v463_v53 = vmax.f32 %v433_v44, 0.0  ;;  %v436_v54 = vadd.f32 %v6812_v40, %v435_v50  ;;  %v437_v56 = vpop.f32.mrb[3].mxu0  ;;  %3514 = vmatprep.subr.bf16.mxu0 %v6013_v0  ;;  %v722_v58 = vmax.f32 %v692_v48, 0.0  ;;  %v695_v59 = vadd.f32 %v6812_v40, %v694_v55  ;;  %v696_v60 = vpop.f32.mrb[3].mxu1  ;;  %3773 = vmatprep.subr.bf16.mxu1 %v6013_v0  ;;  %v5827_v46 = vld [vmem:[%s7465_s1 + $0x40] sm:$0xff]  }
 0x13a   : > { %v5828_v50 = vld [vmem:[%s7465_s1 + $0x48] ss:$0 sps:$4 sm:$0xff]  }
 0x13b   : > { %v5349_v62 = vpack.c.bf16 %v463_v53, %v463_v53  ;;  %v464_v63 = vmax.f32 %v436_v54, 0.0  ;;  %3037 = vmatmul.mubr.bf16.gmra.mrb[88].mxu0 %v5814_v47  ;;  %v5357_v2 = vpack.c.bf16 %v722_v58, %v722_v58  ;;  %v723_v3 = vmax.f32 %v695_v59, 0.0  ;;  %3296 = vmatmul.mubr.bf16.gmra.mrb[88].mxu1 %v5815_v52  ;;  %v5829_v54 = vld [vmem:[%s7465_s1 + $0x48] ss:$0 sps:$4 sm:$0xff]  }
 0x13c   : > { %3515 = vmatpush1.bf16.msra.mxu0 %v5806_v51  ;;  %3774 = vmatpush1.bf16.msra.mxu1 %v5807_v57  ;;  %v3504_v60 = vsel %vm394_vm1, %v5828_v50, 0  ;;  %v5855_v50 = vld [vmem:[%s6153_s21 + $0x360] ss:$8 sps:$4 sm:$0xff]  }
 0x13d   : > { %504 = vst.msk [vmem:[%s6846_s4] sm:$0xf] %vm503_vm2, %v5349_v62  ;;  %v5350_v5 = vpack.c.bf16 %v464_v63, %v464_v63  ;;  %3516 = vmatprep.subr.bf16.mxu0 %v6013_v0  ;;  %4675 = vst.msk [vmem:[%s6846_s4 + $0x20] sm:$0xf] %vm503_vm2, %v5357_v2  ;;  %v5358_v7 = vpack.c.bf16 %v723_v3, %v723_v3  ;;  %3775 = vmatprep.subr.bf16.mxu1 %v6013_v0  ;;  %v3763_v62 = vsel %vm394_vm1, %v5829_v54, 0 }
 0x13e   : > { %v440_v8 = vpop.f32.mrb[4].mxu0  ;;  %5089 = vmatprep.mubr.msk.bf16.mxu0 %vm381_vm0, %v5818_v61  ;;  %v699_v10 = vpop.f32.mrb[4].mxu1  ;;  %5136 = vmatprep.mubr.msk.bf16.mxu1 %vm381_vm0, %v5820_v1  ;;  %v5830_v1 = vld [vmem:[%s6153_s21 + $0x300] ss:$8 sps:$4 sm:$0xff]  }
 0x13f   : > { %505 = vst.msk [vmem:[%s6846_s4 + $0x4] sm:$0xf] %vm503_vm2, %v5350_v5  ;;  %v441_v9 = vadd.f32 %v6812_v40, %v440_v8  ;;  %v442_v11 = vpop.f32.mrb[5].mxu0  ;;  %4676 = vst.msk [vmem:[%s6846_s4 + $0x24] sm:$0xf] %vm503_vm2, %v5358_v7  ;;  %v700_v13 = vadd.f32 %v6812_v40, %v699_v10  ;;  %v701_v15 = vpop.f32.mrb[5].mxu1 }
 0x140   : > { %3517 = vmatpush1.bf16.msra.mxu0 %v5812_v4  ;;  %v443_v16 = vpop.f32.mrb[6].mxu0  ;;  %3776 = vmatpush1.bf16.msra.mxu1 %v5813_v6  ;;  %v702_v21 = vpop.f32.mrb[6].mxu1  ;;  %v5833_v5 = vld [vmem:[%s6153_s21 + $0x340] ss:$8 sps:$4 sm:$0xff]  }
 0x141   : > { %3518 = vmatprep.subr.bf16.mxu0 %v6013_v0  ;;  %v465_v18 = vmax.f32 %v441_v9, 0.0  ;;  %v444_v20 = vadd.f32 %v6812_v40, %v443_v16  ;;  %v445_v22 = vpop.f32.mrb[7].mxu0  ;;  %3777 = vmatprep.subr.bf16.mxu1 %v6013_v0  ;;  %v724_v23 = vmax.f32 %v700_v13, 0.0  ;;  %v703_v24 = vadd.f32 %v6812_v40, %v702_v21  ;;  %v704_v25 = vpop.f32.mrb[7].mxu1  ;;  %v5836_v7 = vld [vmem:[%s7465_s1] sm:$0xff]  }
 0x142   : > { %v5837_v11 = vld [vmem:[%s7465_s1] sm:$0xff]   ;;  %v5844_v21 = vld [vmem:[%s6153_s21 + $0x354] ss:$8 sps:$4 sm:$0xff]  }
 0x143   : > { %v5351_v27 = vpack.c.bf16 %v465_v18, %v465_v18  ;;  %v466_v28 = vmax.f32 %v444_v20, 0.0  ;;  %3045 = vmatmul.mubr.bf16.gmra.mrb[92].mxu0 %v5824_v12  ;;  %v5359_v30 = vpack.c.bf16 %v724_v23, %v724_v23  ;;  %v725_v31 = vmax.f32 %v703_v24, 0.0  ;;  %3304 = vmatmul.mubr.bf16.gmra.mrb[92].mxu1 %v5825_v17  ;;  %v5842_v18 = vld [vmem:[%s6153_s21 + $0x314] ss:$8 sps:$4 sm:$0xff]   ;;  %v5838_v24 = vld [vmem:[%s7465_s1 + $0x8] sm:$0xff]  }
 0x144   : > { %3519 = vmatpush1.bf16.msra.mxu0 %v5816_v14  ;;  %3778 = vmatpush1.bf16.msra.mxu1 %v5817_v19  ;;  %v5155_v25 = vld [vmem:[%s6153_s21 + $0x310] sm:$0xff] }
 0x145   : > { %506 = vst.msk [vmem:[%s6846_s4 + $0x8] sm:$0xf] %vm503_vm2, %v5351_v27  ;;  %v5352_v33 = vpack.c.bf16 %v466_v28, %v466_v28  ;;  %3520 = vmatprep.subr.bf16.mxu0 %v6013_v0  ;;  %4677 = vst.msk [vmem:[%s6846_s4 + $0x28] sm:$0xf] %vm503_vm2, %v5359_v30  ;;  %v5360_v35 = vpack.c.bf16 %v725_v31, %v725_v31  ;;  %3779 = vmatprep.subr.bf16.mxu1 %v6013_v0  ;;  %v5839_v28 = vld [vmem:[%s7465_s1 + $0x8] sm:$0xff]   ;;  %v5203_v30 = vld [vmem:[%s6153_s21 + $0x358] sm:$0xff] }
 0x146   : > { %v448_v36 = vpop.f32.mrb[8].mxu0  ;;  %5180 = vmatprep.mubr.msk.bf16.mxu0 %vm381_vm0, %v5832_v26  ;;  %v707_v38 = vpop.f32.mrb[8].mxu1  ;;  %5227 = vmatprep.mubr.msk.bf16.mxu1 %vm381_vm0, %v5835_v29  ;;  %v5156_v26 = vld [vmem:[%s6153_s21 + $0x318] sm:$0xff]  ;;  %v5202_v29 = vld [vmem:[%s6153_s21 + $0x350] sm:$0xff] }
 0x147   : > { %507 = vst.msk [vmem:[%s6846_s4 + $0xc] sm:$0xf] %vm503_vm2, %v5352_v33  ;;  %v449_v37 = vadd.f32 %v6812_v40, %v448_v36  ;;  %v450_v39 = vpop.f32.mrb[9].mxu0  ;;  %4678 = vst.msk [vmem:[%s6846_s4 + $0x2c] sm:$0xf] %vm503_vm2, %v5360_v35  ;;  %v708_v41 = vadd.f32 %v6812_v40, %v707_v38  ;;  %v709_v43 = vpop.f32.mrb[9].mxu1 }
 0x148   : > { %3521 = vmatpush1.bf16.msra.mxu0 %v5822_v32  ;;  %v451_v44 = vpop.f32.mrb[10].mxu0  ;;  %3780 = vmatpush1.bf16.msra.mxu1 %v5823_v34  ;;  %v710_v48 = vpop.f32.mrb[10].mxu1  ;;  %v5164_v32 = vcombine.low %v5155_v25, %v5156_v26  ;;  %v5840_v33 = vld [vmem:[%s7465_s1 + $0x10] sm:$0xff]   ;;  %v5211_v34 = vcombine.low %v5202_v29, %v5203_v30  ;;  %v5850_v36 = vld [vmem:[%s6153_s21 + $0x324] ss:$8 sps:$4 sm:$0xff]   ;;  %v5846_v38 = vld [vmem:[%s7465_s1 + $0x18] sm:$0xff]  }
 0x149   : > { %3522 = vmatprep.subr.bf16.mxu0 %v6013_v0  ;;  %v467_v45 = vmax.f32 %v449_v37, 0.0  ;;  %v452_v47 = vadd.f32 %v6812_v40, %v451_v44  ;;  %v453_v49 = vpop.f32.mrb[11].mxu0  ;;  %3781 = vmatprep.subr.bf16.mxu1 %v6013_v0  ;;  %v726_v51 = vmax.f32 %v708_v41, 0.0  ;;  %v711_v52 = vadd.f32 %v6812_v40, %v710_v48  ;;  %v712_v53 = vpop.f32.mrb[11].mxu1  ;;  %v5841_v35 = vld [vmem:[%s7465_s1 + $0x10] sm:$0xff]   ;;  %v5847_v39 = vld [vmem:[%s7465_s1 + $0x18] sm:$0xff]  }
 0x14a   : > { %v5852_v37 = vld [vmem:[%s6153_s21 + $0x364] ss:$8 sps:$4 sm:$0xff]   ;;  %v5866_v30 = vld [vmem:[%s7465_s1 + $0x38] sm:$0xff]  }
 0x14b   : > { %v5353_v55 = vpack.c.bf16 %v467_v45, %v467_v45  ;;  %v468_v56 = vmax.f32 %v452_v47, 0.0  ;;  %v5361_v57 = vpack.c.bf16 %v726_v51, %v726_v51  ;;  %v727_v58 = vmax.f32 %v711_v52, 0.0  ;;  %v5854_v45 = vld [vmem:[%s6153_s21 + $0x320] ss:$8 sps:$4 sm:$0xff]  }
 0x14c   : > { %3523 = vmatpush1.bf16.msra.mxu0 %v5826_v42  ;;  %3782 = vmatpush1.bf16.msra.mxu1 %v5827_v46  ;;  %v5848_v49 = vld [vmem:[%s7465_s1 + $0x20] sm:$0xff]  }
 0x14d   : > { %508 = vst.msk [vmem:[%s6846_s4 + $0x10] sm:$0xf] %vm503_vm2, %v5353_v55  ;;  %v5354_v59 = vpack.c.bf16 %v468_v56, %v468_v56  ;;  %3524 = vmatprep.subr.bf16.mxu0 %v6013_v0  ;;  %4679 = vst.msk [vmem:[%s6846_s4 + $0x30] sm:$0xf] %vm503_vm2, %v5361_v57  ;;  %v5362_v61 = vpack.c.bf16 %v727_v58, %v727_v58  ;;  %3783 = vmatprep.subr.bf16.mxu1 %v6013_v0  ;;  %v5849_v55 = vld [vmem:[%s7465_s1 + $0x20] sm:$0xff]  }
 0x14e   : > { %v456_v63 = vpop.f32.mrb[12].mxu0  ;;  %v715_v3 = vpop.f32.mrb[12].mxu1 }
 0x14f   : > { %509 = vst.msk [vmem:[%s6846_s4 + $0x14] sm:$0xf] %vm503_vm2, %v5354_v59  ;;  %v457_v2 = vadd.f32 %v6812_v40, %v456_v63  ;;  %v458_v4 = vpop.f32.mrb[13].mxu0  ;;  %4680 = vst.msk [vmem:[%s6846_s4 + $0x34] sm:$0xf] %vm503_vm2, %v5362_v61  ;;  %v716_v6 = vadd.f32 %v6812_v40, %v715_v3  ;;  %v717_v8 = vpop.f32.mrb[13].mxu1 }
 0x150   : > { %3525 = vmatpush1.bf16.msra.mxu0 %v3504_v60  ;;  %v459_v9 = vpop.f32.mrb[14].mxu0  ;;  %3784 = vmatpush1.bf16.msra.mxu1 %v3763_v62  ;;  %v718_v13 = vpop.f32.mrb[14].mxu1  ;;  %v5860_v59 = vld [vmem:[%s6153_s21 + $0x334] ss:$8 sps:$4 sm:$0xff]   ;;  %v5857_v4 = vld [vmem:[%s7465_s1 + $0x28] sm:$0xff]  }
 0x151   : > { %4024 = vmatprep.subr.bf16.mxu0 %v6013_v0  ;;  %v469_v10 = vmax.f32 %v457_v2, 0.0  ;;  %v460_v12 = vadd.f32 %v6812_v40, %v459_v9  ;;  %v461_v14 = vpop.f32.mrb[15].mxu0  ;;  %4283 = vmatprep.subr.bf16.mxu1 %v6013_v0  ;;  %v728_v15 = vmax.f32 %v716_v6, 0.0  ;;  %v719_v16 = vadd.f32 %v6812_v40, %v718_v13  ;;  %v720_v17 = vpop.f32.mrb[15].mxu1  ;;  %v5862_v62 = vld [vmem:[%s6153_s21 + $0x374] ss:$8 sps:$4 sm:$0xff]  }
 0x152   : > { %v5856_v2 = vld [vmem:[%s7465_s1 + $0x28] sm:$0xff]   ;;  %v5859_v17 = vld [vmem:[%s7465_s1 + $0x30] sm:$0xff]  }
 0x153   : > { %3539 = vmatmul.mubr.bf16.vlgmr.msra.gmra.mrb[96].mxu0 %v5830_v1  ;;  %v5355_v19 = vpack.c.bf16 %v469_v10, %v469_v10  ;;  %v470_v20 = vmax.f32 %v460_v12, 0.0  ;;  %3798 = vmatmul.mubr.bf16.vlgmr.msra.gmra.mrb[96].mxu1 %v5833_v5  ;;  %v5363_v22 = vpack.c.bf16 %v728_v15, %v728_v15  ;;  %v729_v23 = vmax.f32 %v719_v16, 0.0  ;;  %v5864_v10 = vld [vmem:[%s6153_s21 + $0x330] ss:$8 sps:$4 sm:$0xff]  }
 0x154   : > { %4025 = vmatpush1.bf16.msra.mxu0 %v5836_v7  ;;  %4284 = vmatpush1.bf16.msra.mxu1 %v5837_v11  ;;  %v5858_v12 = vld [vmem:[%s7465_s1 + $0x30] sm:$0xff]  }
 0x155   : > { %510 = vst.msk [vmem:[%s6846_s4 + $0x18] sm:$0xf] %vm503_vm2, %v5355_v19  ;;  %v5356_v27 = vpack.c.bf16 %v470_v20, %v470_v20  ;;  %4026 = vmatprep.subr.bf16.mxu0 %v6013_v0  ;;  %4681 = vst.msk [vmem:[%s6846_s4 + $0x38] sm:$0xf] %vm503_vm2, %v5363_v22  ;;  %v5364_v31 = vpack.c.bf16 %v729_v23, %v729_v23  ;;  %4285 = vmatprep.subr.bf16.mxu1 %v6013_v0  ;;  %v5865_v15 = vld [vmem:[%s6153_s21 + $0x370] ss:$8 sps:$4 sm:$0xff]  }
 0x156   : > { %5181 = vmatprep.mubr.msk.bf16.mxu0 %vm381_vm0, %v5842_v18  ;;  %5228 = vmatprep.mubr.msk.bf16.mxu1 %vm381_vm0, %v5844_v21 }
 0x157   : > { %511 = vst.msk [vmem:[%s6846_s4 + $0x1c] sm:$0xf] %vm503_vm2, %v5356_v27  ;;  %4682 = vst.msk [vmem:[%s6846_s4 + $0x3c] sm:$0xf] %vm503_vm2, %v5364_v31  ;;  %v5877_v27 = vld [vmem:[%s6153_s21 + $0x3c4] ss:$8 sps:$4 sm:$0xff]  }
 0x158   : > { %4027 = vmatpush1.bf16.msra.mxu0 %v5838_v24  ;;  %4286 = vmatpush1.bf16.msra.mxu1 %v5839_v28  ;;  %v5874_v24 = vld [vmem:[%s6153_s21 + $0x384] ss:$8 sps:$4 sm:$0xff]  }
 0x159   : > { %4028 = vmatprep.subr.bf16.mxu0 %v6013_v0  ;;  %4287 = vmatprep.subr.bf16.mxu1 %v6013_v0 }
 0x15b   : > { %3547 = vmatmul.mubr.bf16.gmra.mrb[100].mxu0 %v5164_v32  ;;  %3806 = vmatmul.mubr.bf16.gmra.mrb[100].mxu1 %v5211_v34  ;;  %v5867_v32 = vld [vmem:[%s7465_s1 + $0x38] sm:$0xff]  }
 0x15c   : > { %4029 = vmatpush1.bf16.msra.mxu0 %v5840_v33  ;;  %4288 = vmatpush1.bf16.msra.mxu1 %v5841_v35 }
 0x15d   : > { %4030 = vmatprep.subr.bf16.mxu0 %v6013_v0  ;;  %4289 = vmatprep.subr.bf16.mxu1 %v6013_v0 }
 0x15e   : > { %v950_v41 = vpop.f32.mrb[16].mxu0  ;;  %5182 = vmatprep.mubr.msk.bf16.mxu0 %vm381_vm0, %v5850_v36  ;;  %v1209_v43 = vpop.f32.mrb[16].mxu1  ;;  %5229 = vmatprep.mubr.msk.bf16.mxu1 %vm381_vm0, %v5852_v37 }
 0x15f   : > { %v951_v42 = vadd.f32 %v6812_v40, %v950_v41  ;;  %v952_v44 = vpop.f32.mrb[17].mxu0  ;;  %v1210_v46 = vadd.f32 %v6812_v40, %v1209_v43  ;;  %v1211_v47 = vpop.f32.mrb[17].mxu1 }
 0x160   : > { %v953_v48 = vpop.f32.mrb[18].mxu0  ;;  %4031 = vmatpush1.bf16.msra.mxu0 %v5846_v38  ;;  %v1212_v53 = vpop.f32.mrb[18].mxu1  ;;  %4290 = vmatpush1.bf16.msra.mxu1 %v5847_v39  ;;  %v5868_v39 = vld [vmem:[%s7465_s1 + $0x40] sm:$0xff]  }
 0x161   : > { %v981_v51 = vmax.f32 %v951_v42, 0.0  ;;  %v954_v52 = vadd.f32 %v6812_v40, %v953_v48  ;;  %v955_v54 = vpop.f32.mrb[19].mxu0  ;;  %4032 = vmatprep.subr.bf16.mxu0 %v6013_v0  ;;  %v1240_v56 = vmax.f32 %v1210_v46, 0.0  ;;  %v1213_v57 = vadd.f32 %v6812_v40, %v1212_v53  ;;  %v1214_v58 = vpop.f32.mrb[19].mxu1  ;;  %4291 = vmatprep.subr.bf16.mxu1 %v6013_v0  ;;  %v5869_v44 = vld [vmem:[%s7465_s1 + $0x40] sm:$0xff]  }
 0x162   : > { %v5870_v48 = vld [vmem:[%s7465_s1 + $0x48] ss:$0 sps:$4 sm:$0xff]  }
 0x163   : > { %v5365_v60 = vpack.c.bf16 %v981_v51, %v981_v51  ;;  %v982_v61 = vmax.f32 %v954_v52, 0.0  ;;  %3555 = vmatmul.mubr.bf16.gmra.mrb[104].mxu0 %v5854_v45  ;;  %v5373_v63 = vpack.c.bf16 %v1240_v56, %v1240_v56  ;;  %v1241_v1 = vmax.f32 %v1213_v57, 0.0  ;;  %3814 = vmatmul.mubr.bf16.gmra.mrb[104].mxu1 %v5855_v50  ;;  %v5871_v52 = vld [vmem:[%s7465_s1 + $0x48] ss:$0 sps:$4 sm:$0xff]  }
 0x164   : > { %4033 = vmatpush1.bf16.msra.mxu0 %v5848_v49  ;;  %4292 = vmatpush1.bf16.msra.mxu1 %v5849_v55  ;;  %v4022_v58 = vsel %vm394_vm1, %v5870_v48, 0 }
 0x165   : > { %4722 = vst.msk [vmem:[%s6846_s4 + $0x40] sm:$0xf] %vm503_vm2, %v5365_v60  ;;  %v5366_v3 = vpack.c.bf16 %v982_v61, %v982_v61  ;;  %4034 = vmatprep.subr.bf16.mxu0 %v6013_v0  ;;  %4769 = vst.msk [vmem:[%s6846_s4 + $0x60] sm:$0xf] %vm503_vm2, %v5373_v63  ;;  %v5374_v5 = vpack.c.bf16 %v1241_v1, %v1241_v1  ;;  %4293 = vmatprep.subr.bf16.mxu1 %v6013_v0  ;;  %v4281_v60 = vsel %vm394_vm1, %v5871_v52, 0 }
 0x166   : > { %v958_v6 = vpop.f32.mrb[20].mxu0  ;;  %5183 = vmatprep.mubr.msk.bf16.mxu0 %vm381_vm0, %v5860_v59  ;;  %v1217_v8 = vpop.f32.mrb[20].mxu1  ;;  %5230 = vmatprep.mubr.msk.bf16.mxu1 %vm381_vm0, %v5862_v62  ;;  %v5872_v62 = vld [vmem:[%s6153_s21 + $0x380] ss:$8 sps:$4 sm:$0xff]  }
 0x167   : > { %4723 = vst.msk [vmem:[%s6846_s4 + $0x44] sm:$0xf] %vm503_vm2, %v5366_v3  ;;  %v959_v7 = vadd.f32 %v6812_v40, %v958_v6  ;;  %v960_v9 = vpop.f32.mrb[21].mxu0  ;;  %4770 = vst.msk [vmem:[%s6846_s4 + $0x64] sm:$0xf] %vm503_vm2, %v5374_v5  ;;  %v1218_v11 = vadd.f32 %v6812_v40, %v1217_v8  ;;  %v1219_v13 = vpop.f32.mrb[21].mxu1 }
 0x168   : > { %4035 = vmatpush1.bf16.msra.mxu0 %v5856_v2  ;;  %v961_v14 = vpop.f32.mrb[22].mxu0  ;;  %4294 = vmatpush1.bf16.msra.mxu1 %v5857_v4  ;;  %v1220_v19 = vpop.f32.mrb[22].mxu1  ;;  %v5875_v3 = vld [vmem:[%s6153_s21 + $0x3c0] ss:$8 sps:$4 sm:$0xff]  }
 0x169   : > { %4036 = vmatprep.subr.bf16.mxu0 %v6013_v0  ;;  %v983_v16 = vmax.f32 %v959_v7, 0.0  ;;  %v962_v18 = vadd.f32 %v6812_v40, %v961_v14  ;;  %v963_v20 = vpop.f32.mrb[23].mxu0  ;;  %4295 = vmatprep.subr.bf16.mxu1 %v6013_v0  ;;  %v1242_v21 = vmax.f32 %v1218_v11, 0.0  ;;  %v1221_v22 = vadd.f32 %v6812_v40, %v1220_v19  ;;  %v1222_v23 = vpop.f32.mrb[23].mxu1  ;;  %v5880_v11 = vld [vmem:[%s6153_s21 + $0x3d4] ss:$8 sps:$4 sm:$0xff]  }
 0x16a   : > { %v5884_v23 = vld [vmem:[%s6153_s21 + $0x3a4] ss:$8 sps:$4 sm:$0xff]  }
 0x16b   : > { %v5367_v25 = vpack.c.bf16 %v983_v16, %v983_v16  ;;  %v984_v26 = vmax.f32 %v962_v18, 0.0  ;;  %3563 = vmatmul.mubr.bf16.gmra.mrb[108].mxu0 %v5864_v10  ;;  %v5375_v28 = vpack.c.bf16 %v1242_v21, %v1242_v21  ;;  %v1243_v29 = vmax.f32 %v1221_v22, 0.0  ;;  %3822 = vmatmul.mubr.bf16.gmra.mrb[108].mxu1 %v5865_v15  ;;  %v5882_v21 = vld [vmem:[%s6153_s21 + $0x390] ss:$8 sps:$4 sm:$0xff]  }
 0x16c   : > { %4037 = vmatpush1.bf16.msra.mxu0 %v5858_v12  ;;  %4296 = vmatpush1.bf16.msra.mxu1 %v5859_v17  ;;  %v5883_v22 = vld [vmem:[%s6153_s21 + $0x3d0] ss:$8 sps:$4 sm:$0xff]  }
 0x16d   : > { %4724 = vst.msk [vmem:[%s6846_s4 + $0x48] sm:$0xf] %vm503_vm2, %v5367_v25  ;;  %v5368_v31 = vpack.c.bf16 %v984_v26, %v984_v26  ;;  %4038 = vmatprep.subr.bf16.mxu0 %v6013_v0  ;;  %4771 = vst.msk [vmem:[%s6846_s4 + $0x68] sm:$0xf] %vm503_vm2, %v5375_v28  ;;  %v5376_v33 = vpack.c.bf16 %v1243_v29, %v1243_v29  ;;  %4297 = vmatprep.subr.bf16.mxu1 %v6013_v0  ;;  %v5888_v29 = vld [vmem:[%s6153_s21 + $0x3a0] ss:$8 sps:$4 sm:$0xff]  }
 0x16e   : > { %v966_v34 = vpop.f32.mrb[24].mxu0  ;;  %5274 = vmatprep.mubr.msk.bf16.mxu0 %vm381_vm0, %v5874_v24  ;;  %v1225_v36 = vpop.f32.mrb[24].mxu1  ;;  %5321 = vmatprep.mubr.msk.bf16.mxu1 %vm381_vm0, %v5877_v27  ;;  %v5886_v24 = vld [vmem:[%s6153_s21 + $0x3e4] ss:$8 sps:$4 sm:$0xff]  }
 0x16f   : > { %4725 = vst.msk [vmem:[%s6846_s4 + $0x4c] sm:$0xf] %vm503_vm2, %v5368_v31  ;;  %v967_v35 = vadd.f32 %v6812_v40, %v966_v34  ;;  %v968_v37 = vpop.f32.mrb[25].mxu0  ;;  %4772 = vst.msk [vmem:[%s6846_s4 + $0x6c] sm:$0xf] %vm503_vm2, %v5376_v33  ;;  %v1226_v38 = vadd.f32 %v6812_v40, %v1225_v36  ;;  %v1227_v41 = vpop.f32.mrb[25].mxu1 }
 0x170   : > { %4039 = vmatpush1.bf16.msra.mxu0 %v5866_v30  ;;  %v969_v42 = vpop.f32.mrb[26].mxu0  ;;  %4298 = vmatpush1.bf16.msra.mxu1 %v5867_v32  ;;  %v1228_v46 = vpop.f32.mrb[26].mxu1  ;;  %v5889_v33 = vld [vmem:[%s6153_s21 + $0x3e0] ss:$8 sps:$4 sm:$0xff]   ;;  %v5890_v34 = vld [vmem:[%s6153_s21 + $0x3b4] ss:$8 sps:$4 sm:$0xff]  }
 0x171   : > { %4040 = vmatprep.subr.bf16.mxu0 %v6013_v0  ;;  %v985_v43 = vmax.f32 %v967_v35, 0.0  ;;  %v970_v45 = vadd.f32 %v6812_v40, %v969_v42  ;;  %v971_v47 = vpop.f32.mrb[27].mxu0  ;;  %4299 = vmatprep.subr.bf16.mxu1 %v6013_v0  ;;  %v1244_v49 = vmax.f32 %v1226_v38, 0.0  ;;  %v1229_v50 = vadd.f32 %v6812_v40, %v1228_v46  ;;  %v1230_v51 = vpop.f32.mrb[27].mxu1 }
 0x172   : > { %v5894_v51 = vld [vmem:[%s6153_s21 + $0x3b0] ss:$8 sps:$4 sm:$0xff]  }
 0x173   : > { %v5369_v53 = vpack.c.bf16 %v985_v43, %v985_v43  ;;  %v986_v54 = vmax.f32 %v970_v45, 0.0  ;;  %v5377_v55 = vpack.c.bf16 %v1244_v49, %v1244_v49  ;;  %v1245_v56 = vmax.f32 %v1229_v50, 0.0 }
 0x174   : > { %4041 = vmatpush1.bf16.msra.mxu0 %v5868_v39  ;;  %4300 = vmatpush1.bf16.msra.mxu1 %v5869_v44  ;;  %v5892_v39 = vld [vmem:[%s6153_s21 + $0x3f4] ss:$8 sps:$4 sm:$0xff]  }
 0x175   : > { %4726 = vst.msk [vmem:[%s6846_s4 + $0x50] sm:$0xf] %vm503_vm2, %v5369_v53  ;;  %v5370_v57 = vpack.c.bf16 %v986_v54, %v986_v54  ;;  %4042 = vmatprep.subr.bf16.mxu0 %v6013_v0  ;;  %4773 = vst.msk [vmem:[%s6846_s4 + $0x70] sm:$0xf] %vm503_vm2, %v5377_v55  ;;  %v5378_v59 = vpack.c.bf16 %v1245_v56, %v1245_v56  ;;  %4301 = vmatprep.subr.bf16.mxu1 %v6013_v0  ;;  %v5878_v0 = vld [vmem:[%s6153_s21 + $0x394] ss:$8 sps:$4 sm:$0xff]  }
 0x176   : > { %v974_v61 = vpop.f32.mrb[28].mxu0  ;;  %v1233_v1 = vpop.f32.mrb[28].mxu1  ;;  %v5895_v55 = vld [vmem:[%s6153_s21 + $0x3f0] ss:$8 sps:$4 sm:$0xff]  }
 0x177   : > { %4727 = vst.msk [vmem:[%s6846_s4 + $0x54] sm:$0xf] %vm503_vm2, %v5370_v57  ;;  %v975_v63 = vadd.f32 %v6812_v40, %v974_v61  ;;  %v976_v2 = vpop.f32.mrb[29].mxu0  ;;  %4774 = vst.msk [vmem:[%s6846_s4 + $0x74] sm:$0xf] %vm503_vm2, %v5378_v59  ;;  %v1234_v4 = vadd.f32 %v6812_v40, %v1233_v1  ;;  %v1235_v5 = vpop.f32.mrb[29].mxu1 }
 0x178   : > { %4043 = vmatpush1.bf16.msra.mxu0 %v4022_v58  ;;  %v977_v6 = vpop.f32.mrb[30].mxu0  ;;  %4302 = vmatpush1.bf16.msra.mxu1 %v4281_v60  ;;  %v1236_v9 = vpop.f32.mrb[30].mxu1 }
 0x179   : > { %v987_v7 = vmax.f32 %v975_v63, 0.0  ;;  %v978_v8 = vadd.f32 %v6812_v40, %v977_v6  ;;  %v979_v10 = vpop.f32.mrb[31].mxu0  ;;  %v1246_v12 = vmax.f32 %v1234_v4, 0.0  ;;  %v1237_v13 = vadd.f32 %v6812_v40, %v1236_v9  ;;  %v1238_v14 = vpop.f32.mrb[31].mxu1 }
 0x17b   : > { %4057 = vmatmul.mubr.bf16.vlgmr.msra.gmra.mrb[112].mxu0 %v5872_v62  ;;  %v5371_v15 = vpack.c.bf16 %v987_v7, %v987_v7  ;;  %v988_v16 = vmax.f32 %v978_v8, 0.0  ;;  %4316 = vmatmul.mubr.bf16.vlgmr.msra.gmra.mrb[112].mxu1 %v5875_v3  ;;  %v5379_v17 = vpack.c.bf16 %v1246_v12, %v1246_v12  ;;  %v1247_v18 = vmax.f32 %v1237_v13, 0.0 }
 0x17c   : > { %5275 = vmatprep.mubr.msk.bf16.mxu0 %vm381_vm0, %v5878_v0  ;;  %5322 = vmatprep.mubr.msk.bf16.mxu1 %vm381_vm0, %v5880_v11 }
 0x17d   : > { %4728 = vst.msk [vmem:[%s6846_s4 + $0x58] sm:$0xf] %vm503_vm2, %v5371_v15  ;;  %v5372_v19 = vpack.c.bf16 %v988_v16, %v988_v16  ;;  %4775 = vst.msk [vmem:[%s6846_s4 + $0x78] sm:$0xf] %vm503_vm2, %v5379_v17  ;;  %v5380_v20 = vpack.c.bf16 %v1247_v18, %v1247_v18 }
 0x17f   : > { %4729 = vst.msk [vmem:[%s6846_s4 + $0x5c] sm:$0xf] %vm503_vm2, %v5372_v19  ;;  %4776 = vst.msk [vmem:[%s6846_s4 + $0x7c] sm:$0xf] %vm503_vm2, %v5380_v20 }
 0x183   : > { %4065 = vmatmul.mubr.bf16.gmra.mrb[116].mxu0 %v5882_v21  ;;  %4324 = vmatmul.mubr.bf16.gmra.mrb[116].mxu1 %v5883_v22 }
 0x184   : > { %5276 = vmatprep.mubr.msk.bf16.mxu0 %vm381_vm0, %v5884_v23  ;;  %5323 = vmatprep.mubr.msk.bf16.mxu1 %vm381_vm0, %v5886_v24 }
 0x186   : > { %v1468_v25 = vpop.f32.mrb[32].mxu0  ;;  %v1727_v27 = vpop.f32.mrb[32].mxu1 }
 0x187   : > { %v1469_v26 = vadd.f32 %v6812_v40, %v1468_v25  ;;  %v1470_v28 = vpop.f32.mrb[33].mxu0  ;;  %v1728_v30 = vadd.f32 %v6812_v40, %v1727_v27  ;;  %v1729_v31 = vpop.f32.mrb[33].mxu1 }
 0x188   : > { %v1471_v32 = vpop.f32.mrb[34].mxu0  ;;  %v1730_v37 = vpop.f32.mrb[34].mxu1 }
 0x189   : > { %v1499_v35 = vmax.f32 %v1469_v26, 0.0  ;;  %v1472_v36 = vadd.f32 %v6812_v40, %v1471_v32  ;;  %v1473_v38 = vpop.f32.mrb[35].mxu0  ;;  %v1758_v41 = vmax.f32 %v1728_v30, 0.0  ;;  %v1731_v42 = vadd.f32 %v6812_v40, %v1730_v37  ;;  %v1732_v43 = vpop.f32.mrb[35].mxu1 }
 0x18b   : > { %v5381_v44 = vpack.c.bf16 %v1499_v35, %v1499_v35  ;;  %v1500_v45 = vmax.f32 %v1472_v36, 0.0  ;;  %4073 = vmatmul.mubr.bf16.gmra.mrb[120].mxu0 %v5888_v29  ;;  %v5389_v46 = vpack.c.bf16 %v1758_v41, %v1758_v41  ;;  %v1759_v47 = vmax.f32 %v1731_v42, 0.0  ;;  %4332 = vmatmul.mubr.bf16.gmra.mrb[120].mxu1 %v5889_v33 }
 0x18c   : > { %5277 = vmatprep.mubr.msk.bf16.mxu0 %vm381_vm0, %v5890_v34  ;;  %5324 = vmatprep.mubr.msk.bf16.mxu1 %vm381_vm0, %v5892_v39 }
 0x18d   : > { %4816 = vst.msk [vmem:[%s6846_s4 + $0x80] sm:$0xf] %vm503_vm2, %v5381_v44  ;;  %v5382_v48 = vpack.c.bf16 %v1500_v45, %v1500_v45  ;;  %4863 = vst.msk [vmem:[%s6846_s4 + $0xa0] sm:$0xf] %vm503_vm2, %v5389_v46  ;;  %v5390_v49 = vpack.c.bf16 %v1759_v47, %v1759_v47 }
 0x18e   : > { %v1476_v50 = vpop.f32.mrb[36].mxu0  ;;  %v1735_v53 = vpop.f32.mrb[36].mxu1 }
 0x18f   : > { %4817 = vst.msk [vmem:[%s6846_s4 + $0x84] sm:$0xf] %vm503_vm2, %v5382_v48  ;;  %v1477_v52 = vadd.f32 %v6812_v40, %v1476_v50  ;;  %v1478_v54 = vpop.f32.mrb[37].mxu0  ;;  %4864 = vst.msk [vmem:[%s6846_s4 + $0xa4] sm:$0xf] %vm503_vm2, %v5390_v49  ;;  %v1736_v56 = vadd.f32 %v6812_v40, %v1735_v53  ;;  %v1737_v57 = vpop.f32.mrb[37].mxu1 }
 0x190   : > { %v1479_v58 = vpop.f32.mrb[38].mxu0  ;;  %v1738_v61 = vpop.f32.mrb[38].mxu1  ;;  %v7166_v49 = vld [vmem:[%s7466_s2] ss:$0 sm:$0xff] }
 0x191   : > { %v1501_v59 = vmax.f32 %v1477_v52, 0.0  ;;  %v1480_v60 = vadd.f32 %v6812_v40, %v1479_v58  ;;  %v1481_v62 = vpop.f32.mrb[39].mxu0  ;;  %v1760_v63 = vmax.f32 %v1736_v56, 0.0  ;;  %v1739_v1 = vadd.f32 %v6812_v40, %v1738_v61  ;;  %v1740_v2 = vpop.f32.mrb[39].mxu1 }
 0x193   : > { %4081 = vmatmul.mubr.bf16.gmra.mrb[124].mxu0 %v5894_v51  ;;  %v5383_v3 = vpack.c.bf16 %v1501_v59, %v1501_v59  ;;  %v1502_v4 = vmax.f32 %v1480_v60, 0.0  ;;  %4340 = vmatmul.mubr.bf16.gmra.mrb[124].mxu1 %v5895_v55  ;;  %v5391_v5 = vpack.c.bf16 %v1760_v63, %v1760_v63  ;;  %v1761_v6 = vmax.f32 %v1739_v1, 0.0 }
 0x195   : > { %4818 = vst.msk [vmem:[%s6846_s4 + $0x88] sm:$0xf] %vm503_vm2, %v5383_v3  ;;  %v5384_v0 = vpack.c.bf16 %v1502_v4, %v1502_v4  ;;  %4865 = vst.msk [vmem:[%s6846_s4 + $0xa8] sm:$0xf] %vm503_vm2, %v5391_v5  ;;  %v5392_v7 = vpack.c.bf16 %v1761_v6, %v1761_v6 }
 0x196   : > { %v1484_v8 = vpop.f32.mrb[40].mxu0  ;;  %v1743_v10 = vpop.f32.mrb[40].mxu1 }
 0x197   : > { %4819 = vst.msk [vmem:[%s6846_s4 + $0x8c] sm:$0xf] %vm503_vm2, %v5384_v0  ;;  %v1485_v9 = vadd.f32 %v6812_v40, %v1484_v8  ;;  %v1486_v11 = vpop.f32.mrb[41].mxu0  ;;  %4866 = vst.msk [vmem:[%s6846_s4 + $0xac] sm:$0xf] %vm503_vm2, %v5392_v7  ;;  %v1744_v12 = vadd.f32 %v6812_v40, %v1743_v10  ;;  %v1745_v13 = vpop.f32.mrb[41].mxu1 }
 0x198   : > { %v1487_v14 = vpop.f32.mrb[42].mxu0  ;;  %v1746_v17 = vpop.f32.mrb[42].mxu1 }
 0x199   : > { %v1503_v15 = vmax.f32 %v1485_v9, 0.0  ;;  %v1488_v16 = vadd.f32 %v6812_v40, %v1487_v14  ;;  %v1489_v18 = vpop.f32.mrb[43].mxu0  ;;  %v1762_v19 = vmax.f32 %v1744_v12, 0.0  ;;  %v1747_v20 = vadd.f32 %v6812_v40, %v1746_v17  ;;  %v1748_v21 = vpop.f32.mrb[43].mxu1 }
 0x19b   : > { %v5385_v22 = vpack.c.bf16 %v1503_v15, %v1503_v15  ;;  %v1504_v23 = vmax.f32 %v1488_v16, 0.0  ;;  %v5393_v24 = vpack.c.bf16 %v1762_v19, %v1762_v19  ;;  %v1763_v25 = vmax.f32 %v1747_v20, 0.0 }
 0x19d   : > { %4820 = vst.msk [vmem:[%s6846_s4 + $0x90] sm:$0xf] %vm503_vm2, %v5385_v22  ;;  %v5386_v26 = vpack.c.bf16 %v1504_v23, %v1504_v23  ;;  %4867 = vst.msk [vmem:[%s6846_s4 + $0xb0] sm:$0xf] %vm503_vm2, %v5393_v24  ;;  %v5394_v27 = vpack.c.bf16 %v1763_v25, %v1763_v25 }
 0x19e   : > { %v1492_v28 = vpop.f32.mrb[44].mxu0  ;;  %v1751_v30 = vpop.f32.mrb[44].mxu1 }
 0x19f   : > { %4821 = vst.msk [vmem:[%s6846_s4 + $0x94] sm:$0xf] %vm503_vm2, %v5386_v26  ;;  %v1493_v29 = vadd.f32 %v6812_v40, %v1492_v28  ;;  %v1494_v31 = vpop.f32.mrb[45].mxu0  ;;  %4868 = vst.msk [vmem:[%s6846_s4 + $0xb4] sm:$0xf] %vm503_vm2, %v5394_v27  ;;  %v1752_v32 = vadd.f32 %v6812_v40, %v1751_v30  ;;  %v1753_v33 = vpop.f32.mrb[45].mxu1 }
 0x1a0   : > { %v1495_v34 = vpop.f32.mrb[46].mxu0  ;;  %v1754_v37 = vpop.f32.mrb[46].mxu1 }
 0x1a1   : > { %v1505_v35 = vmax.f32 %v1493_v29, 0.0  ;;  %v1496_v36 = vadd.f32 %v6812_v40, %v1495_v34  ;;  %v1497_v38 = vpop.f32.mrb[47].mxu0  ;;  %v1764_v39 = vmax.f32 %v1752_v32, 0.0  ;;  %v1755_v41 = vadd.f32 %v6812_v40, %v1754_v37  ;;  %v1756_v42 = vpop.f32.mrb[47].mxu1 }
 0x1a3   : > { %v5387_v43 = vpack.c.bf16 %v1505_v35, %v1505_v35  ;;  %v1506_v44 = vmax.f32 %v1496_v36, 0.0  ;;  %v5395_v45 = vpack.c.bf16 %v1764_v39, %v1764_v39  ;;  %v1765_v46 = vmax.f32 %v1755_v41, 0.0 }
 0x1a5   : > { %4822 = vst.msk [vmem:[%s6846_s4 + $0x98] sm:$0xf] %vm503_vm2, %v5387_v43  ;;  %v5388_v47 = vpack.c.bf16 %v1506_v44, %v1506_v44  ;;  %4869 = vst.msk [vmem:[%s6846_s4 + $0xb8] sm:$0xf] %vm503_vm2, %v5395_v45  ;;  %v5396_v48 = vpack.c.bf16 %v1765_v46, %v1765_v46 }
 0x1a7   : > { %4823 = vst.msk [vmem:[%s6846_s4 + $0x9c] sm:$0xf] %vm503_vm2, %v5388_v47  ;;  %4870 = vst.msk [vmem:[%s6846_s4 + $0xbc] sm:$0xf] %vm503_vm2, %v5396_v48 }
 0x1ae   : > { %v1986_v40 = vpop.f32.mrb[48].mxu0  ;;  %v2245_v51 = vpop.f32.mrb[48].mxu1 }
 0x1af   : > { %v1987_v50 = vadd.f32 %v7166_v49, %v1986_v40  ;;  %v1988_v52 = vpop.f32.mrb[49].mxu0  ;;  %v2246_v53 = vadd.f32 %v7166_v49, %v2245_v51  ;;  %v2247_v54 = vpop.f32.mrb[49].mxu1 }
 0x1b0   : > { %v1989_v55 = vpop.f32.mrb[50].mxu0  ;;  %v2248_v58 = vpop.f32.mrb[50].mxu1 }
 0x1b1   : > { %v2017_v56 = vmax.f32 %v1987_v50, 0.0  ;;  %v1990_v57 = vadd.f32 %v7166_v49, %v1989_v55  ;;  %v1991_v59 = vpop.f32.mrb[51].mxu0  ;;  %v2276_v60 = vmax.f32 %v2246_v53, 0.0  ;;  %v2249_v61 = vadd.f32 %v7166_v49, %v2248_v58  ;;  %v2250_v62 = vpop.f32.mrb[51].mxu1 }
 0x1b3   : > { %v5397_v63 = vpack.c.bf16 %v2017_v56, %v2017_v56  ;;  %v2018_v1 = vmax.f32 %v1990_v57, 0.0  ;;  %v5405_v2 = vpack.c.bf16 %v2276_v60, %v2276_v60  ;;  %v2277_v3 = vmax.f32 %v2249_v61, 0.0 }
 0x1b5   : > { %4910 = vst.msk [vmem:[%s6846_s4 + $0xc0] sm:$0xf] %vm503_vm2, %v5397_v63  ;;  %v5398_v4 = vpack.c.bf16 %v2018_v1, %v2018_v1  ;;  %4957 = vst.msk [vmem:[%s6846_s4 + $0xe0] sm:$0xf] %vm503_vm2, %v5405_v2  ;;  %v5406_v5 = vpack.c.bf16 %v2277_v3, %v2277_v3 }
 0x1b6   : > { %v1994_v6 = vpop.f32.mrb[52].mxu0  ;;  %v2253_v7 = vpop.f32.mrb[52].mxu1 }
 0x1b7   : > { %4911 = vst.msk [vmem:[%s6846_s4 + $0xc4] sm:$0xf] %vm503_vm2, %v5398_v4  ;;  %v1995_v0 = vadd.f32 %v7166_v49, %v1994_v6  ;;  %v1996_v8 = vpop.f32.mrb[53].mxu0  ;;  %4958 = vst.msk [vmem:[%s6846_s4 + $0xe4] sm:$0xf] %vm503_vm2, %v5406_v5  ;;  %v2254_v9 = vadd.f32 %v7166_v49, %v2253_v7  ;;  %v2255_v10 = vpop.f32.mrb[53].mxu1 }
 0x1b8   : > { %v1997_v11 = vpop.f32.mrb[54].mxu0  ;;  %v2256_v14 = vpop.f32.mrb[54].mxu1 }
 0x1b9   : > { %v2019_v12 = vmax.f32 %v1995_v0, 0.0  ;;  %v1998_v13 = vadd.f32 %v7166_v49, %v1997_v11  ;;  %v1999_v15 = vpop.f32.mrb[55].mxu0  ;;  %v2278_v16 = vmax.f32 %v2254_v9, 0.0  ;;  %v2257_v17 = vadd.f32 %v7166_v49, %v2256_v14  ;;  %v2258_v18 = vpop.f32.mrb[55].mxu1 }
 0x1bb   : > { %v5399_v19 = vpack.c.bf16 %v2019_v12, %v2019_v12  ;;  %v2020_v20 = vmax.f32 %v1998_v13, 0.0  ;;  %v5407_v21 = vpack.c.bf16 %v2278_v16, %v2278_v16  ;;  %v2279_v22 = vmax.f32 %v2257_v17, 0.0 }
 0x1bd   : > { %4912 = vst.msk [vmem:[%s6846_s4 + $0xc8] sm:$0xf] %vm503_vm2, %v5399_v19  ;;  %v5400_v23 = vpack.c.bf16 %v2020_v20, %v2020_v20  ;;  %4959 = vst.msk [vmem:[%s6846_s4 + $0xe8] sm:$0xf] %vm503_vm2, %v5407_v21  ;;  %v5408_v24 = vpack.c.bf16 %v2279_v22, %v2279_v22 }
 0x1be   : > { %v2002_v25 = vpop.f32.mrb[56].mxu0  ;;  %v2261_v27 = vpop.f32.mrb[56].mxu1 }
 0x1bf   : > { %4913 = vst.msk [vmem:[%s6846_s4 + $0xcc] sm:$0xf] %vm503_vm2, %v5400_v23  ;;  %v2003_v26 = vadd.f32 %v7166_v49, %v2002_v25  ;;  %v2004_v28 = vpop.f32.mrb[57].mxu0  ;;  %4960 = vst.msk [vmem:[%s6846_s4 + $0xec] sm:$0xf] %vm503_vm2, %v5408_v24  ;;  %v2262_v29 = vadd.f32 %v7166_v49, %v2261_v27  ;;  %v2263_v30 = vpop.f32.mrb[57].mxu1 }
 0x1c0   : > { %v2005_v31 = vpop.f32.mrb[58].mxu0  ;;  %v2264_v34 = vpop.f32.mrb[58].mxu1 }
 0x1c1   : > { %v2021_v32 = vmax.f32 %v2003_v26, 0.0  ;;  %v2006_v33 = vadd.f32 %v7166_v49, %v2005_v31  ;;  %v2007_v35 = vpop.f32.mrb[59].mxu0  ;;  %v2280_v36 = vmax.f32 %v2262_v29, 0.0  ;;  %v2265_v37 = vadd.f32 %v7166_v49, %v2264_v34  ;;  %v2266_v38 = vpop.f32.mrb[59].mxu1 }
 0x1c3   : > { %v5401_v39 = vpack.c.bf16 %v2021_v32, %v2021_v32  ;;  %v2022_v41 = vmax.f32 %v2006_v33, 0.0  ;;  %v5409_v42 = vpack.c.bf16 %v2280_v36, %v2280_v36  ;;  %v2281_v43 = vmax.f32 %v2265_v37, 0.0 }
 0x1c5   : > { %4914 = vst.msk [vmem:[%s6846_s4 + $0xd0] sm:$0xf] %vm503_vm2, %v5401_v39  ;;  %v5402_v44 = vpack.c.bf16 %v2022_v41, %v2022_v41  ;;  %4961 = vst.msk [vmem:[%s6846_s4 + $0xf0] sm:$0xf] %vm503_vm2, %v5409_v42  ;;  %v5410_v45 = vpack.c.bf16 %v2281_v43, %v2281_v43 }
 0x1c6   : > { %v2010_v46 = vpop.f32.mrb[60].mxu0  ;;  %v2269_v48 = vpop.f32.mrb[60].mxu1 }
 0x1c7   : > { %4915 = vst.msk [vmem:[%s6846_s4 + $0xd4] sm:$0xf] %vm503_vm2, %v5402_v44  ;;  %v2011_v47 = vadd.f32 %v7166_v49, %v2010_v46  ;;  %v2012_v40 = vpop.f32.mrb[61].mxu0  ;;  %4962 = vst.msk [vmem:[%s6846_s4 + $0xf4] sm:$0xf] %vm503_vm2, %v5410_v45  ;;  %v2270_v50 = vadd.f32 %v7166_v49, %v2269_v48  ;;  %v2271_v51 = vpop.f32.mrb[61].mxu1 }
 0x1c8   : > { %v2013_v52 = vpop.f32.mrb[62].mxu0  ;;  %v2272_v55 = vpop.f32.mrb[62].mxu1 }
 0x1c9   : > { %v2023_v53 = vmax.f32 %v2011_v47, 0.0  ;;  %v2014_v54 = vadd.f32 %v7166_v49, %v2013_v52  ;;  %v2015_v56 = vpop.f32.mrb[63].mxu0  ;;  %v2282_v57 = vmax.f32 %v2270_v50, 0.0  ;;  %v2273_v58 = vadd.f32 %v7166_v49, %v2272_v55  ;;  %v2274_v59 = vpop.f32.mrb[63].mxu1 }
 0x1cb   : > { %v5403_v60 = vpack.c.bf16 %v2023_v53, %v2023_v53  ;;  %v2024_v61 = vmax.f32 %v2014_v54, 0.0  ;;  %v5411_v62 = vpack.c.bf16 %v2282_v57, %v2282_v57  ;;  %v2283_v63 = vmax.f32 %v2273_v58, 0.0 }
 0x1cd   : > { %4916 = vst.msk [vmem:[%s6846_s4 + $0xd8] sm:$0xf] %vm503_vm2, %v5403_v60  ;;  %v5404_v1 = vpack.c.bf16 %v2024_v61, %v2024_v61  ;;  %4963 = vst.msk [vmem:[%s6846_s4 + $0xf8] sm:$0xf] %vm503_vm2, %v5411_v62  ;;  %v5412_v2 = vpack.c.bf16 %v2283_v63, %v2283_v63 }
 0x1cf   : > { %4917 = vst.msk [vmem:[%s6846_s4 + $0xdc] sm:$0xf] %vm503_vm2, %v5404_v1  ;;  %4964 = vst.msk [vmem:[%s6846_s4 + $0xfc] sm:$0xf] %vm503_vm2, %v5412_v2 }
 0x1d6   : > { %v2504_v3 = vpop.f32.mrb[64].mxu0  ;;  %v2763_v5 = vpop.f32.mrb[64].mxu1 }
 0x1d7   : > { %v2505_v4 = vadd.f32 %v7166_v49, %v2504_v3  ;;  %v2506_v6 = vpop.f32.mrb[65].mxu0  ;;  %v2764_v0 = vadd.f32 %v7166_v49, %v2763_v5  ;;  %v2765_v7 = vpop.f32.mrb[65].mxu1 }
 0x1d8   : > { %v2507_v8 = vpop.f32.mrb[66].mxu0  ;;  %v2766_v11 = vpop.f32.mrb[66].mxu1 }
 0x1d9   : > { %v2535_v9 = vmax.f32 %v2505_v4, 0.0  ;;  %v2508_v10 = vadd.f32 %v7166_v49, %v2507_v8  ;;  %v2509_v12 = vpop.f32.mrb[67].mxu0  ;;  %v2794_v13 = vmax.f32 %v2764_v0, 0.0  ;;  %v2767_v14 = vadd.f32 %v7166_v49, %v2766_v11  ;;  %v2768_v15 = vpop.f32.mrb[67].mxu1 }
 0x1db   : > { %v5413_v16 = vpack.c.bf16 %v2535_v9, %v2535_v9  ;;  %v2536_v17 = vmax.f32 %v2508_v10, 0.0  ;;  %v5421_v18 = vpack.c.bf16 %v2794_v13, %v2794_v13  ;;  %v2795_v19 = vmax.f32 %v2767_v14, 0.0 }
 0x1dd   : > { %5004 = vst.msk [vmem:[%s6846_s4 + $0x100] sm:$0xf] %vm503_vm2, %v5413_v16  ;;  %v5414_v20 = vpack.c.bf16 %v2536_v17, %v2536_v17  ;;  %5051 = vst.msk [vmem:[%s6846_s4 + $0x120] sm:$0xf] %vm503_vm2, %v5421_v18  ;;  %v5422_v21 = vpack.c.bf16 %v2795_v19, %v2795_v19 }
 0x1de   : > { %v2512_v22 = vpop.f32.mrb[68].mxu0  ;;  %v2771_v24 = vpop.f32.mrb[68].mxu1 }
 0x1df   : > { %5005 = vst.msk [vmem:[%s6846_s4 + $0x104] sm:$0xf] %vm503_vm2, %v5414_v20  ;;  %v2513_v23 = vadd.f32 %v7166_v49, %v2512_v22  ;;  %v2514_v25 = vpop.f32.mrb[69].mxu0  ;;  %5052 = vst.msk [vmem:[%s6846_s4 + $0x124] sm:$0xf] %vm503_vm2, %v5422_v21  ;;  %v2772_v26 = vadd.f32 %v7166_v49, %v2771_v24  ;;  %v2773_v27 = vpop.f32.mrb[69].mxu1 }
 0x1e0   : > { %v2515_v28 = vpop.f32.mrb[70].mxu0  ;;  %v2774_v31 = vpop.f32.mrb[70].mxu1 }
 0x1e1   : > { %v2537_v29 = vmax.f32 %v2513_v23, 0.0  ;;  %v2516_v30 = vadd.f32 %v7166_v49, %v2515_v28  ;;  %v2517_v32 = vpop.f32.mrb[71].mxu0  ;;  %v2796_v33 = vmax.f32 %v2772_v26, 0.0  ;;  %v2775_v34 = vadd.f32 %v7166_v49, %v2774_v31  ;;  %v2776_v35 = vpop.f32.mrb[71].mxu1 }
 0x1e3   : > { %v5415_v36 = vpack.c.bf16 %v2537_v29, %v2537_v29  ;;  %v2538_v37 = vmax.f32 %v2516_v30, 0.0  ;;  %v5423_v38 = vpack.c.bf16 %v2796_v33, %v2796_v33  ;;  %v2797_v39 = vmax.f32 %v2775_v34, 0.0 }
 0x1e5   : > { %5006 = vst.msk [vmem:[%s6846_s4 + $0x108] sm:$0xf] %vm503_vm2, %v5415_v36  ;;  %v5416_v41 = vpack.c.bf16 %v2538_v37, %v2538_v37  ;;  %5053 = vst.msk [vmem:[%s6846_s4 + $0x128] sm:$0xf] %vm503_vm2, %v5423_v38  ;;  %v5424_v42 = vpack.c.bf16 %v2797_v39, %v2797_v39 }
 0x1e6   : > { %v2520_v43 = vpop.f32.mrb[72].mxu0  ;;  %v2779_v45 = vpop.f32.mrb[72].mxu1 }
 0x1e7   : > { %5007 = vst.msk [vmem:[%s6846_s4 + $0x10c] sm:$0xf] %vm503_vm2, %v5416_v41  ;;  %v2521_v44 = vadd.f32 %v7166_v49, %v2520_v43  ;;  %v2522_v46 = vpop.f32.mrb[73].mxu0  ;;  %5054 = vst.msk [vmem:[%s6846_s4 + $0x12c] sm:$0xf] %vm503_vm2, %v5424_v42  ;;  %v2780_v47 = vadd.f32 %v7166_v49, %v2779_v45  ;;  %v2781_v48 = vpop.f32.mrb[73].mxu1 }
 0x1e8   : > { %v2523_v40 = vpop.f32.mrb[74].mxu0  ;;  %v2782_v52 = vpop.f32.mrb[74].mxu1 }
 0x1e9   : > { %v2539_v50 = vmax.f32 %v2521_v44, 0.0  ;;  %v2524_v51 = vadd.f32 %v7166_v49, %v2523_v40  ;;  %v2525_v53 = vpop.f32.mrb[75].mxu0  ;;  %v2798_v54 = vmax.f32 %v2780_v47, 0.0  ;;  %v2783_v55 = vadd.f32 %v7166_v49, %v2782_v52  ;;  %v2784_v56 = vpop.f32.mrb[75].mxu1 }
 0x1eb   : > { %v5417_v57 = vpack.c.bf16 %v2539_v50, %v2539_v50  ;;  %v2540_v58 = vmax.f32 %v2524_v51, 0.0  ;;  %v5425_v59 = vpack.c.bf16 %v2798_v54, %v2798_v54  ;;  %v2799_v60 = vmax.f32 %v2783_v55, 0.0 }
 0x1ed   : > { %5008 = vst.msk [vmem:[%s6846_s4 + $0x110] sm:$0xf] %vm503_vm2, %v5417_v57  ;;  %v5418_v61 = vpack.c.bf16 %v2540_v58, %v2540_v58  ;;  %5055 = vst.msk [vmem:[%s6846_s4 + $0x130] sm:$0xf] %vm503_vm2, %v5425_v59  ;;  %v5426_v62 = vpack.c.bf16 %v2799_v60, %v2799_v60 }
 0x1ee   : > { %v2528_v63 = vpop.f32.mrb[76].mxu0  ;;  %v2787_v2 = vpop.f32.mrb[76].mxu1 }
 0x1ef   : > { %5009 = vst.msk [vmem:[%s6846_s4 + $0x114] sm:$0xf] %vm503_vm2, %v5418_v61  ;;  %v2529_v1 = vadd.f32 %v7166_v49, %v2528_v63  ;;  %v2530_v3 = vpop.f32.mrb[77].mxu0  ;;  %5056 = vst.msk [vmem:[%s6846_s4 + $0x134] sm:$0xf] %vm503_vm2, %v5426_v62  ;;  %v2788_v4 = vadd.f32 %v7166_v49, %v2787_v2  ;;  %v2789_v5 = vpop.f32.mrb[77].mxu1 }
 0x1f0   : > { %v2531_v6 = vpop.f32.mrb[78].mxu0  ;;  %v2790_v8 = vpop.f32.mrb[78].mxu1 }
 0x1f1   : > { %v2541_v0 = vmax.f32 %v2529_v1, 0.0  ;;  %v2532_v7 = vadd.f32 %v7166_v49, %v2531_v6  ;;  %v2533_v9 = vpop.f32.mrb[79].mxu0  ;;  %v2800_v10 = vmax.f32 %v2788_v4, 0.0  ;;  %v2791_v11 = vadd.f32 %v7166_v49, %v2790_v8  ;;  %v2792_v12 = vpop.f32.mrb[79].mxu1 }
 0x1f3   : > { %v5419_v13 = vpack.c.bf16 %v2541_v0, %v2541_v0  ;;  %v2542_v14 = vmax.f32 %v2532_v7, 0.0  ;;  %v5427_v15 = vpack.c.bf16 %v2800_v10, %v2800_v10  ;;  %v2801_v16 = vmax.f32 %v2791_v11, 0.0 }
 0x1f5   : > { %5010 = vst.msk [vmem:[%s6846_s4 + $0x118] sm:$0xf] %vm503_vm2, %v5419_v13  ;;  %v5420_v17 = vpack.c.bf16 %v2542_v14, %v2542_v14  ;;  %5057 = vst.msk [vmem:[%s6846_s4 + $0x138] sm:$0xf] %vm503_vm2, %v5427_v15  ;;  %v5428_v18 = vpack.c.bf16 %v2801_v16, %v2801_v16 }
 0x1f7   : > { %5011 = vst.msk [vmem:[%s6846_s4 + $0x11c] sm:$0xf] %vm503_vm2, %v5420_v17  ;;  %5058 = vst.msk [vmem:[%s6846_s4 + $0x13c] sm:$0xf] %vm503_vm2, %v5428_v18 }
 0x1fe   : > { %v3022_v19 = vpop.f32.mrb[80].mxu0  ;;  %v3281_v21 = vpop.f32.mrb[80].mxu1 }
 0x1ff   : > { %v3023_v20 = vadd.f32 %v7166_v49, %v3022_v19  ;;  %v3024_v22 = vpop.f32.mrb[81].mxu0  ;;  %v3282_v23 = vadd.f32 %v7166_v49, %v3281_v21  ;;  %v3283_v24 = vpop.f32.mrb[81].mxu1 }
 0x200   : > { %v3025_v25 = vpop.f32.mrb[82].mxu0  ;;  %v3284_v28 = vpop.f32.mrb[82].mxu1 }
 0x201   : > { %v3053_v26 = vmax.f32 %v3023_v20, 0.0  ;;  %v3026_v27 = vadd.f32 %v7166_v49, %v3025_v25  ;;  %v3027_v29 = vpop.f32.mrb[83].mxu0  ;;  %v3312_v30 = vmax.f32 %v3282_v23, 0.0  ;;  %v3285_v31 = vadd.f32 %v7166_v49, %v3284_v28  ;;  %v3286_v32 = vpop.f32.mrb[83].mxu1 }
 0x203   : > { %v5429_v33 = vpack.c.bf16 %v3053_v26, %v3053_v26  ;;  %v3054_v34 = vmax.f32 %v3026_v27, 0.0  ;;  %v5437_v35 = vpack.c.bf16 %v3312_v30, %v3312_v30  ;;  %v3313_v36 = vmax.f32 %v3285_v31, 0.0 }
 0x205   : > { %5098 = vst.msk [vmem:[%s6846_s4 + $0x140] sm:$0xf] %vm503_vm2, %v5429_v33  ;;  %v5430_v37 = vpack.c.bf16 %v3054_v34, %v3054_v34  ;;  %5145 = vst.msk [vmem:[%s6846_s4 + $0x160] sm:$0xf] %vm503_vm2, %v5437_v35  ;;  %v5438_v38 = vpack.c.bf16 %v3313_v36, %v3313_v36 }
 0x206   : > { %v3030_v39 = vpop.f32.mrb[84].mxu0  ;;  %v3289_v42 = vpop.f32.mrb[84].mxu1 }
 0x207   : > { %5099 = vst.msk [vmem:[%s6846_s4 + $0x144] sm:$0xf] %vm503_vm2, %v5430_v37  ;;  %v3031_v41 = vadd.f32 %v7166_v49, %v3030_v39  ;;  %v3032_v43 = vpop.f32.mrb[85].mxu0  ;;  %5146 = vst.msk [vmem:[%s6846_s4 + $0x164] sm:$0xf] %vm503_vm2, %v5438_v38  ;;  %v3290_v44 = vadd.f32 %v7166_v49, %v3289_v42  ;;  %v3291_v45 = vpop.f32.mrb[85].mxu1 }
 0x208   : > { %v3033_v46 = vpop.f32.mrb[86].mxu0  ;;  %v3292_v40 = vpop.f32.mrb[86].mxu1 }
 0x209   : > { %v3055_v47 = vmax.f32 %v3031_v41, 0.0  ;;  %v3034_v48 = vadd.f32 %v7166_v49, %v3033_v46  ;;  %v3035_v50 = vpop.f32.mrb[87].mxu0  ;;  %v3314_v51 = vmax.f32 %v3290_v44, 0.0  ;;  %v3293_v52 = vadd.f32 %v7166_v49, %v3292_v40  ;;  %v3294_v53 = vpop.f32.mrb[87].mxu1 }
 0x20b   : > { %v5431_v54 = vpack.c.bf16 %v3055_v47, %v3055_v47  ;;  %v3056_v55 = vmax.f32 %v3034_v48, 0.0  ;;  %v5439_v56 = vpack.c.bf16 %v3314_v51, %v3314_v51  ;;  %v3315_v57 = vmax.f32 %v3293_v52, 0.0 }
 0x20d   : > { %5100 = vst.msk [vmem:[%s6846_s4 + $0x148] sm:$0xf] %vm503_vm2, %v5431_v54  ;;  %v5432_v58 = vpack.c.bf16 %v3056_v55, %v3056_v55  ;;  %5147 = vst.msk [vmem:[%s6846_s4 + $0x168] sm:$0xf] %vm503_vm2, %v5439_v56  ;;  %v5440_v59 = vpack.c.bf16 %v3315_v57, %v3315_v57 }
 0x20e   : > { %v3038_v60 = vpop.f32.mrb[88].mxu0  ;;  %v3297_v62 = vpop.f32.mrb[88].mxu1 }
 0x20f   : > { %5101 = vst.msk [vmem:[%s6846_s4 + $0x14c] sm:$0xf] %vm503_vm2, %v5432_v58  ;;  %v3039_v61 = vadd.f32 %v7166_v49, %v3038_v60  ;;  %v3040_v63 = vpop.f32.mrb[89].mxu0  ;;  %5148 = vst.msk [vmem:[%s6846_s4 + $0x16c] sm:$0xf] %vm503_vm2, %v5440_v59  ;;  %v3298_v1 = vadd.f32 %v7166_v49, %v3297_v62  ;;  %v3299_v2 = vpop.f32.mrb[89].mxu1 }
 0x210   : > { %v3041_v3 = vpop.f32.mrb[90].mxu0  ;;  %v3300_v6 = vpop.f32.mrb[90].mxu1 }
 0x211   : > { %v3057_v4 = vmax.f32 %v3039_v61, 0.0  ;;  %v3042_v5 = vadd.f32 %v7166_v49, %v3041_v3  ;;  %v3043_v0 = vpop.f32.mrb[91].mxu0  ;;  %v3316_v7 = vmax.f32 %v3298_v1, 0.0  ;;  %v3301_v8 = vadd.f32 %v7166_v49, %v3300_v6  ;;  %v3302_v9 = vpop.f32.mrb[91].mxu1 }
 0x213   : > { %v5433_v10 = vpack.c.bf16 %v3057_v4, %v3057_v4  ;;  %v3058_v11 = vmax.f32 %v3042_v5, 0.0  ;;  %v5441_v12 = vpack.c.bf16 %v3316_v7, %v3316_v7  ;;  %v3317_v13 = vmax.f32 %v3301_v8, 0.0 }
 0x215   : > { %5102 = vst.msk [vmem:[%s6846_s4 + $0x150] sm:$0xf] %vm503_vm2, %v5433_v10  ;;  %v5434_v14 = vpack.c.bf16 %v3058_v11, %v3058_v11  ;;  %5149 = vst.msk [vmem:[%s6846_s4 + $0x170] sm:$0xf] %vm503_vm2, %v5441_v12  ;;  %v5442_v15 = vpack.c.bf16 %v3317_v13, %v3317_v13 }
 0x216   : > { %v3046_v16 = vpop.f32.mrb[92].mxu0  ;;  %v3305_v18 = vpop.f32.mrb[92].mxu1 }
 0x217   : > { %5103 = vst.msk [vmem:[%s6846_s4 + $0x154] sm:$0xf] %vm503_vm2, %v5434_v14  ;;  %v3047_v17 = vadd.f32 %v7166_v49, %v3046_v16  ;;  %v3048_v19 = vpop.f32.mrb[93].mxu0  ;;  %5150 = vst.msk [vmem:[%s6846_s4 + $0x174] sm:$0xf] %vm503_vm2, %v5442_v15  ;;  %v3306_v20 = vadd.f32 %v7166_v49, %v3305_v18  ;;  %v3307_v21 = vpop.f32.mrb[93].mxu1 }
 0x218   : > { %v3049_v22 = vpop.f32.mrb[94].mxu0  ;;  %v3308_v25 = vpop.f32.mrb[94].mxu1 }
 0x219   : > { %v3059_v23 = vmax.f32 %v3047_v17, 0.0  ;;  %v3050_v24 = vadd.f32 %v7166_v49, %v3049_v22  ;;  %v3051_v26 = vpop.f32.mrb[95].mxu0  ;;  %v3318_v27 = vmax.f32 %v3306_v20, 0.0  ;;  %v3309_v28 = vadd.f32 %v7166_v49, %v3308_v25  ;;  %v3310_v29 = vpop.f32.mrb[95].mxu1 }
 0x21b   : > { %v5435_v30 = vpack.c.bf16 %v3059_v23, %v3059_v23  ;;  %v3060_v31 = vmax.f32 %v3050_v24, 0.0  ;;  %v5443_v32 = vpack.c.bf16 %v3318_v27, %v3318_v27  ;;  %v3319_v33 = vmax.f32 %v3309_v28, 0.0 }
 0x21d   : > { %5104 = vst.msk [vmem:[%s6846_s4 + $0x158] sm:$0xf] %vm503_vm2, %v5435_v30  ;;  %v5436_v34 = vpack.c.bf16 %v3060_v31, %v3060_v31  ;;  %5151 = vst.msk [vmem:[%s6846_s4 + $0x178] sm:$0xf] %vm503_vm2, %v5443_v32  ;;  %v5444_v35 = vpack.c.bf16 %v3319_v33, %v3319_v33 }
 0x21f   : > { %5105 = vst.msk [vmem:[%s6846_s4 + $0x15c] sm:$0xf] %vm503_vm2, %v5436_v34  ;;  %5152 = vst.msk [vmem:[%s6846_s4 + $0x17c] sm:$0xf] %vm503_vm2, %v5444_v35 }
 0x226   : > { %v3540_v36 = vpop.f32.mrb[96].mxu0  ;;  %v3799_v38 = vpop.f32.mrb[96].mxu1 }
 0x227   : > { %v3541_v37 = vadd.f32 %v7166_v49, %v3540_v36  ;;  %v3542_v39 = vpop.f32.mrb[97].mxu0  ;;  %v3800_v41 = vadd.f32 %v7166_v49, %v3799_v38  ;;  %v3801_v42 = vpop.f32.mrb[97].mxu1 }
 0x228   : > { %v3543_v43 = vpop.f32.mrb[98].mxu0  ;;  %v3802_v46 = vpop.f32.mrb[98].mxu1 }
 0x229   : > { %v3571_v44 = vmax.f32 %v3541_v37, 0.0  ;;  %v3544_v45 = vadd.f32 %v7166_v49, %v3543_v43  ;;  %v3545_v47 = vpop.f32.mrb[99].mxu0  ;;  %v3830_v48 = vmax.f32 %v3800_v41, 0.0  ;;  %v3803_v40 = vadd.f32 %v7166_v49, %v3802_v46  ;;  %v3804_v50 = vpop.f32.mrb[99].mxu1 }
 0x22b   : > { %v5445_v51 = vpack.c.bf16 %v3571_v44, %v3571_v44  ;;  %v3572_v52 = vmax.f32 %v3544_v45, 0.0  ;;  %v5453_v53 = vpack.c.bf16 %v3830_v48, %v3830_v48  ;;  %v3831_v54 = vmax.f32 %v3803_v40, 0.0 }
 0x22d   : > { %5192 = vst.msk [vmem:[%s6846_s4 + $0x180] sm:$0xf] %vm503_vm2, %v5445_v51  ;;  %v5446_v55 = vpack.c.bf16 %v3572_v52, %v3572_v52  ;;  %5239 = vst.msk [vmem:[%s6846_s4 + $0x1a0] sm:$0xf] %vm503_vm2, %v5453_v53  ;;  %v5454_v56 = vpack.c.bf16 %v3831_v54, %v3831_v54 }
 0x22e   : > { %v3548_v57 = vpop.f32.mrb[100].mxu0  ;;  %v3807_v59 = vpop.f32.mrb[100].mxu1 }
 0x22f   : > { %5193 = vst.msk [vmem:[%s6846_s4 + $0x184] sm:$0xf] %vm503_vm2, %v5446_v55  ;;  %v3549_v58 = vadd.f32 %v7166_v49, %v3548_v57  ;;  %v3550_v60 = vpop.f32.mrb[101].mxu0  ;;  %5240 = vst.msk [vmem:[%s6846_s4 + $0x1a4] sm:$0xf] %vm503_vm2, %v5454_v56  ;;  %v3808_v61 = vadd.f32 %v7166_v49, %v3807_v59  ;;  %v3809_v62 = vpop.f32.mrb[101].mxu1 }
 0x230   : > { %v3551_v63 = vpop.f32.mrb[102].mxu0  ;;  %v3810_v3 = vpop.f32.mrb[102].mxu1 }
 0x231   : > { %v3573_v1 = vmax.f32 %v3549_v58, 0.0  ;;  %v3552_v2 = vadd.f32 %v7166_v49, %v3551_v63  ;;  %v3553_v4 = vpop.f32.mrb[103].mxu0  ;;  %v3832_v5 = vmax.f32 %v3808_v61, 0.0  ;;  %v3811_v6 = vadd.f32 %v7166_v49, %v3810_v3  ;;  %v3812_v0 = vpop.f32.mrb[103].mxu1 }
 0x233   : > { %v5447_v7 = vpack.c.bf16 %v3573_v1, %v3573_v1  ;;  %v3574_v8 = vmax.f32 %v3552_v2, 0.0  ;;  %v5455_v9 = vpack.c.bf16 %v3832_v5, %v3832_v5  ;;  %v3833_v10 = vmax.f32 %v3811_v6, 0.0 }
 0x235   : > { %5194 = vst.msk [vmem:[%s6846_s4 + $0x188] sm:$0xf] %vm503_vm2, %v5447_v7  ;;  %v5448_v11 = vpack.c.bf16 %v3574_v8, %v3574_v8  ;;  %5241 = vst.msk [vmem:[%s6846_s4 + $0x1a8] sm:$0xf] %vm503_vm2, %v5455_v9  ;;  %v5456_v12 = vpack.c.bf16 %v3833_v10, %v3833_v10 }
 0x236   : > { %v3556_v13 = vpop.f32.mrb[104].mxu0  ;;  %v3815_v15 = vpop.f32.mrb[104].mxu1 }
 0x237   : > { %5195 = vst.msk [vmem:[%s6846_s4 + $0x18c] sm:$0xf] %vm503_vm2, %v5448_v11  ;;  %v3557_v14 = vadd.f32 %v7166_v49, %v3556_v13  ;;  %v3558_v16 = vpop.f32.mrb[105].mxu0  ;;  %5242 = vst.msk [vmem:[%s6846_s4 + $0x1ac] sm:$0xf] %vm503_vm2, %v5456_v12  ;;  %v3816_v17 = vadd.f32 %v7166_v49, %v3815_v15  ;;  %v3817_v18 = vpop.f32.mrb[105].mxu1 }
 0x238   : > { %v3559_v19 = vpop.f32.mrb[106].mxu0  ;;  %v3818_v22 = vpop.f32.mrb[106].mxu1 }
 0x239   : > { %v3575_v20 = vmax.f32 %v3557_v14, 0.0  ;;  %v3560_v21 = vadd.f32 %v7166_v49, %v3559_v19  ;;  %v3561_v23 = vpop.f32.mrb[107].mxu0  ;;  %v3834_v24 = vmax.f32 %v3816_v17, 0.0  ;;  %v3819_v25 = vadd.f32 %v7166_v49, %v3818_v22  ;;  %v3820_v26 = vpop.f32.mrb[107].mxu1 }
 0x23b   : > { %v5449_v27 = vpack.c.bf16 %v3575_v20, %v3575_v20  ;;  %v3576_v28 = vmax.f32 %v3560_v21, 0.0  ;;  %v5457_v29 = vpack.c.bf16 %v3834_v24, %v3834_v24  ;;  %v3835_v30 = vmax.f32 %v3819_v25, 0.0 }
 0x23d   : > { %5196 = vst.msk [vmem:[%s6846_s4 + $0x190] sm:$0xf] %vm503_vm2, %v5449_v27  ;;  %v5450_v31 = vpack.c.bf16 %v3576_v28, %v3576_v28  ;;  %5243 = vst.msk [vmem:[%s6846_s4 + $0x1b0] sm:$0xf] %vm503_vm2, %v5457_v29  ;;  %v5458_v32 = vpack.c.bf16 %v3835_v30, %v3835_v30 }
 0x23e   : > { %v3564_v33 = vpop.f32.mrb[108].mxu0  ;;  %v3823_v35 = vpop.f32.mrb[108].mxu1 }
 0x23f   : > { %5197 = vst.msk [vmem:[%s6846_s4 + $0x194] sm:$0xf] %vm503_vm2, %v5450_v31  ;;  %v3565_v34 = vadd.f32 %v7166_v49, %v3564_v33  ;;  %v3566_v36 = vpop.f32.mrb[109].mxu0  ;;  %5244 = vst.msk [vmem:[%s6846_s4 + $0x1b4] sm:$0xf] %vm503_vm2, %v5458_v32  ;;  %v3824_v37 = vadd.f32 %v7166_v49, %v3823_v35  ;;  %v3825_v38 = vpop.f32.mrb[109].mxu1 }
 0x240   : > { %v3567_v39 = vpop.f32.mrb[110].mxu0  ;;  %v3826_v43 = vpop.f32.mrb[110].mxu1 }
 0x241   : > { %v3577_v41 = vmax.f32 %v3565_v34, 0.0  ;;  %v3568_v42 = vadd.f32 %v7166_v49, %v3567_v39  ;;  %v3569_v44 = vpop.f32.mrb[111].mxu0  ;;  %v3836_v45 = vmax.f32 %v3824_v37, 0.0  ;;  %v3827_v46 = vadd.f32 %v7166_v49, %v3826_v43  ;;  %v3828_v47 = vpop.f32.mrb[111].mxu1 }
 0x243   : > { %v5451_v48 = vpack.c.bf16 %v3577_v41, %v3577_v41  ;;  %v3578_v40 = vmax.f32 %v3568_v42, 0.0  ;;  %v5459_v50 = vpack.c.bf16 %v3836_v45, %v3836_v45  ;;  %v3837_v51 = vmax.f32 %v3827_v46, 0.0 }
 0x245   : > { %5198 = vst.msk [vmem:[%s6846_s4 + $0x198] sm:$0xf] %vm503_vm2, %v5451_v48  ;;  %v5452_v52 = vpack.c.bf16 %v3578_v40, %v3578_v40  ;;  %5245 = vst.msk [vmem:[%s6846_s4 + $0x1b8] sm:$0xf] %vm503_vm2, %v5459_v50  ;;  %v5460_v53 = vpack.c.bf16 %v3837_v51, %v3837_v51 }
 0x247   : > { %5199 = vst.msk [vmem:[%s6846_s4 + $0x19c] sm:$0xf] %vm503_vm2, %v5452_v52  ;;  %5246 = vst.msk [vmem:[%s6846_s4 + $0x1bc] sm:$0xf] %vm503_vm2, %v5460_v53 }
 0x24e   : > { %v4058_v54 = vpop.f32.mrb[112].mxu0  ;;  %v4317_v56 = vpop.f32.mrb[112].mxu1 }
 0x24f   : > { %v4059_v55 = vadd.f32 %v7166_v49, %v4058_v54  ;;  %v4060_v57 = vpop.f32.mrb[113].mxu0  ;;  %v4318_v58 = vadd.f32 %v7166_v49, %v4317_v56  ;;  %v4319_v59 = vpop.f32.mrb[113].mxu1 }
 0x250   : > { %v4061_v60 = vpop.f32.mrb[114].mxu0  ;;  %v4320_v63 = vpop.f32.mrb[114].mxu1 }
 0x251   : > { %v4089_v61 = vmax.f32 %v4059_v55, 0.0  ;;  %v4062_v62 = vadd.f32 %v7166_v49, %v4061_v60  ;;  %v4063_v1 = vpop.f32.mrb[115].mxu0  ;;  %v4348_v2 = vmax.f32 %v4318_v58, 0.0  ;;  %v4321_v3 = vadd.f32 %v7166_v49, %v4320_v63  ;;  %v4322_v4 = vpop.f32.mrb[115].mxu1 }
 0x253   : > { %v5461_v5 = vpack.c.bf16 %v4089_v61, %v4089_v61  ;;  %v4090_v6 = vmax.f32 %v4062_v62, 0.0  ;;  %v5469_v0 = vpack.c.bf16 %v4348_v2, %v4348_v2  ;;  %v4349_v7 = vmax.f32 %v4321_v3, 0.0 }
 0x255   : > { %5286 = vst.msk [vmem:[%s6846_s4 + $0x1c0] sm:$0xf] %vm503_vm2, %v5461_v5  ;;  %v5462_v8 = vpack.c.bf16 %v4090_v6, %v4090_v6  ;;  %5333 = vst.msk [vmem:[%s6846_s4 + $0x1e0] sm:$0xf] %vm503_vm2, %v5469_v0  ;;  %v5470_v9 = vpack.c.bf16 %v4349_v7, %v4349_v7 }
 0x256   : > { %v4066_v10 = vpop.f32.mrb[116].mxu0  ;;  %v4325_v12 = vpop.f32.mrb[116].mxu1 }
 0x257   : > { %5287 = vst.msk [vmem:[%s6846_s4 + $0x1c4] sm:$0xf] %vm503_vm2, %v5462_v8  ;;  %v4067_v11 = vadd.f32 %v7166_v49, %v4066_v10  ;;  %v4068_v13 = vpop.f32.mrb[117].mxu0  ;;  %5334 = vst.msk [vmem:[%s6846_s4 + $0x1e4] sm:$0xf] %vm503_vm2, %v5470_v9  ;;  %v4326_v14 = vadd.f32 %v7166_v49, %v4325_v12  ;;  %v4327_v15 = vpop.f32.mrb[117].mxu1 }
 0x258   : > { %v4069_v16 = vpop.f32.mrb[118].mxu0  ;;  %v4328_v19 = vpop.f32.mrb[118].mxu1 }
 0x259   : > { %v4091_v17 = vmax.f32 %v4067_v11, 0.0  ;;  %v4070_v18 = vadd.f32 %v7166_v49, %v4069_v16  ;;  %v4071_v20 = vpop.f32.mrb[119].mxu0  ;;  %v4350_v21 = vmax.f32 %v4326_v14, 0.0  ;;  %v4329_v22 = vadd.f32 %v7166_v49, %v4328_v19  ;;  %v4330_v23 = vpop.f32.mrb[119].mxu1 }
 0x25b   : > { %v5463_v24 = vpack.c.bf16 %v4091_v17, %v4091_v17  ;;  %v4092_v25 = vmax.f32 %v4070_v18, 0.0  ;;  %v5471_v26 = vpack.c.bf16 %v4350_v21, %v4350_v21  ;;  %v4351_v27 = vmax.f32 %v4329_v22, 0.0 }
 0x25d   : > { %5288 = vst.msk [vmem:[%s6846_s4 + $0x1c8] sm:$0xf] %vm503_vm2, %v5463_v24  ;;  %v5464_v28 = vpack.c.bf16 %v4092_v25, %v4092_v25  ;;  %5335 = vst.msk [vmem:[%s6846_s4 + $0x1e8] sm:$0xf] %vm503_vm2, %v5471_v26  ;;  %v5472_v29 = vpack.c.bf16 %v4351_v27, %v4351_v27 }
 0x25e   : > { %v4074_v30 = vpop.f32.mrb[120].mxu0  ;;  %v4333_v32 = vpop.f32.mrb[120].mxu1 }
 0x25f   : > { %5289 = vst.msk [vmem:[%s6846_s4 + $0x1cc] sm:$0xf] %vm503_vm2, %v5464_v28  ;;  %v4075_v31 = vadd.f32 %v7166_v49, %v4074_v30  ;;  %v4076_v33 = vpop.f32.mrb[121].mxu0  ;;  %5336 = vst.msk [vmem:[%s6846_s4 + $0x1ec] sm:$0xf] %vm503_vm2, %v5472_v29  ;;  %v4334_v34 = vadd.f32 %v7166_v49, %v4333_v32  ;;  %v4335_v35 = vpop.f32.mrb[121].mxu1 }
 0x260   : > { %v4077_v36 = vpop.f32.mrb[122].mxu0  ;;  %v4336_v39 = vpop.f32.mrb[122].mxu1 }
 0x261   : > { %v4093_v37 = vmax.f32 %v4075_v31, 0.0  ;;  %v4078_v38 = vadd.f32 %v7166_v49, %v4077_v36  ;;  %v4079_v41 = vpop.f32.mrb[123].mxu0  ;;  %v4352_v42 = vmax.f32 %v4334_v34, 0.0  ;;  %v4337_v43 = vadd.f32 %v7166_v49, %v4336_v39  ;;  %v4338_v44 = vpop.f32.mrb[123].mxu1 }
 0x263   : > { %v5465_v45 = vpack.c.bf16 %v4093_v37, %v4093_v37  ;;  %v4094_v46 = vmax.f32 %v4078_v38, 0.0  ;;  %v5473_v47 = vpack.c.bf16 %v4352_v42, %v4352_v42  ;;  %v4353_v48 = vmax.f32 %v4337_v43, 0.0 }
 0x265   : > { %5290 = vst.msk [vmem:[%s6846_s4 + $0x1d0] sm:$0xf] %vm503_vm2, %v5465_v45  ;;  %v5466_v40 = vpack.c.bf16 %v4094_v46, %v4094_v46  ;;  %5337 = vst.msk [vmem:[%s6846_s4 + $0x1f0] sm:$0xf] %vm503_vm2, %v5473_v47  ;;  %v5474_v50 = vpack.c.bf16 %v4353_v48, %v4353_v48 }
 0x266   : > { %v4082_v51 = vpop.f32.mrb[124].mxu0  ;;  %v4341_v53 = vpop.f32.mrb[124].mxu1 }
 0x267   : > { %5291 = vst.msk [vmem:[%s6846_s4 + $0x1d4] sm:$0xf] %vm503_vm2, %v5466_v40  ;;  %v4083_v52 = vadd.f32 %v7166_v49, %v4082_v51  ;;  %v4084_v54 = vpop.f32.mrb[125].mxu0  ;;  %5338 = vst.msk [vmem:[%s6846_s4 + $0x1f4] sm:$0xf] %vm503_vm2, %v5474_v50  ;;  %v4342_v55 = vadd.f32 %v7166_v49, %v4341_v53  ;;  %v4343_v56 = vpop.f32.mrb[125].mxu1 }
 0x268   : > { %v4085_v57 = vpop.f32.mrb[126].mxu0  ;;  %v4344_v60 = vpop.f32.mrb[126].mxu1 }
 0x269   : > { %v4095_v58 = vmax.f32 %v4083_v52, 0.0  ;;  %v4086_v59 = vadd.f32 %v7166_v49, %v4085_v57  ;;  %v4087_v61 = vpop.f32.mrb[127].mxu0  ;;  %v4354_v62 = vmax.f32 %v4342_v55, 0.0  ;;  %v4345_v63 = vadd.f32 %v7166_v49, %v4344_v60  ;;  %v4346_v1 = vpop.f32.mrb[127].mxu1 }
 0x26b   : > { %v5467_v2 = vpack.c.bf16 %v4095_v58, %v4095_v58  ;;  %v4096_v3 = vmax.f32 %v4086_v59, 0.0  ;;  %v5475_v4 = vpack.c.bf16 %v4354_v62, %v4354_v62  ;;  %v4355_v5 = vmax.f32 %v4345_v63, 0.0 }
 0x26d   : > { %5292 = vst.msk [vmem:[%s6846_s4 + $0x1d8] sm:$0xf] %vm503_vm2, %v5467_v2  ;;  %v5468_v6 = vpack.c.bf16 %v4096_v3, %v4096_v3  ;;  %5339 = vst.msk [vmem:[%s6846_s4 + $0x1f8] sm:$0xf] %vm503_vm2, %v5475_v4  ;;  %v5476_v49 = vpack.c.bf16 %v4355_v5, %v4355_v5 }
 0x26f   : > { %5293 = vst.msk [vmem:[%s6846_s4 + $0x1dc] sm:$0xf] %vm503_vm2, %v5468_v6  ;;  %5340 = vst.msk [vmem:[%s6846_s4 + $0x1fc] sm:$0xf] %vm503_vm2, %v5476_v49 }
 0x270   : > { %5939 = shalt.err (!%p5936_p5)
}
 0x271   : > { %s5940_s4 = scalar_lea.hbm %s7407_s10, 8192  ;;  %s5944_s5 = scalar_lea.hbm %s7467_s3, 16384 }
 0x272   : > { %p5941_p4 = scmp.ne.s32.totalorder %s7407_s10, %s5940_s4  ;;  %p5945_p12 = scmp.lt.u32.totalorder %s7407_s10, %s7467_s3 }
 0x273   : > { %p5946_p1 = scmp.lt.u32.totalorder %s5944_s5, %s5940_s4  ;;  %p5948_p8 = scmp.lt.u32.totalorder %s5940_s4, %s7407_s10 }
 0x274   : > { %p5942_p7 = pnand %p5941_p4, %p7475_p9 }
 0x275   : > { %p5947_p3 = por %p5946_p1, %p5945_p12 }
 0x276   : > { %p5943_p10 = pneg %p5942_p7 }
 0x277   : > { %p5949_p11 = por %p5948_p8, %p5947_p3 }
 0x279   : > { %p5950_p0 = pnand %p5949_p11, %p5943_p10 }
 0x27b   : > { %5953 = shalt.err (!%p5950_p0)
}
 0x27c   : > { %s6015_s18 = smov 64   ;;  %s6016_s19 = smov 4  }
 0x27d   : > { %5481 = dma.vmem_to_hbm [thread:$0]  (%p7475_p9), %s7409_s6, 8192, %s7407_s10, %s4398_s15, %s6015_s18, %s6015_s18, %s6016_s19  }
 0x27e PF: > { %s4430_s8 = sand.u32 1, %s5988_s12   ;;  %p7476_p6 = scmp.ne.s32.totalorder %s7472_s27, 0 }
 0x27f   : > { %p7477_p13 = scmp.ge.s32.totalorder %s6008_s17, 2  ;;  %s4431_s9 = scalar_lea.sflag [#allocation4], %s4430_s8 }
 0x281   : > { %p5488_p2 = pnand %p7477_p13, %p7476_p6 }
 0x283   : > { %5983 = dma.done.wait (!%p5488_p2), %s4431_s9, 8192  }
 0x284   : > { %5985 = vsyncadd (!%p5488_p2), %s4431_s9, 4294959104  ;;  %s19_s17 = sadd.s32 1, %s6008_s17   ;;  %s7478_s12 = smov %s5992_s13 }
 0x285   : > { %p16_p5 = scmp.ge.s32.totalorder %s19_s17, 4   ;;  %s7479_s13 = smov %s5996_s14 }
 0x286   : > { %s7480_s14 = smov %s6093_s26  ;;  %s7481_s15 = smov %s6004_s16 }
 0x287   : > { %s7482_s16 = smov %s7484_s20  ;;  %18 = sbr.rel (!%p16_p5) target bundleno = 6 (0x6), region = 114 }
 0x28e   :  { %4436 = vsyncpa [#allocation3], 1 }
 0x28f   :  { %4438 = vsyncpa [#allocation3 + $0x1], 1 }
 0x290   :  { %4439 = vsyncpa [#allocation4], 1 }
 0x291   :  { %4441 = vsyncpa [#allocation4 + $0x1], 1 }

</bundles_post_ra>
